<compile_context>
chip_gen: v7x
topology: tpu7x:2x2x1
jax: 0.10.0
libtpu: 0.0.40
codegen_flags: <defaults>
</compile_context>

<pallas_src>
import functools

import numpy as np
import jax
import jax.numpy as jnp
from jax import lax
from jax.experimental import pallas as pl
from jax.experimental.pallas import tpu as pltpu

_EXPANSION = 4
_BN_EPS = 1e-5
_LANE = 128


def _ceil_to(v, m):
    return (v + m - 1) // m * m


def _avgpool_rows(h, H, W, s):
    """AvgPool2d(s) on an (H*W, C) activation (rows h-major, w-minor)."""
    if s == 1:
        return h
    C = h.shape[-1]
    Ho, Wo = H // s, W // s
    # Pool along W: fold s adjacent spatial columns into the lane dim.
    t = h.reshape(H * Wo, s * C)
    tw = t[:, 0:C]
    for j in range(1, s):
        tw = tw + t[:, j * C:(j + 1) * C]
    # Pool along H.
    t2 = tw.reshape(Ho, s * Wo * C)
    th = t2[:, 0:Wo * C]
    for i in range(1, s):
        th = th + t2[:, i * Wo * C:(i + 1) * Wo * C]
    return th.reshape(Ho * Wo, C) * (1.0 / float(s * s))


def _conv_bn_relu_stack(H, W, Pp, x2d, w1_ref, s1_ref, b1_ref,
                        w2_ref, s2_ref, b2_ref, pad_ref):
    """conv1(1x1)+bn1+relu1 -> conv2(3x3,pad=1)+bn2+relu2. Returns (H*W, Pp) f32."""
    f32 = jnp.float32

    # conv1 (1x1, no bias) + folded BN affine + relu  (MXU bf16, acc f32)
    h1 = jnp.dot(x2d, w1_ref[...], preferred_element_type=f32)
    h1 = jnp.maximum(h1 * s1_ref[...] + b1_ref[...], 0.0)        # (H*W, Pp)

    # Zero only the 1-pixel halo; interior is fully overwritten each step.
    zrow = jnp.zeros((1, W + 2, Pp), pad_ref.dtype)
    pad_ref[0:1, :, :] = zrow
    pad_ref[H + 1:H + 2, :, :] = zrow
    zcol = jnp.zeros((H, 1, Pp), pad_ref.dtype)
    pad_ref[1:H + 1, 0:1, :] = zcol
    pad_ref[1:H + 1, W + 1:W + 2, :] = zcol
    pad_ref[1:H + 1, 1:W + 1, :] = h1.astype(pad_ref.dtype).reshape(H, W, Pp)

    padv = pad_ref[...]                                          # (H+2, W+2, Pp) bf16
    # im2col along W only (single lane concat); the three kh taps are then
    # free leading-dim offsets.  One matmul per kh with K = 3*Pp.
    col = jnp.concatenate(
        [padv[:, 0:W, :], padv[:, 1:W + 1, :], padv[:, 2:W + 2, :]], axis=-1)

    acc = jnp.zeros((H * W, Pp), f32)
    for kh in range(3):
        tap = col[kh:kh + H].reshape(H * W, 3 * Pp)              # (H*W, 3*Pp) bf16
        wk = w2_ref[kh * 3 * Pp:(kh + 1) * 3 * Pp, :]            # (3*Pp, Pp)
        acc = acc + jnp.dot(tap, wk, preferred_element_type=f32)

    return jnp.maximum(acc * s2_ref[...] + b2_ref[...], 0.0)     # (H*W, Pp) f32


def _bottleneck_ds_kernel(H, W, stride, Pp,
                          x_ref, w1_ref, s1_ref, b1_ref,
                          w2_ref, s2_ref, b2_ref,
                          w3_ref, s3_ref, b3_ref,
                          wd_ref, sd_ref, bd_ref,
                          out_ref, pad_ref):
    """Bottleneck with avgpool + 1x1 downsample branch (one image per program)."""
    f32 = jnp.float32
    bf = x_ref.dtype
    x2d = x_ref[0]                                               # (H*W, Cinp) bf16

    h2 = _conv_bn_relu_stack(H, W, Pp, x2d, w1_ref, s1_ref, b1_ref,
                             w2_ref, s2_ref, b2_ref, pad_ref)

    # AvgPool2d(stride) on the VPU (reshape + adds)
    pooled = _avgpool_rows(h2, H, W, stride)                     # (Ho*Wo, Pp) f32

    # conv3 (1x1) + bn3
    main = jnp.dot(pooled.astype(bf), w3_ref[...], preferred_element_type=f32)
    main = main * s3_ref[...] + b3_ref[...]                      # (Ho*Wo, Coutp)

    # downsample branch: avgpool(x) -> 1x1 conv -> bn
    px = _avgpool_rows(x2d.astype(f32), H, W, stride)            # (Ho*Wo, Cinp)
    ident = jnp.dot(px.astype(bf), wd_ref[...], preferred_element_type=f32)
    ident = ident * sd_ref[...] + bd_ref[...]

    out_ref[0] = jnp.maximum(main + ident, 0.0).astype(out_ref.dtype)


def _bottleneck_id_kernel(H, W, Pp,
                          x_ref, w1_ref, s1_ref, b1_ref,
                          w2_ref, s2_ref, b2_ref,
                          w3_ref, s3_ref, b3_ref,
                          out_ref, pad_ref):
    """Bottleneck with identity skip (stride==1, Cin==Cout): no pool/downsample."""
    f32 = jnp.float32
    x2d = x_ref[0]                                               # (H*W, Cp) bf16

    h2 = _conv_bn_relu_stack(H, W, Pp, x2d, w1_ref, s1_ref, b1_ref,
                             w2_ref, s2_ref, b2_ref, pad_ref)

    main = jnp.dot(h2.astype(x_ref.dtype), w3_ref[...], preferred_element_type=f32)
    main = main * s3_ref[...] + b3_ref[...]                      # (H*W, Coutp)
    ident = x2d.astype(f32)                                      # Cin == Cout

    out_ref[0] = jnp.maximum(main + ident, 0.0).astype(out_ref.dtype)


def bottleneck_forward(x_nchw, params, stride):
    N, Cin, H, W = x_nchw.shape
    assert H % stride == 0 and W % stride == 0
    P = params['w1'].shape[1]
    Cout = params['w3'].shape[1]
    Ho, Wo = H // stride, W // stride
    has_ds = params['has_downsample']
    if not has_ds:
        assert stride == 1 and Cin == Cout

    Cinp = _ceil_to(Cin, _LANE)
    Pp = _ceil_to(P, _LANE)
    Coutp = _ceil_to(Cout, _LANE)
    bf16, f32 = jnp.bfloat16, jnp.float32

    # Glue: NCHW -> (N, H*W, Cin_pad) lane-dense bf16 rows.
    x = jnp.transpose(x_nchw, (0, 2, 3, 1)).reshape(N, H * W, Cin)
    x = jnp.pad(x, ((0, 0), (0, 0), (0, Cinp - Cin))).astype(bf16)

    def pad_w(w, r, c):
        return jnp.pad(w, ((0, r - w.shape[0]), (0, c - w.shape[1]))).astype(bf16)

    def pad_affine(s, b, c):
        return (jnp.pad(s, ((0, 0), (0, c - s.shape[1]))).astype(f32),
                jnp.pad(b, ((0, 0), (0, c - b.shape[1]))).astype(f32))

    w1 = pad_w(params['w1'], Cinp, Pp)
    s1, b1 = pad_affine(params['s1'], params['b1'], Pp)
    # w2: (3,3,P,P) HWIO -> channel pad -> (9*Pp, Pp), rows ordered (kh, kw, cin)
    w2 = jnp.pad(params['w2'], ((0, 0), (0, 0), (0, Pp - P), (0, Pp - P)))
    w2 = w2.reshape(9 * Pp, Pp).astype(bf16)
    s2, b2 = pad_affine(params['s2'], params['b2'], Pp)
    w3 = pad_w(params['w3'], Pp, Coutp)
    s3, b3 = pad_affine(params['s3'], params['b3'], Coutp)

    def whole(a):
        nd = a.ndim
        return pl.BlockSpec(a.shape, lambda n, _nd=nd: (0,) * _nd)

    x_spec = pl.BlockSpec((1, H * W, Cinp), lambda n: (n, 0, 0))
    out_spec = pl.BlockSpec((1, Ho * Wo, Coutp), lambda n: (n, 0, 0))

    if has_ds:
        wd = pad_w(params['wd'], Cinp, Coutp)
        sd, bd = pad_affine(params['sd'], params['bd'], Coutp)
        kernel = functools.partial(_bottleneck_ds_kernel, H, W, stride, Pp)
        args = (x, w1, s1, b1, w2, s2, b2, w3, s3, b3, wd, sd, bd)
    else:
        kernel = functools.partial(_bottleneck_id_kernel, H, W, Pp)
        args = (x, w1, s1, b1, w2, s2, b2, w3, s3, b3)

    in_specs = [x_spec] + [whole(a) for a in args[1:]]

    out = pl.pallas_call(
        kernel,
        out_shape=jax.ShapeDtypeStruct((N, Ho * Wo, Coutp), f32),
        grid_spec=pltpu.PrefetchScalarGridSpec(
            num_scalar_prefetch=0,
            grid=(N,),
            in_specs=in_specs,
            out_specs=out_spec,
            scratch_shapes=[pltpu.VMEM((H + 2, W + 2, Pp), bf16)]),
        compiler_params=pltpu.CompilerParams(
            dimension_semantics=("parallel",),
            vmem_limit_bytes=48 * 1024 * 1024),
    )(*args)

    out = out[:, :, :Cout].reshape(N, Ho, Wo, Cout)
    return jnp.transpose(out, (0, 3, 1, 2))                      # back to NCHW


# ----------------------------- params / reference -----------------------------

def _bn_raw(key, c):
    k1, k2, k3, k4 = jax.random.split(key, 4)
    gamma = jax.random.uniform(k1, (c,), jnp.float32, 0.5, 1.5)
    beta = 0.1 * jax.random.normal(k2, (c,), jnp.float32)
    mean = 0.1 * jax.random.normal(k3, (c,), jnp.float32)
    var = jax.random.uniform(k4, (c,), jnp.float32, 0.5, 1.5)
    return gamma, beta, mean, var


def _bn_fold(bn):
    gamma, beta, mean, var = bn
    scale = gamma / jnp.sqrt(var + _BN_EPS)
    shift = beta - mean * scale
    return scale[None, :], shift[None, :]


def init_bottleneck_params(key, inplanes, planes, stride):
    cout = planes * _EXPANSION
    ks = jax.random.split(key, 8)
    p = {}
    p['w1'] = jax.random.normal(ks[0], (inplanes, planes), jnp.float32) / np.sqrt(inplanes)
    p['bn1'] = _bn_raw(ks[1], planes)
    p['w2'] = jax.random.normal(ks[2], (3, 3, planes, planes), jnp.float32) / np.sqrt(9 * planes)
    p['bn2'] = _bn_raw(ks[3], planes)
    p['w3'] = jax.random.normal(ks[4], (planes, cout), jnp.float32) / np.sqrt(planes)
    p['bn3'] = _bn_raw(ks[5], cout)
    p['s1'], p['b1'] = _bn_fold(p['bn1'])
    p['s2'], p['b2'] = _bn_fold(p['bn2'])
    p['s3'], p['b3'] = _bn_fold(p['bn3'])
    p['has_downsample'] = (stride > 1) or (inplanes != cout)
    if p['has_downsample']:
        p['wd'] = jax.random.normal(ks[6], (inplanes, cout), jnp.float32) / np.sqrt(inplanes)
        p['bnd'] = _bn_raw(ks[7], cout)
        p['sd'], p['bd'] = _bn_fold(p['bnd'])
    return p


def bottleneck_reference(x_nchw, p, stride):
    """Plain-JAX NHWC reference of the PyTorch forward (inference-mode BN)."""
    dn = ('NHWC', 'HWIO', 'NHWC')

    def conv(x, w, pad):
        return lax.conv_general_dilated(x, w, (1, 1), pad, dimension_numbers=dn)

    def bn(x, raw):
        gamma, beta, mean, var = raw
        return (x - mean) / jnp.sqrt(var + _BN_EPS) * gamma + beta

    def avgpool(x, s):
        if s == 1:
            return x
        y = lax.reduce_window(x, 0.0, lax.add, (1, s, s, 1), (1, s, s, 1), 'VALID')
        return y / float(s * s)

    x = jnp.transpose(x_nchw, (0, 2, 3, 1))
    out = jax.nn.relu(bn(conv(x, p['w1'][None, None], 'VALID'), p['bn1']))
    out = jax.nn.relu(bn(conv(out, p['w2'], ((1, 1), (1, 1))), p['bn2']))
    out = avgpool(out, stride)
    out = bn(conv(out, p['w3'][None, None], 'VALID'), p['bn3'])
    if p['has_downsample']:
        ident = bn(conv(avgpool(x, stride), p['wd'][None, None], 'VALID'), p['bnd'])
    else:
        ident = x
    out = jax.nn.relu(out + ident)
    return jnp.transpose(out, (0, 3, 1, 2))


if __name__ == "__main__":
    key = jax.random.PRNGKey(0)

    # Case 1: downsampling block (stride=2, channel expansion) — demo spec shapes.
    N, inplanes, planes, stride = 2, 4, 4, 2
    H = W = 16
    kx, kp, key = jax.random.split(key, 3)
    x = jax.random.normal(kx, (N, inplanes, H, W), jnp.float32)   # NCHW like PyTorch
    params = init_bottleneck_params(kp, inplanes, planes, stride)

    out = jax.block_until_ready(bottleneck_forward(x, params, stride))
    ref = jax.block_until_ready(bottleneck_reference(x, params, stride))
    assert out.shape == (N, planes * _EXPANSION, H // stride, W // stride)
    np.testing.assert_allclose(np.asarray(out), np.asarray(ref), rtol=3e-2, atol=3e-2)

    # Case 2: identity block (stride=1, inplanes == planes*4) — specialized kernel.
    inplanes2, planes2, stride2 = 16, 4, 1
    kx2, kp2 = jax.random.split(key)
    x2 = jax.random.normal(kx2, (N, inplanes2, H, W), jnp.float32)
    params2 = init_bottleneck_params(kp2, inplanes2, planes2, stride2)

    out2 = jax.block_until_ready(bottleneck_forward(x2, params2, stride2))
    ref2 = jax.block_until_ready(bottleneck_reference(x2, params2, stride2))
    assert out2.shape == (N, planes2 * _EXPANSION, H, W)
    np.testing.assert_allclose(np.asarray(out2), np.asarray(ref2), rtol=3e-2, atol=3e-2)

    print("KERNEL_OK")
</pallas_src>

<mosaic_0001>
module attributes {stable_mosaic.version = 11 : i64} {
  func.func @_bottleneck_ds_kernel(%arg0: i32, %arg1: memref<1x256x128xbf16, #tpu.memory_space<vmem>>, %arg2: memref<128x128xbf16, #tpu.memory_space<vmem>>, %arg3: memref<1x128xf32, #tpu.memory_space<vmem>>, %arg4: memref<1x128xf32, #tpu.memory_space<vmem>>, %arg5: memref<1152x128xbf16, #tpu.memory_space<vmem>>, %arg6: memref<1x128xf32, #tpu.memory_space<vmem>>, %arg7: memref<1x128xf32, #tpu.memory_space<vmem>>, %arg8: memref<128x128xbf16, #tpu.memory_space<vmem>>, %arg9: memref<1x128xf32, #tpu.memory_space<vmem>>, %arg10: memref<1x128xf32, #tpu.memory_space<vmem>>, %arg11: memref<128x128xbf16, #tpu.memory_space<vmem>>, %arg12: memref<1x128xf32, #tpu.memory_space<vmem>>, %arg13: memref<1x128xf32, #tpu.memory_space<vmem>>, %arg14: memref<1x64x128xf32, #tpu.memory_space<vmem>>, %arg15: memref<18x18x128xbf16, #tpu.memory_space<vmem>>) attributes {dimension_semantics = [#tpu.dimension_semantics<parallel>], iteration_bounds = array<i64: 2>, scalar_prefetch = 0 : i64, scratch_operands = 1 : i64, tpu.core_type = #tpu.core_type<tc>, window_params = [{transform_indices = @transform_0, window_bounds = array<i64: 1, 256, 128>}, {pipeline_mode = #tpu.pipeline_mode<synchronous>, transform_indices = @transform_1, window_bounds = array<i64: 128, 128>}, {pipeline_mode = #tpu.pipeline_mode<synchronous>, transform_indices = @transform_2, window_bounds = array<i64: 1, 128>}, {pipeline_mode = #tpu.pipeline_mode<synchronous>, transform_indices = @transform_3, window_bounds = array<i64: 1, 128>}, {pipeline_mode = #tpu.pipeline_mode<synchronous>, transform_indices = @transform_4, window_bounds = array<i64: 1152, 128>}, {pipeline_mode = #tpu.pipeline_mode<synchronous>, transform_indices = @transform_5, window_bounds = array<i64: 1, 128>}, {pipeline_mode = #tpu.pipeline_mode<synchronous>, transform_indices = @transform_6, window_bounds = array<i64: 1, 128>}, {pipeline_mode = #tpu.pipeline_mode<synchronous>, transform_indices = @transform_7, window_bounds = array<i64: 128, 128>}, {pipeline_mode = #tpu.pipeline_mode<synchronous>, transform_indices = @transform_8, window_bounds = array<i64: 1, 128>}, {pipeline_mode = #tpu.pipeline_mode<synchronous>, transform_indices = @transform_9, window_bounds = array<i64: 1, 128>}, {pipeline_mode = #tpu.pipeline_mode<synchronous>, transform_indices = @transform_10, window_bounds = array<i64: 128, 128>}, {pipeline_mode = #tpu.pipeline_mode<synchronous>, transform_indices = @transform_11, window_bounds = array<i64: 1, 128>}, {pipeline_mode = #tpu.pipeline_mode<synchronous>, transform_indices = @transform_12, window_bounds = array<i64: 1, 128>}, {transform_indices = @transform_13, window_bounds = array<i64: 1, 64, 128>}]} {
    %c0 = arith.constant 0 : index
    %c0_0 = arith.constant 0 : index
    %c0_1 = arith.constant 0 : index
    %0 = vector.load %arg1[%c0, %c0_0, %c0_1] : memref<1x256x128xbf16, #tpu.memory_space<vmem>>, vector<1x256x128xbf16>
    %1 = vector.shape_cast %0 : vector<1x256x128xbf16> to vector<256x128xbf16>
    %c0_2 = arith.constant 0 : index
    %c0_3 = arith.constant 0 : index
    %2 = vector.load %arg2[%c0_2, %c0_3] : memref<128x128xbf16, #tpu.memory_space<vmem>>, vector<128x128xbf16>
    %cst = arith.constant dense<0.000000e+00> : vector<256x128xf32>
    %3 = tpu.matmul %1, %2, %cst {dimension_numbers = #tpu.dot_dimension_numbers<[1], [0], [0], [1], [0, 0, 1, 1], [], []>} : vector<256x128xbf16>, vector<128x128xbf16>, vector<256x128xf32> -> vector<256x128xf32>
    %c0_4 = arith.constant 0 : index
    %c0_5 = arith.constant 0 : index
    %4 = vector.load %arg3[%c0_4, %c0_5] : memref<1x128xf32, #tpu.memory_space<vmem>>, vector<1x128xf32>
    %5 = vector.broadcast %4 : vector<1x128xf32> to vector<256x128xf32>
    %6 = arith.mulf %3, %5 : vector<256x128xf32>
    %c0_6 = arith.constant 0 : index
    %c0_7 = arith.constant 0 : index
    %7 = vector.load %arg4[%c0_6, %c0_7] : memref<1x128xf32, #tpu.memory_space<vmem>>, vector<1x128xf32>
    %8 = vector.broadcast %7 : vector<1x128xf32> to vector<256x128xf32>
    %9 = arith.addf %6, %8 : vector<256x128xf32>
    %cst_8 = arith.constant 0.000000e+00 : f32
    %10 = vector.broadcast %cst_8 : f32 to vector<256x128xf32>
    %11 = arith.maximumf %9, %10 : vector<256x128xf32>
    %cst_9 = arith.constant 0.000000e+00 : bf16
    %12 = vector.broadcast %cst_9 : bf16 to vector<1x18x128xbf16>
    %c0_10 = arith.constant 0 : index
    %c0_11 = arith.constant 0 : index
    %c0_12 = arith.constant 0 : index
    %13 = vector.load %arg15[%c0_10, %c0_11, %c0_12] : memref<18x18x128xbf16, #tpu.memory_space<vmem>>, vector<1x18x128xbf16>
    tpu.vector_store %arg15[%c0_10, %c0_11, %c0_12], %12 {strides = array<i32>} : memref<18x18x128xbf16, #tpu.memory_space<vmem>>, vector<1x18x128xbf16>,
    %c17 = arith.constant 17 : index
    %c0_13 = arith.constant 0 : index
    %c0_14 = arith.constant 0 : index
    %14 = vector.load %arg15[%c17, %c0_13, %c0_14] : memref<18x18x128xbf16, #tpu.memory_space<vmem>>, vector<1x18x128xbf16>
    tpu.vector_store %arg15[%c17, %c0_13, %c0_14], %12 {strides = array<i32>} : memref<18x18x128xbf16, #tpu.memory_space<vmem>>, vector<1x18x128xbf16>,
    %cst_15 = arith.constant 0.000000e+00 : bf16
    %15 = vector.broadcast %cst_15 : bf16 to vector<16x1x128xbf16>
    %c1 = arith.constant 1 : index
    %c0_16 = arith.constant 0 : index
    %c0_17 = arith.constant 0 : index
    %16 = vector.load %arg15[%c1, %c0_16, %c0_17] : memref<18x18x128xbf16, #tpu.memory_space<vmem>>, vector<16x1x128xbf16>
    tpu.vector_store %arg15[%c1, %c0_16, %c0_17], %15 {strides = array<i32>} : memref<18x18x128xbf16, #tpu.memory_space<vmem>>, vector<16x1x128xbf16>,
    %c1_18 = arith.constant 1 : index
    %c17_19 = arith.constant 17 : index
    %c0_20 = arith.constant 0 : index
    %17 = vector.load %arg15[%c1_18, %c17_19, %c0_20] : memref<18x18x128xbf16, #tpu.memory_space<vmem>>, vector<16x1x128xbf16>
    tpu.vector_store %arg15[%c1_18, %c17_19, %c0_20], %15 {strides = array<i32>} : memref<18x18x128xbf16, #tpu.memory_space<vmem>>, vector<16x1x128xbf16>,
    %18 = arith.truncf %11 : vector<256x128xf32> to vector<256x128xbf16>
    %19 = vector.shape_cast %18 : vector<256x128xbf16> to vector<16x16x128xbf16>
    %c1_21 = arith.constant 1 : index
    %c1_22 = arith.constant 1 : index
    %c0_23 = arith.constant 0 : index
    %20 = vector.load %arg15[%c1_21, %c1_22, %c0_23] : memref<18x18x128xbf16, #tpu.memory_space<vmem>>, vector<16x16x128xbf16>
    tpu.vector_store %arg15[%c1_21, %c1_22, %c0_23], %19 {strides = array<i32>} : memref<18x18x128xbf16, #tpu.memory_space<vmem>>, vector<16x16x128xbf16>,
    %c0_24 = arith.constant 0 : index
    %c0_25 = arith.constant 0 : index
    %c0_26 = arith.constant 0 : index
    %21 = vector.load %arg15[%c0_24, %c0_25, %c0_26] : memref<18x18x128xbf16, #tpu.memory_space<vmem>>, vector<18x18x128xbf16>
    %22 = vector.extract_strided_slice %21 {offsets = [0, 0, 0], sizes = [18, 16, 128], strides = [1, 1, 1]} : vector<18x18x128xbf16> to vector<18x16x128xbf16>
    %23 = vector.extract_strided_slice %21 {offsets = [0, 1, 0], sizes = [18, 16, 128], strides = [1, 1, 1]} : vector<18x18x128xbf16> to vector<18x16x128xbf16>
    %24 = vector.extract_strided_slice %21 {offsets = [0, 2, 0], sizes = [18, 16, 128], strides = [1, 1, 1]} : vector<18x18x128xbf16> to vector<18x16x128xbf16>
    %25 = tpu.concatenate %22, %23, %24 in 2 : vector<18x16x128xbf16>, vector<18x16x128xbf16>, vector<18x16x128xbf16> -> vector<18x16x384xbf16>
    %cst_27 = arith.constant 0.000000e+00 : f32
    %26 = vector.broadcast %cst_27 : f32 to vector<256x128xf32>
    %27 = vector.extract_strided_slice %25 {offsets = [0, 0, 0], sizes = [16, 16, 384], strides = [1, 1, 1]} : vector<18x16x384xbf16> to vector<16x16x384xbf16>
    %28 = vector.shape_cast %27 : vector<16x16x384xbf16> to vector<256x384xbf16>
    %c0_28 = arith.constant 0 : index
    %c0_29 = arith.constant 0 : index
    %29 = vector.load %arg5[%c0_28, %c0_29] : memref<1152x128xbf16, #tpu.memory_space<vmem>>, vector<384x128xbf16>
    %cst_30 = arith.constant dense<0.000000e+00> : vector<256x128xf32>
    %30 = tpu.matmul %28, %29, %cst_30 {dimension_numbers = #tpu.dot_dimension_numbers<[1], [0], [0], [1], [0, 0, 1, 1], [], []>} : vector<256x384xbf16>, vector<384x128xbf16>, vector<256x128xf32> -> vector<256x128xf32>
    %31 = arith.addf %26, %30 : vector<256x128xf32>
    %32 = vector.extract_strided_slice %25 {offsets = [1, 0, 0], sizes = [16, 16, 384], strides = [1, 1, 1]} : vector<18x16x384xbf16> to vector<16x16x384xbf16>
    %33 = vector.shape_cast %32 : vector<16x16x384xbf16> to vector<256x384xbf16>
    %c384 = arith.constant 384 : index
    %c0_31 = arith.constant 0 : index
    %34 = vector.load %arg5[%c384, %c0_31] : memref<1152x128xbf16, #tpu.memory_space<vmem>>, vector<384x128xbf16>
    %cst_32 = arith.constant dense<0.000000e+00> : vector<256x128xf32>
    %35 = tpu.matmul %33, %34, %cst_32 {dimension_numbers = #tpu.dot_dimension_numbers<[1], [0], [0], [1], [0, 0, 1, 1], [], []>} : vector<256x384xbf16>, vector<384x128xbf16>, vector<256x128xf32> -> vector<256x128xf32>
    %36 = arith.addf %31, %35 : vector<256x128xf32>
    %37 = vector.extract_strided_slice %25 {offsets = [2, 0, 0], sizes = [16, 16, 384], strides = [1, 1, 1]} : vector<18x16x384xbf16> to vector<16x16x384xbf16>
    %38 = vector.shape_cast %37 : vector<16x16x384xbf16> to vector<256x384xbf16>
    %c768 = arith.constant 768 : index
    %c0_33 = arith.constant 0 : index
    %39 = vector.load %arg5[%c768, %c0_33] : memref<1152x128xbf16, #tpu.memory_space<vmem>>, vector<384x128xbf16>
    %cst_34 = arith.constant dense<0.000000e+00> : vector<256x128xf32>
    %40 = tpu.matmul %38, %39, %cst_34 {dimension_numbers = #tpu.dot_dimension_numbers<[1], [0], [0], [1], [0, 0, 1, 1], [], []>} : vector<256x384xbf16>, vector<384x128xbf16>, vector<256x128xf32> -> vector<256x128xf32>
    %41 = arith.addf %36, %40 : vector<256x128xf32>
    %c0_35 = arith.constant 0 : index
    %c0_36 = arith.constant 0 : index
    %42 = vector.load %arg6[%c0_35, %c0_36] : memref<1x128xf32, #tpu.memory_space<vmem>>, vector<1x128xf32>
    %43 = vector.broadcast %42 : vector<1x128xf32> to vector<256x128xf32>
    %44 = arith.mulf %41, %43 : vector<256x128xf32>
    %c0_37 = arith.constant 0 : index
    %c0_38 = arith.constant 0 : index
    %45 = vector.load %arg7[%c0_37, %c0_38] : memref<1x128xf32, #tpu.memory_space<vmem>>, vector<1x128xf32>
    %46 = vector.broadcast %45 : vector<1x128xf32> to vector<256x128xf32>
    %47 = arith.addf %44, %46 : vector<256x128xf32>
    %cst_39 = arith.constant 0.000000e+00 : f32
    %48 = vector.broadcast %cst_39 : f32 to vector<256x128xf32>
    %49 = arith.maximumf %47, %48 : vector<256x128xf32>
    %50 = vector.shape_cast %49 : vector<256x128xf32> to vector<128x256xf32>
    %51 = vector.extract_strided_slice %50 {offsets = [0, 0], sizes = [128, 128], strides = [1, 1]} : vector<128x256xf32> to vector<128x128xf32>
    %52 = vector.extract_strided_slice %50 {offsets = [0, 128], sizes = [128, 128], strides = [1, 1]} : vector<128x256xf32> to vector<128x128xf32>
    %53 = arith.addf %51, %52 : vector<128x128xf32>
    %54 = vector.shape_cast %53 : vector<128x128xf32> to vector<8x2048xf32>
    %55 = vector.extract_strided_slice %54 {offsets = [0, 0], sizes = [8, 1024], strides = [1, 1]} : vector<8x2048xf32> to vector<8x1024xf32>
    %56 = vector.extract_strided_slice %54 {offsets = [0, 1024], sizes = [8, 1024], strides = [1, 1]} : vector<8x2048xf32> to vector<8x1024xf32>
    %57 = arith.addf %55, %56 : vector<8x1024xf32>
    %58 = vector.shape_cast %57 : vector<8x1024xf32> to vector<64x128xf32>
    %cst_40 = arith.constant 2.500000e-01 : f32
    %59 = vector.broadcast %cst_40 : f32 to vector<64x128xf32>
    %60 = arith.mulf %58, %59 : vector<64x128xf32>
    %61 = arith.truncf %60 : vector<64x128xf32> to vector<64x128xbf16>
    %c0_41 = arith.constant 0 : index
    %c0_42 = arith.constant 0 : index
    %62 = vector.load %arg8[%c0_41, %c0_42] : memref<128x128xbf16, #tpu.memory_space<vmem>>, vector<128x128xbf16>
    %cst_43 = arith.constant dense<0.000000e+00> : vector<64x128xf32>
    %63 = tpu.matmul %61, %62, %cst_43 {dimension_numbers = #tpu.dot_dimension_numbers<[1], [0], [0], [1], [0, 0, 1, 1], [], []>} : vector<64x128xbf16>, vector<128x128xbf16>, vector<64x128xf32> -> vector<64x128xf32>
    %c0_44 = arith.constant 0 : index
    %c0_45 = arith.constant 0 : index
    %64 = vector.load %arg9[%c0_44, %c0_45] : memref<1x128xf32, #tpu.memory_space<vmem>>, vector<1x128xf32>
    %65 = vector.broadcast %64 : vector<1x128xf32> to vector<64x128xf32>
    %66 = arith.mulf %63, %65 : vector<64x128xf32>
    %c0_46 = arith.constant 0 : index
    %c0_47 = arith.constant 0 : index
    %67 = vector.load %arg10[%c0_46, %c0_47] : memref<1x128xf32, #tpu.memory_space<vmem>>, vector<1x128xf32>
    %68 = vector.broadcast %67 : vector<1x128xf32> to vector<64x128xf32>
    %69 = arith.addf %66, %68 : vector<64x128xf32>
    %70 = arith.extf %1 : vector<256x128xbf16> to vector<256x128xf32>
    %71 = vector.shape_cast %70 : vector<256x128xf32> to vector<128x256xf32>
    %72 = vector.extract_strided_slice %71 {offsets = [0, 0], sizes = [128, 128], strides = [1, 1]} : vector<128x256xf32> to vector<128x128xf32>
    %73 = vector.extract_strided_slice %71 {offsets = [0, 128], sizes = [128, 128], strides = [1, 1]} : vector<128x256xf32> to vector<128x128xf32>
    %74 = arith.addf %72, %73 : vector<128x128xf32>
    %75 = vector.shape_cast %74 : vector<128x128xf32> to vector<8x2048xf32>
    %76 = vector.extract_strided_slice %75 {offsets = [0, 0], sizes = [8, 1024], strides = [1, 1]} : vector<8x2048xf32> to vector<8x1024xf32>
    %77 = vector.extract_strided_slice %75 {offsets = [0, 1024], sizes = [8, 1024], strides = [1, 1]} : vector<8x2048xf32> to vector<8x1024xf32>
    %78 = arith.addf %76, %77 : vector<8x1024xf32>
    %79 = vector.shape_cast %78 : vector<8x1024xf32> to vector<64x128xf32>
    %cst_48 = arith.constant 2.500000e-01 : f32
    %80 = vector.broadcast %cst_48 : f32 to vector<64x128xf32>
    %81 = arith.mulf %79, %80 : vector<64x128xf32>
    %82 = arith.truncf %81 : vector<64x128xf32> to vector<64x128xbf16>
    %c0_49 = arith.constant 0 : index
    %c0_50 = arith.constant 0 : index
    %83 = vector.load %arg11[%c0_49, %c0_50] : memref<128x128xbf16, #tpu.memory_space<vmem>>, vector<128x128xbf16>
    %cst_51 = arith.constant dense<0.000000e+00> : vector<64x128xf32>
    %84 = tpu.matmul %82, %83, %cst_51 {dimension_numbers = #tpu.dot_dimension_numbers<[1], [0], [0], [1], [0, 0, 1, 1], [], []>} : vector<64x128xbf16>, vector<128x128xbf16>, vector<64x128xf32> -> vector<64x128xf32>
    %c0_52 = arith.constant 0 : index
    %c0_53 = arith.constant 0 : index
    %85 = vector.load %arg12[%c0_52, %c0_53] : memref<1x128xf32, #tpu.memory_space<vmem>>, vector<1x128xf32>
    %86 = vector.broadcast %85 : vector<1x128xf32> to vector<64x128xf32>
    %87 = arith.mulf %84, %86 : vector<64x128xf32>
    %c0_54 = arith.constant 0 : index
    %c0_55 = arith.constant 0 : index
    %88 = vector.load %arg13[%c0_54, %c0_55] : memref<1x128xf32, #tpu.memory_space<vmem>>, vector<1x128xf32>
    %89 = vector.broadcast %88 : vector<1x128xf32> to vector<64x128xf32>
    %90 = arith.addf %87, %89 : vector<64x128xf32>
    %91 = arith.addf %69, %90 : vector<64x128xf32>
    %cst_56 = arith.constant 0.000000e+00 : f32
    %92 = vector.broadcast %cst_56 : f32 to vector<64x128xf32>
    %93 = arith.maximumf %91, %92 : vector<64x128xf32>
    %c0_57 = arith.constant 0 : index
    %c0_58 = arith.constant 0 : index
    %c0_59 = arith.constant 0 : index
    %94 = vector.load %arg14[%c0_57, %c0_58, %c0_59] : memref<1x64x128xf32, #tpu.memory_space<vmem>>, vector<1x64x128xf32>
    %95 = vector.shape_cast %94 : vector<1x64x128xf32> to vector<64x128xf32>
    %96 = vector.shape_cast %93 : vector<64x128xf32> to vector<1x64x128xf32>
    tpu.vector_store %arg14[%c0_57, %c0_58, %c0_59], %96 {strides = array<i32>} : memref<1x64x128xf32, #tpu.memory_space<vmem>>, vector<1x64x128xf32>,
    return
  }
  func.func @transform_0(%arg0: i32) -> (i32, i32, i32) {
    %c0_i32 = arith.constant 0 : i32
    %c0_i32_0 = arith.constant 0 : i32
    %c0_i32_1 = arith.constant 0 : i32
    return %arg0, %c0_i32, %c0_i32_0 : i32, i32, i32
  }
  func.func @transform_1(%arg0: i32) -> (i32, i32) {
    %c0_i32 = arith.constant 0 : i32
    %c0_i32_0 = arith.constant 0 : i32
    %c0_i32_1 = arith.constant 0 : i32
    return %c0_i32, %c0_i32_0 : i32, i32
  }
  func.func @transform_2(%arg0: i32) -> (i32, i32) {
    %c0_i32 = arith.constant 0 : i32
    %c0_i32_0 = arith.constant 0 : i32
    %c0_i32_1 = arith.constant 0 : i32
    return %c0_i32, %c0_i32_0 : i32, i32
  }
  func.func @transform_3(%arg0: i32) -> (i32, i32) {
    %c0_i32 = arith.constant 0 : i32
    %c0_i32_0 = arith.constant 0 : i32
    %c0_i32_1 = arith.constant 0 : i32
    return %c0_i32, %c0_i32_0 : i32, i32
  }
  func.func @transform_4(%arg0: i32) -> (i32, i32) {
    %c0_i32 = arith.constant 0 : i32
    %c0_i32_0 = arith.constant 0 : i32
    %c0_i32_1 = arith.constant 0 : i32
    return %c0_i32, %c0_i32_0 : i32, i32
  }
  func.func @transform_5(%arg0: i32) -> (i32, i32) {
    %c0_i32 = arith.constant 0 : i32
    %c0_i32_0 = arith.constant 0 : i32
    %c0_i32_1 = arith.constant 0 : i32
    return %c0_i32, %c0_i32_0 : i32, i32
  }
  func.func @transform_6(%arg0: i32) -> (i32, i32) {
    %c0_i32 = arith.constant 0 : i32
    %c0_i32_0 = arith.constant 0 : i32
    %c0_i32_1 = arith.constant 0 : i32
    return %c0_i32, %c0_i32_0 : i32, i32
  }
  func.func @transform_7(%arg0: i32) -> (i32, i32) {
    %c0_i32 = arith.constant 0 : i32
    %c0_i32_0 = arith.constant 0 : i32
    %c0_i32_1 = arith.constant 0 : i32
    return %c0_i32, %c0_i32_0 : i32, i32
  }
  func.func @transform_8(%arg0: i32) -> (i32, i32) {
    %c0_i32 = arith.constant 0 : i32
    %c0_i32_0 = arith.constant 0 : i32
    %c0_i32_1 = arith.constant 0 : i32
    return %c0_i32, %c0_i32_0 : i32, i32
  }
  func.func @transform_9(%arg0: i32) -> (i32, i32) {
    %c0_i32 = arith.constant 0 : i32
    %c0_i32_0 = arith.constant 0 : i32
    %c0_i32_1 = arith.constant 0 : i32
    return %c0_i32, %c0_i32_0 : i32, i32
  }
  func.func @transform_10(%arg0: i32) -> (i32, i32) {
    %c0_i32 = arith.constant 0 : i32
    %c0_i32_0 = arith.constant 0 : i32
    %c0_i32_1 = arith.constant 0 : i32
    return %c0_i32, %c0_i32_0 : i32, i32
  }
  func.func @transform_11(%arg0: i32) -> (i32, i32) {
    %c0_i32 = arith.constant 0 : i32
    %c0_i32_0 = arith.constant 0 : i32
    %c0_i32_1 = arith.constant 0 : i32
    return %c0_i32, %c0_i32_0 : i32, i32
  }
  func.func @transform_12(%arg0: i32) -> (i32, i32) {
    %c0_i32 = arith.constant 0 : i32
    %c0_i32_0 = arith.constant 0 : i32
    %c0_i32_1 = arith.constant 0 : i32
    return %c0_i32, %c0_i32_0 : i32, i32
  }
  func.func @transform_13(%arg0: i32) -> (i32, i32, i32) {
    %c0_i32 = arith.constant 0 : i32
    %c0_i32_0 = arith.constant 0 : i32
    %c0_i32_1 = arith.constant 0 : i32
    return %arg0, %c0_i32, %c0_i32_0 : i32, i32, i32
  }
}

</mosaic_0001>

<bundles_post_ra>
// kernel: tpu_custom_call.1
= control target key start
LH: loop header
LB: loop body
LE: loop exit
PB: predicated region body
PF: predicated region fallthrough
CT: control target
= control target key end

     0   :  { %s8555_s0 = inlined_call_operand.hbm [shape: bf16[2,256,128], index: 0, kind: input, shape index: {}]   ;;  %s8556_s1 = inlined_call_operand.hbm [shape: bf16[128,128], index: 1, kind: input, shape index: {}]   ;;  %s8557_s2 = inlined_call_operand.vmem [shape: f32[1,128], index: 2, kind: input, shape index: {}]   ;;  %s8558_s3 = inlined_call_operand.vmem [shape: f32[1,128], index: 3, kind: input, shape index: {}]   ;;  %s8559_s4 = inlined_call_operand.hbm [shape: bf16[1152,128], index: 4, kind: input, shape index: {}]   ;;  %s8560_s5 = inlined_call_operand.vmem [shape: f32[1,128], index: 5, kind: input, shape index: {}]   ;;  %s8561_s6 = inlined_call_operand.vmem [shape: f32[1,128], index: 6, kind: input, shape index: {}]   ;;  %s8562_s7 = inlined_call_operand.hbm [shape: bf16[128,128], index: 7, kind: input, shape index: {}]   ;;  %s8563_s8 = inlined_call_operand.vmem [shape: f32[1,128], index: 8, kind: input, shape index: {}]   ;;  %s8564_s9 = inlined_call_operand.vmem [shape: f32[1,128], index: 9, kind: input, shape index: {}]   ;;  %s8565_s10 = inlined_call_operand.hbm [shape: bf16[128,128], index: 10, kind: input, shape index: {}]   ;;  %s8566_s11 = inlined_call_operand.vmem [shape: f32[1,128], index: 11, kind: input, shape index: {}]   ;;  %s8567_s12 = inlined_call_operand.vmem [shape: f32[1,128], index: 12, kind: input, shape index: {}]   ;;  %s8568_s13 = inlined_call_operand.hbm [shape: f32[2,64,128], index: 13, kind: output, shape index: {}]  }
   0x1   :  { %8580 = sst [smem:[#allocation40_spill]] %s8563_s8 }
   0x2   :  { %8581 = sst [smem:[#allocation41_spill]] %s8564_s9 }
   0x3   :  { %8582 = sst [smem:[#allocation42_spill]] %s8566_s11 }
   0x4   :  { %8583 = sst [smem:[#allocation43_spill]] %s8567_s12 }
   0x5   :  { %8584 = sst [smem:[#allocation44_spill]] %s8568_s13 }
   0x6   :  { %18 = vsyncpa [#allocation4], 0 }
   0x7   :  { %20 = vsyncpa [#allocation4 + $0x1], 0 }
   0x8   :  { %21 = vsyncpa [#allocation7], 0 }
   0x9   :  { %22 = vsyncpa [#allocation10], 0 }
   0xa   :  { %23 = vsyncpa [#allocation5], 0 }
   0xb   :  { %25 = vsyncpa [#allocation5 + $0x1], 0  ;;  %s6893_s25 = smov 0   ;;  %s6895_s26 = smov 0  }
   0xc   :  { %s6897_s27 = smov 0   ;;  %s6899_s28 = smov 0  }
   0xd LB: > { %8585 = sst [smem:[#allocation17_spill]] %s6797_s25  ;;  %s6914_s29 = sadd.s32 4294967295, %s6809_s28   ;;  %s6809_s28 = sphi %s6899_s28, %s8668_s28   ;;  %s6805_s27 = sphi %s6897_s27, %s8667_s27   ;;  %s6801_s26 = sphi %s6895_s26, %s8666_s26   ;;  %s6797_s25 = sphi %s6893_s25, %s8665_s25  }
   0xe   : > { %s5201_s30 = sadd.s32 4294967294, %s6809_s28   ;;  %p51_p0 = scmp.ne.s32.totalorder %s6801_s26, %s6797_s25 }
   0xf   : > { %p8572_p1 = scmp.eq.s32.totalorder %s6914_s29, 0  ;;  %p333_p3 = scmp.eq.s32.totalorder %s5201_s30, 1 }
  0x10   : > { %p5202_p5 = scmp.ge.s32.totalorder %s6809_s28, 1  ;;  %p340_p7 = scmp.lt.s32.totalorder %s6809_s28, 3 }
  0x11   : > { %p6923_p4 = por %p8572_p1, %p51_p0  ;;  %p6928_p6 = por %p333_p3, %p51_p0 }
  0x12   : > { %p6933_p8 = pnand %p5202_p5, %p340_p7  ;;  %s6811_s17 = smov [#allocation6]  }
  0x13   : > { %s8586_s14 = scalar_select %p6923_p4, 1, 0 }
  0x14   : > { %s8587_s15 = scalar_select %p6928_p6, 1, 0 }
  0x15   : > { %s8589_s16 = scalar_select %p6933_p8, 1, 0 }
  0x16   : > { %8588 = sst [smem:[#allocation18_spill]] %s8587_s15  ;;  %s352_s18 = sshll.u32 %s6811_s17, 4  ;;  %s6937_s18 = int_to_ptr.vmem [resolvable:$true] %s352_s18 }
  0x17   : > { %p6337_p9 = pneg %p6933_p8  ;;  %s6812_s20 = smov [#allocation9]  }
  0x18   : > { %s390_s21 = sshll.u32 %s6812_s20, 4  ;;  %s6813_s22 = smov [#allocation8]   ;;  %s6948_s21 = int_to_ptr.vmem [resolvable:$true] %s390_s21 }
  0x19   : > { %p6944_p11 = pnand %p6337_p9, %p8572_p1  ;;  %s6950_s23 = sshll.u32 %s6813_s22, 4  ;;  %s372_s23 = int_to_ptr.vmem [resolvable:$true] %s6950_s23 }
  0x1a   : > { %s6593_s17 = scalar_lea.hbm %s8556_s1, 1024 }
  0x1b   : > { %p6594_p12 = scmp.ne.s32.totalorder %s8556_s1, %s6593_s17  ;;  %p6960_p13 = pneg %p6944_p11 }
  0x1c   : > { %p6600_p5 = scmp.lt.u32.totalorder %s6593_s17, %s8556_s1 }
  0x1d   : > { %p6596_p0 = pnand %p6960_p13, %p6594_p12 }
  0x1f   : > { %p6597_p3 = pneg %p6596_p0 }
  0x21   : > { %p6602_p7 = pnand %p6600_p5, %p6597_p3 }
  0x23   : > { %6605 = shalt.err (!%p6602_p7)
}
  0x24   : > { %s6606_s25 = scalar_lea.vmem %s6937_s18, 1024  ;;  %p6614_p2 = scmp.lt.s32.totalorder %s6937_s18, %s6937_s18 }
  0x25   : > { %p6607_p9 = scmp.ne.s32.totalorder %s6937_s18, %s6606_s25  ;;  %p6615_p6 = scmp.lt.s32.totalorder %s6606_s25, %s6606_s25 }
  0x27   : > { %p6609_p10 = pnand %p6607_p9, %p6960_p13  ;;  %p6616_p12 = por %p6615_p6, %p6614_p2 }
  0x29   : > { %p6610_p1 = pneg %p6609_p10 }
  0x2b   : > { %p6617_p0 = pnand %p6616_p12, %p6610_p1 }
  0x2d   : > { %6620 = shalt.err (!%p6617_p0)
}
  0x2e   : > { %s6814_s15 = smov 64   ;;  %s6815_s24 = smov 4  }
  0x2f   : > { %6340 = dma.hbm_to_vmem [thread:$0]  (!%p6944_p11), %s8556_s1, 1024, %s6937_s18, [#allocation7], %s6814_s15, %s6814_s15, %s6815_s24  }
  0x30   : > { %s6621_s25 = scalar_lea.hbm %s8562_s7, 1024 }
  0x31   : > { %p6622_p1 = scmp.ne.s32.totalorder %s8562_s7, %s6621_s25  ;;  %p6628_p10 = scmp.lt.u32.totalorder %s6621_s25, %s8562_s7 }
  0x33   : > { %p6624_p2 = pnand %p6622_p1, %p6960_p13 }
  0x35   : > { %p6625_p6 = pneg %p6624_p2 }
  0x37   : > { %p6630_p3 = pnand %p6628_p10, %p6625_p6 }
  0x39   : > { %6633 = shalt.err (!%p6630_p3)
}
  0x3a   : > { %s6634_s18 = scalar_lea.vmem %s6948_s21, 1024  ;;  %p6642_p12 = scmp.lt.s32.totalorder %s6948_s21, %s6948_s21 }
  0x3b   : > { %p6635_p5 = scmp.ne.s32.totalorder %s6948_s21, %s6634_s18  ;;  %p6643_p0 = scmp.lt.s32.totalorder %s6634_s18, %s6634_s18 }
  0x3d   : > { %p6637_p7 = pnand %p6635_p5, %p6960_p13  ;;  %p6644_p1 = por %p6643_p0, %p6642_p12 }
  0x3f   : > { %p6638_p9 = pneg %p6637_p7 }
  0x41   : > { %p6645_p2 = pnand %p6644_p1, %p6638_p9 }
  0x43   : > { %6648 = shalt.err (!%p6645_p2)
}
  0x44   : > { %6346 = dma.hbm_to_vmem [thread:$0]  (!%p6944_p11), %s8562_s7, 1024, %s6948_s21, [#allocation10], %s6814_s15, %s6814_s15, %s6815_s24  }
  0x45   : > { %s6649_s30 = scalar_lea.hbm %s8559_s4, 9216 }
  0x46   : > { %p6650_p6 = scmp.ne.s32.totalorder %s8559_s4, %s6649_s30  ;;  %p6656_p5 = scmp.lt.u32.totalorder %s6649_s30, %s8559_s4 }
  0x48   : > { %p6652_p10 = pnand %p6650_p6, %p6960_p13 }
  0x4a   : > { %p6653_p3 = pneg %p6652_p10 }
  0x4c   : > { %p6658_p7 = pnand %p6656_p5, %p6653_p3 }
  0x4e   : > { %6661 = shalt.err (!%p6658_p7)
}
  0x4f   : > { %s6662_s18 = scalar_lea.vmem %s372_s23, 9216  ;;  %p6670_p1 = scmp.lt.s32.totalorder %s372_s23, %s372_s23 }
  0x50   : > { %p6663_p9 = scmp.ne.s32.totalorder %s372_s23, %s6662_s18  ;;  %p6671_p2 = scmp.lt.s32.totalorder %s6662_s18, %s6662_s18 }
  0x52   : > { %p6665_p12 = pnand %p6663_p9, %p6960_p13  ;;  %p6672_p4 = por %p6671_p2, %p6670_p1 }
  0x54   : > { %p6666_p0 = pneg %p6665_p12 }
  0x56   : > { %p6673_p8 = pnand %p6672_p4, %p6666_p0 }
  0x58   : > { %6676 = shalt.err (!%p6673_p8)
}
  0x59   : > { %6343 = dma.hbm_to_vmem [thread:$0]  (!%p6944_p11), %s8559_s4, 9216, %s372_s23, [#allocation7], %s6814_s15, %s6814_s15, %s6815_s24  }
  0x5a   : > { %s6816_s9 = smov [#allocation11]   ;;  %s6677_s17 = scalar_lea.hbm %s8565_s10, 1024 }
  0x5b   : > { %s409_s11 = sshll.u32 %s6816_s9, 4  ;;  %p6678_p4 = scmp.ne.s32.totalorder %s8565_s10, %s6677_s17  ;;  %s410_s11 = int_to_ptr.vmem [resolvable:$true] %s409_s11 }
  0x5c   : > { %p6684_p10 = scmp.lt.u32.totalorder %s6677_s17, %s8565_s10 }
  0x5d   : > { %p6680_p8 = pnand %p6678_p4, %p6960_p13 }
  0x5f   : > { %p6681_p6 = pneg %p6680_p8 }
  0x61   : > { %p6686_p3 = pnand %p6684_p10, %p6681_p6 }
  0x63   : > { %6689 = shalt.err (!%p6686_p3)
}
  0x64   : > { %s6690_s23 = scalar_lea.vmem %s410_s11, 1024  ;;  %p6698_p12 = scmp.lt.s32.totalorder %s410_s11, %s410_s11 }
  0x65   : > { %p6691_p5 = scmp.ne.s32.totalorder %s410_s11, %s6690_s23  ;;  %p6699_p0 = scmp.lt.s32.totalorder %s6690_s23, %s6690_s23 }
  0x67   : > { %p6693_p7 = pnand %p6691_p5, %p6960_p13  ;;  %p6700_p1 = por %p6699_p0, %p6698_p12 }
  0x69   : > { %p6694_p9 = pneg %p6693_p7 }
  0x6b   : > { %p6701_p2 = pnand %p6700_p1, %p6694_p9 }
  0x6d   : > { %6704 = shalt.err (!%p6701_p2)
}
  0x6e   : > { %6349 = dma.hbm_to_vmem [thread:$0]  (!%p6944_p11), %s8565_s10, 1024, %s410_s11, [#allocation10], %s6814_s15, %s6814_s15, %s6815_s24  }
  0x6f   : > { %s7054_s13 = sadd.s32 1, %s6809_s28   ;;  %s38_s19 = sadd.s32 1, %s6805_s27 }
  0x70   : > { %s35_s9 = ssub.s32 %s6809_s28, %s7054_s13  ;;  %p45_p13 = scmp.ne.s32.totalorder %s6805_s27, %s6801_s26 }
  0x71   : > { %p36_p4 = scmp.eq.s32.totalorder %s35_s9, 0  ;;  %p46_p8 = scmp.eq.s32.totalorder %s6809_s28, 0 }
  0x72   : > { %p8592_p6 = scmp.eq.s32.totalorder %s6914_s29, 1  ;;  %p6362_p3 = scmp.lt.s32.totalorder %s6809_s28, 2 }
  0x73   : > { %s7070_s30 = scalar_select %p36_p4, %s6805_s27, %s38_s19  }
  0x74   : > { %p7064_p10 = por %p8592_p6, %p45_p13  ;;  %p47_p5 = por %p46_p8, %p45_p13 }
  0x75   : > { %s429_s17 = sand.u32 1, %s6805_s27   ;;  %s5411_s11 = sshll.u32 %s6809_s28, 11 }
  0x76   : > { %s5208_s20 = sshll.u32 %s429_s17, 7  ;;  %s7077_s18 = scalar_lea.hbm %s8555_s0, %s5411_s11 }
  0x77   : > { %s433_s23 = scalar_lea.vmem [#allocation3], %s5208_s20  ;;  %p7081_p11 = pnand %p6362_p3, %p47_p5 }
  0x78   : > { %s440_s21 = sshll.u32 %s433_s23, 4  ;;  %s7085_s19 = scalar_lea.sflag [#allocation4], %s429_s17  ;;  %s7079_s21 = int_to_ptr.vmem [resolvable:$true] %s440_s21 }
  0x79   : > { %s6705_s9 = scalar_lea.hbm %s7077_s18, 2048  ;;  %p6707_p9 = pneg %p7081_p11 }
  0x7a   : > { %p6706_p7 = scmp.ne.s32.totalorder %s7077_s18, %s6705_s9  ;;  %s6710_s22 = scalar_lea.hbm %s8555_s0, 4096 }
  0x7b   : > { %p6711_p1 = scmp.lt.u32.totalorder %s7077_s18, %s8555_s0  ;;  %p6712_p2 = scmp.lt.u32.totalorder %s6710_s22, %s6705_s9 }
  0x7c   : > { %p6708_p12 = pnand %p6707_p9, %p6706_p7  ;;  %p6714_p4 = scmp.lt.u32.totalorder %s6705_s9, %s7077_s18 }
  0x7d   : > { %p6713_p13 = por %p6712_p2, %p6711_p1 }
  0x7e   : > { %p6709_p0 = pneg %p6708_p12 }
  0x7f   : > { %p6715_p8 = por %p6714_p4, %p6713_p13 }
  0x81   : > { %p6716_p6 = pnand %p6715_p8, %p6709_p0 }
  0x83   : > { %6719 = shalt.err (!%p6716_p6)
}
  0x84   : > { %s6720_s17 = scalar_lea.vmem %s7079_s21, 2048  ;;  %s6817_s20 = smov [#allocation3]  }
  0x85   : > { %p6721_p3 = scmp.ne.s32.totalorder %s7079_s21, %s6720_s17  ;;  %s6725_s11 = sshll.u32 %s6817_s20, 4  ;;  %s6726_s11 = int_to_ptr.vmem [resolvable:$false] %s6725_s11 }
  0x86   : > { %s6727_s25 = scalar_lea.vmem %s6726_s11, 4096  ;;  %p6728_p12 = scmp.lt.s32.totalorder %s7079_s21, %s6726_s11 }
  0x87   : > { %p6723_p5 = pnand %p6721_p3, %p6707_p9  ;;  %p6729_p1 = scmp.lt.s32.totalorder %s6727_s25, %s6720_s17 }
  0x89   : > { %p6724_p7 = pneg %p6723_p5  ;;  %p6730_p2 = por %p6729_p1, %p6728_p12 }
  0x8b   : > { %p6731_p13 = pnand %p6730_p2, %p6724_p7 }
  0x8d   : > { %6734 = shalt.err (!%p6731_p13)
}
  0x8e   : > { %6353 = dma.hbm_to_vmem [thread:$0]  (!%p7081_p11), %s7077_s18, 2048, %s7079_s21, %s7085_s19, %s6814_s15, %s6814_s15, %s6815_s24  }
  0x8f   : > { %p8595_p9 = scmp.ne.s32.totalorder %s8589_s16, 0 }
  0x91   : > { %452 = sbr.rel (%p8595_p9) target bundleno = 1263 (0x4ef), region = 72 }
  0x98   : > { %s7119_s9 = sand.u32 1, %s6801_s26   ;;  %p8596_p0 = scmp.ne.s32.totalorder %s8586_s14, 0 }
  0x99   : > { %s5212_s22 = sshll.u32 %s7119_s9, 7  ;;  %s455_s23 = scalar_lea.sflag [#allocation4], %s7119_s9 }
  0x9a   : > { %s7123_s17 = scalar_lea.vmem [#allocation3], %s5212_s22 }
  0x9b   : > { %6780 = dma.done.wait (%p8596_p0), %s455_s23, 2048  }
  0x9c   : > { %6782 = vsyncadd (%p8596_p0), %s455_s23, 4294965248  ;;  %p8597_p11 = scmp.eq.s32.totalorder %s6914_s29, 0 }
  0x9e   : > { %6784 = dma.done.wait (%p8597_p11), [#allocation7], 10240   ;;  %p8598_p4 = pmov %p8597_p11 }
  0xa0   : > { %6786 = vsyncadd (%p8598_p4), [#allocation7], 4294957056  ;;  %p8599_p8 = pmov %p8598_p4 }
  0xa1   : > { %p8600_p6 = pmov %p8598_p4 }
  0xa2   : > { %6788 = dma.done.wait (%p8599_p8), [#allocation10], 2048  }
  0xa3   : > { %6790 = vsyncadd (%p8600_p6), [#allocation10], 4294965248  ;;  %v6410_v0 = vld [vmem:[#allocation6] sm:$0xff]   ;;  %v6411_v1 = vld [vmem:[#allocation6 + $0x8] sm:$0xff]   ;;  %v6818_v5 = vmov 1966171168   ;;  %v3833_v7 = vlaneseq }
  0xa4   : > { %5901 = vmatprep.subr.bf16.mxu0 %v6410_v0  ;;  %v6412_v2 = vld [vmem:[#allocation6 + $0x10] sm:$0xff]   ;;  %v6413_v3 = vld [vmem:[#allocation6 + $0x18] sm:$0xff]   ;;  %v518_v4 = vld [vmem:[%s7123_s17] sm:$0xff]   ;;  %v3831_v6 = vunpack.c.l.s4 %v6818_v5  ;;  %vm989_vm0 = vcmask 1040384   ;;  %vm990_vm1 = vsmask.f32 256 }
  0xa5   : > { %5902 = vmatpush3.bf16.msra.mxu0 %v6410_v0  ;;  %5917 = vmatprep.mubr.bf16.mxu0 %v518_v4  ;;  %v6414_v8 = vld [vmem:[#allocation6 + $0x20] sm:$0xff]   ;;  %v6415_v9 = vld [vmem:[#allocation6 + $0x28] sm:$0xff]   ;;  %v3834_v11 = vshrl.u32 %v3833_v7, 7  ;;  %v530_v14 = vld [vmem:[%s7123_s17 + $0x30] sm:$0xff]   ;;  %vm1040_vm3 = vsmask.f32 7938 }
  0xa6   : > { %5903 = vmatprep.subr.bf16.mxu0 %v6411_v1  ;;  %v3832_v10 = vunpack.c.0.s8 %v3831_v6  ;;  %v526_v12 = vld [vmem:[%s7123_s17 + $0x20] sm:$0xff]   ;;  %v528_v13 = vld [vmem:[%s7123_s17 + $0x28] sm:$0xff]   ;;  %v6416_v15 = vld [vmem:[#allocation6 + $0x30] sm:$0xff]   ;;  %v4437_v24 = vunpack.c.l.bf16 %v530_v14  ;;  %v4438_v25 = vunpack.c.h.bf16 %v530_v14  ;;  %vm1186_vm5 = vsmask.f32 4368  ;;  %s8656_s14 = sld [smem:[#allocation40_spill]] }
  0xa7   : > { %v4433_v17 = vunpack.c.l.bf16 %v526_v12  ;;  %v4434_v18 = vunpack.c.h.bf16 %v526_v12  ;;  %v532_v19 = vld [vmem:[%s7123_s17 + $0x38] sm:$0xff]   ;;  %v4435_v20 = vunpack.c.l.bf16 %v528_v13  ;;  %v4436_v21 = vunpack.c.h.bf16 %v528_v13  ;;  %v520_v42 = vld [vmem:[%s7123_s17 + $0x8] sm:$0xff]   ;;  %v522_v47 = vld [vmem:[%s7123_s17 + $0x10] sm:$0xff]   ;;  %s8657_s24 = sld [smem:[#allocation42_spill]]  ;;  %s8658_s8 = sld [smem:[#allocation41_spill]] }
  0xa8   : > { %v7141_v16 = vsub.s32 %v3832_v10, %v3834_v11  ;;  %v4439_v28 = vunpack.c.l.bf16 %v532_v19  ;;  %v6417_v29 = vld [vmem:[#allocation6 + $0x38] sm:$0xff]   ;;  %v4440_v36 = vunpack.c.h.bf16 %v532_v19  ;;  %v6434_v54 = vld [vmem:[#allocation8 + $0x140] sm:$0xff]   ;;  %v536_v62 = vld [vmem:[%s7123_s17 + $0x48] sm:$0xff]   ;;  %vm1508_vm6 = vcmask 1043456   ;;  %s8659_s11 = sld [smem:[#allocation43_spill]]  ;;  %s5217_s25 = sshll.u32 %s7119_s9, 6 }
  0xa9   : > { %5904 = vmatpush3.bf16.msra.mxu0 %v6411_v1  ;;  %v524_v60 = vld [vmem:[%s7123_s17 + $0x18] sm:$0xff]   ;;  %v534_v61 = vld [vmem:[%s7123_s17 + $0x40] sm:$0xff]   ;;  %v538_v63 = vld [vmem:[%s7123_s17 + $0x50] sm:$0xff]   ;;  %vm2073_vm9 = vcmask 1046528   ;;  %vm1838_vm10 = vsmask.f32 7424 }
  0xaa   : > { %5905 = vmatprep.subr.bf16.mxu0 %v6412_v2  ;;  %8601 = vst [vmem:[#allocation19_spill] sm:$0xff] %v7141_v16  ;;  %v4519_v22 = vrot.slane %v4433_v17, %v7141_v16  ;;  %v4526_v23 = vrot.slane %v4434_v18, %v7141_v16  ;;  %v4533_v26 = vrot.slane %v4435_v20, %v7141_v16  ;;  %v540_v0 = vld [vmem:[%s7123_s17 + $0x58] sm:$0xff]   ;;  %v542_v1 = vld [vmem:[%s7123_s17 + $0x60] sm:$0xff]   ;;  %v6435_v5 = vld [vmem:[#allocation8 + $0x148] sm:$0xff]   ;;  %s8494_s22 = scalar_lea.vmem [#allocation12], %s5217_s25  ;;  %s5444_s23 = sshll.u32 %s6914_s29, 10 }
  0xab   : > { %v4540_v27 = vrot.slane %v4436_v21, %v7141_v16  ;;  %v4547_v32 = vrot.slane %v4437_v24, %v7141_v16  ;;  %v4554_v33 = vrot.slane %v4438_v25, %v7141_v16  ;;  %v4561_v37 = vrot.slane %v4439_v28, %v7141_v16  ;;  %v548_v4 = vld [vmem:[%s7123_s17 + $0x78] sm:$0xff]   ;;  %v6436_v6 = vld [vmem:[#allocation8 + $0x100] sm:$0xff]   ;;  %vm7168_vm2 = vmand %vm989_vm0, %vm990_vm1  ;;  %s8660_s15 = sld [smem:[#allocation44_spill]]  ;;  %s5077_s29 = scalar_lea.sflag [#allocation5], %s7119_s9 }
  0xac   : > { %v4721_v30 = vrot.slane %v4519_v22, 4  ;;  %v4722_v31 = vrot.slane %v4526_v23, 4  ;;  %v4723_v34 = vrot.slane %v4533_v26, 4  ;;  %v4568_v45 = vrot.slane %v4440_v36, %v7141_v16  ;;  %v6437_v7 = vld [vmem:[#allocation8 + $0xc0] sm:$0xff]   ;;  %5469 = vmatprep.subr.bf16.mxu1 %v6436_v6  ;;  %vm7175_vm4 = vmand %vm989_vm0, %vm1040_vm3  ;;  %v6439_v17 = vld [vmem:[#allocation8 + $0x150] sm:$0xff]   ;;  %s6820_s21 = smov [#allocation12]  }
  0xad   : > { %5906 = vmatpush3.bf16.msra.mxu0 %v6412_v2  ;;  %v4724_v35 = vrot.slane %v4540_v27, 4  ;;  %v4725_v40 = vrot.slane %v4547_v32, 4  ;;  %v4726_v41 = vrot.slane %v4554_v33, 4  ;;  %v4727_v46 = vrot.slane %v4561_v37, 4  ;;  %v544_v2 = vld [vmem:[%s7123_s17 + $0x68] sm:$0xff]   ;;  %5470 = vmatpush3.bf16.msra.mxu1 %v6437_v7  ;;  %v6441_v25 = vld [vmem:[#allocation8 + $0x110] sm:$0xff]   ;;  %vm7264_vm7 = vmand %vm1508_vm6, %vm1040_vm3 }
  0xae   : > { %5907 = vmatprep.subr.bf16.mxu0 %v6413_v3  ;;  %v4785_v38 = vadd.f32 %v4721_v30, %v4519_v22  ;;  %v4786_v39 = vadd.f32 %v4722_v31, %v4526_v23  ;;  %v4787_v43 = vadd.f32 %v4723_v34, %v4533_v26  ;;  %v4728_v52 = vrot.slane %v4568_v45, 4  ;;  %v6440_v18 = vld [vmem:[#allocation8 + $0xc8] sm:$0xff]   ;;  %v1042_v20 = vld [vmem:[#allocation2 + $0x14] sm:$0x1]  ;;  %v1001_v23 = vld [vmem:[#allocation2 + $0x30] sm:$0x1] }
  0xaf   : > { %v4788_v44 = vadd.f32 %v4724_v35, %v4540_v27  ;;  %v4789_v49 = vadd.f32 %v4725_v40, %v4547_v32  ;;  %v4790_v50 = vadd.f32 %v4726_v41, %v4554_v33  ;;  %v4791_v53 = vadd.f32 %v4727_v46, %v4561_v37  ;;  %v998_v22 = vld [vmem:[#allocation2 + $0x24] sm:$0x1]  ;;  %v6442_v27 = vld [vmem:[#allocation8 + $0xd0] sm:$0xff]   ;;  %v6443_v28 = vld [vmem:[#allocation8 + $0x158] sm:$0xff]  }
  0xb0   : > { %v4845_v48 = vcombine.low %v4785_v38, %v4786_v39  ;;  %v4792_v57 = vadd.f32 %v4728_v52, %v4568_v45  ;;  %v1043_v21 = vsel %vm7175_vm4, 0, %v1042_v20  ;;  %v999_v24 = vsel %vm7168_vm2, 0, %v998_v22  ;;  %v6446_v30 = vld [vmem:[#allocation8 + $0x160] sm:$0xff]   ;;  %v6445_v31 = vld [vmem:[#allocation8 + $0xd8] sm:$0xff]   ;;  %v1048_v33 = vld [vmem:[#allocation2 + $0x2c] sm:$0x1] }
  0xb1   : > { %5908 = vmatpush3.bf16.msra.mxu0 %v6413_v3  ;;  %v4846_v51 = vcombine.low %v4787_v43, %v4788_v44  ;;  %v4847_v56 = vcombine.low %v4789_v49, %v4790_v50  ;;  %v546_v3 = vld [vmem:[%s7123_s17 + $0x70] sm:$0xff]   ;;  %1044 = vst [vmem:[#allocation2 + $0x14] sm:$0x1] %v1043_v21  ;;  %v1002_v26 = vsel %vm7168_vm2, 0, %v1001_v23  ;;  %1000 = vst [vmem:[#allocation2 + $0x24] sm:$0x1] %v999_v24 }
  0xb2   : > { %5909 = vmatprep.subr.bf16.mxu0 %v6414_v8  ;;  %v4848_v58 = vcombine.low %v4791_v53, %v4792_v57  ;;  %1003 = vst [vmem:[#allocation2 + $0x30] sm:$0x1] %v1002_v26  ;;  %v1051_v32 = vld [vmem:[#allocation2 + $0x38] sm:$0x1]  ;;  %v1049_v35 = vsel %vm7175_vm4, 0, %v1048_v33  ;;  %v6449_v37 = vld [vmem:[#allocation8 + $0x168] sm:$0xff]   ;;  %vm7271_vm8 = vmor %vm990_vm1, %vm1186_vm5 }
  0xb3   : > { %v7154_v55 = vadd.f32 %v4846_v51, %v4845_v48  ;;  %v1052_v34 = vsel %vm7175_vm4, 0, %v1051_v32  ;;  %1050 = vst [vmem:[#allocation2 + $0x2c] sm:$0x1] %v1049_v35  ;;  %v6447_v36 = vld [vmem:[#allocation8 + $0x120] sm:$0xff]   ;;  %v6450_v39 = vld [vmem:[#allocation8 + $0x128] sm:$0xff]   ;;  %v6452_v40 = vld [vmem:[#allocation8 + $0x170] sm:$0xff]  }
  0xb4   : > { %v7156_v59 = vadd.f32 %v4848_v58, %v4847_v56  ;;  %1053 = vst [vmem:[#allocation2 + $0x38] sm:$0x1] %v1052_v34  ;;  %v6448_v38 = vld [vmem:[#allocation8 + $0xe0] sm:$0xff]   ;;  %v6451_v41 = vld [vmem:[#allocation8 + $0xe8] sm:$0xff]   ;;  %v1007_v44 = vld [vmem:[#allocation2 + $0x48] sm:$0x1] }
  0xb5   : > { %5910 = vmatpush3.bf16.msra.mxu0 %v6414_v8  ;;  %8602 = vst [vmem:[#allocation20_spill] sm:$0xff] %v7154_v55  ;;  %v1054_v43 = vld [vmem:[#allocation2 + $0x44] sm:$0x1]  ;;  %v1008_v45 = vsel %vm7168_vm2, 0, %v1007_v44  ;;  %v6453_v50 = vld [vmem:[#allocation8 + $0x130] sm:$0xff]   ;;  %v6455_v51 = vld [vmem:[#allocation8 + $0x178] sm:$0xff]  }
  0xb6   : > { %5911 = vmatprep.subr.bf16.mxu0 %v6415_v9  ;;  %8603 = vst [vmem:[#allocation21_spill] sm:$0xff] %v7156_v59  ;;  %v1055_v48 = vsel %vm7175_vm4, 0, %v1054_v43  ;;  %1009 = vst [vmem:[#allocation2 + $0x48] sm:$0x1] %v1008_v45  ;;  %v6454_v52 = vld [vmem:[#allocation8 + $0xf0] sm:$0xff]   ;;  %v6456_v57 = vld [vmem:[#allocation8 + $0x138] sm:$0xff]  }
  0xb7   : > { %1056 = vst [vmem:[#allocation2 + $0x44] sm:$0x1] %v1055_v48  ;;  %v1010_v53 = vld [vmem:[#allocation2 + $0x54] sm:$0x1]  ;;  %v1031_v21 = vld [vmem:[#allocation2 + $0xa8] sm:$0x1] }
  0xb8   : > { %v1011_v56 = vsel %vm7168_vm2, 0, %v1010_v53  ;;  %v1066_v6 = vld [vmem:[#allocation2 + $0x74] sm:$0x1]  ;;  %v1032_v22 = vsel %vm7168_vm2, 0, %v1031_v21  ;;  %v1028_v23 = vld [vmem:[#allocation2 + $0x9c] sm:$0x1] }
  0xb9   : > { %5912 = vmatpush3.bf16.msra.mxu0 %v6415_v9  ;;  %v995_v9 = vld [vmem:[#allocation2 + $0x18] sm:$0x1]  ;;  %1012 = vst [vmem:[#allocation2 + $0x54] sm:$0x1] %v1011_v56  ;;  %1033 = vst [vmem:[#allocation2 + $0xa8] sm:$0x1] %v1032_v22 }
  0xba   : > { %5913 = vmatprep.subr.bf16.mxu0 %v6416_v15  ;;  %v996_v10 = vsel %vm7168_vm2, 0, %v995_v9  ;;  %v1067_v9 = vsel %vm7175_vm4, 0, %v1066_v6  ;;  %v1078_v24 = vld [vmem:[#allocation2 + $0xa4] sm:$0x1]  ;;  %v1081_v26 = vld [vmem:[#allocation2 + $0xb0] sm:$0x1] }
  0xbb   : > { %997 = vst [vmem:[#allocation2 + $0x18] sm:$0x1] %v996_v10  ;;  %1068 = vst [vmem:[#allocation2 + $0x74] sm:$0x1] %v1067_v9  ;;  %v6462_v10 = vld [vmem:[#allocation8 + $0x40] sm:$0xff]  }
  0xbc   : > { %v1087_v33 = vld [vmem:[#allocation2 + $0xc8] sm:$0x1]  ;;  %v1084_v35 = vld [vmem:[#allocation2 + $0xbc] sm:$0x1] }
  0xbd   : > { %5914 = vmatpush3.bf16.msra.mxu0 %v6416_v15  ;;  %v1045_v15 = vld [vmem:[#allocation2 + $0x20] sm:$0x1]  ;;  %v1088_v34 = vsel %vm7175_vm4, 0, %v1087_v33 }
  0xbe   : > { %5915 = vmatprep.subr.bf16.mxu0 %v6417_v29  ;;  %1089 = vst [vmem:[#allocation2 + $0xc8] sm:$0x1] %v1088_v34  ;;  %v1514_v34 = vld [vmem:[#allocation2 + $0x14] sm:$0x1] }
  0xc1   : > { %5916 = vmatpush3.bf16.msra.mxu0 %v6417_v29  ;;  %v6444_v29 = vld [vmem:[#allocation8 + $0x118] sm:$0xff]  }
  0xc2   : > { %5949 = vmatprep.subr.bf16.mxu0 %v6434_v54 }
  0xc4   : > { %5918 = vmatmul.mubr.bf16.vlgmr.msra.gmra.mrb[0].mxu0 %v520_v42  ;;  %v1004_v42 = vld [vmem:[#allocation2 + $0x3c] sm:$0x1] }
  0xc5   : > { %5921 = vmatprep.mubr.bf16.mxu0 %v522_v47  ;;  %5950 = vmatpush3.bf16.msra.mxu0 %v6434_v54  ;;  %v1005_v46 = vsel %vm7168_vm2, 0, %v1004_v42  ;;  %v1057_v47 = vld [vmem:[#allocation2 + $0x50] sm:$0x1]  ;;  %v1013_v54 = vld [vmem:[#allocation2 + $0x60] sm:$0x1] }
  0xc6   : > { %5951 = vmatprep.subr.bf16.mxu0 %v6435_v5  ;;  %1006 = vst [vmem:[#allocation2 + $0x3c] sm:$0x1] %v1005_v46  ;;  %v1058_v49 = vsel %vm7175_vm4, 0, %v1057_v47  ;;  %v1014_v58 = vsel %vm7168_vm2, 0, %v1013_v54 }
  0xc7   : > { %1059 = vst [vmem:[#allocation2 + $0x50] sm:$0x1] %v1058_v49  ;;  %1015 = vst [vmem:[#allocation2 + $0x60] sm:$0x1] %v1014_v58 }
  0xc9   : > { %5952 = vmatpush3.bf16.msra.mxu0 %v6435_v5  ;;  %v1069_v5 = vld [vmem:[#allocation2 + $0x80] sm:$0x1] }
  0xca   : > { %5953 = vmatprep.subr.bf16.mxu0 %v6439_v17  ;;  %v1070_v7 = vsel %vm7175_vm4, 0, %v1069_v5 }
  0xcb   : > { %1071 = vst [vmem:[#allocation2 + $0x80] sm:$0x1] %v1070_v7 }
  0xcc   : > { %5922 = vmatmul.mubr.bf16.gmra.mrb[4].mxu0 %v524_v60  ;;  %v1063_v60 = vld [vmem:[#allocation2 + $0x68] sm:$0x1] }
  0xcd   : > { %5925 = vmatprep.mubr.bf16.mxu0 %v526_v12  ;;  %v992_v12 = vld [vmem:[#allocation2 + $0xc] sm:$0x1]  ;;  %5954 = vmatpush3.bf16.msra.mxu0 %v6439_v17  ;;  %v1075_v17 = vld [vmem:[#allocation2 + $0x98] sm:$0x1] }
  0xce   : > { %5955 = vmatprep.subr.bf16.mxu0 %v6443_v28 }
  0xd1   : > { %5956 = vmatpush3.bf16.msra.mxu0 %v6443_v28  ;;  %v1082_v28 = vsel %vm7175_vm4, 0, %v1081_v26 }
  0xd2   : > { %5957 = vmatprep.subr.bf16.mxu0 %v6446_v30  ;;  %1083 = vst [vmem:[#allocation2 + $0xb0] sm:$0x1] %v1082_v28 }
  0xd4   : > { %5926 = vmatmul.mubr.bf16.gmra.mrb[8].mxu0 %v528_v13  ;;  %v6438_v13 = vld [vmem:[#allocation8 + $0x108] sm:$0xff]  }
  0xd5   : > { %5929 = vmatprep.mubr.bf16.mxu0 %v530_v14  ;;  %v993_v14 = vsel %vm7168_vm2, 0, %v992_v12  ;;  %5471 = vmatprep.subr.bf16.mxu1 %v6438_v13  ;;  %v1025_v12 = vld [vmem:[#allocation2 + $0x90] sm:$0x1] }
  0xd6   : > { %994 = vst [vmem:[#allocation2 + $0xc] sm:$0x1] %v993_v14  ;;  %5472 = vmatpush3.bf16.msra.mxu1 %v6440_v18  ;;  %5958 = vmatpush3.bf16.msra.mxu0 %v6446_v30  ;;  %v1026_v13 = vsel %vm7168_vm2, 0, %v1025_v12  ;;  %v1022_v14 = vld [vmem:[#allocation2 + $0x84] sm:$0x1] }
  0xd7   : > { %5473 = vmatprep.subr.bf16.mxu1 %v6441_v25  ;;  %5959 = vmatprep.subr.bf16.mxu0 %v6449_v37  ;;  %1027 = vst [vmem:[#allocation2 + $0x90] sm:$0x1] %v1026_v13  ;;  %v1072_v18 = vld [vmem:[#allocation2 + $0x8c] sm:$0x1]  ;;  %v1029_v25 = vsel %vm7168_vm2, 0, %v1028_v23 }
  0xd8   : > { %v1073_v20 = vsel %vm7175_vm4, 0, %v1072_v18  ;;  %1030 = vst [vmem:[#allocation2 + $0x9c] sm:$0x1] %v1029_v25 }
  0xd9   : > { %1074 = vst [vmem:[#allocation2 + $0x8c] sm:$0x1] %v1073_v20 }
  0xda   : > { %5474 = vmatpush3.bf16.msra.mxu1 %v6442_v27  ;;  %5960 = vmatpush3.bf16.msra.mxu0 %v6449_v37  ;;  %v1079_v27 = vsel %vm7175_vm4, 0, %v1078_v24  ;;  %v7244_v37 = vld [vmem:[%s8557_s2] ss:$0 sm:$0xff] }
  0xdb   : > { %5475 = vmatprep.subr.bf16.mxu1 %v6444_v29  ;;  %5961 = vmatprep.subr.bf16.mxu0 %v6452_v40  ;;  %1080 = vst [vmem:[#allocation2 + $0xa4] sm:$0x1] %v1079_v27  ;;  %v1037_v29 = vld [vmem:[#allocation2 + $0xc0] sm:$0x1] }
  0xdc   : > { %5930 = vmatmul.mubr.bf16.gmra.mrb[12].mxu0 %v532_v19  ;;  %v1046_v19 = vsel %vm7175_vm4, 0, %v1045_v15  ;;  %v1023_v15 = vsel %vm7168_vm2, 0, %v1022_v14  ;;  %v1038_v30 = vsel %vm7168_vm2, 0, %v1037_v29  ;;  %v1517_v14 = vld [vmem:[#allocation2 + $0x18] sm:$0xf] }
  0xdd   : > { %5933 = vmatprep.mubr.bf16.mxu0 %v534_v61  ;;  %1047 = vst [vmem:[#allocation2 + $0x20] sm:$0x1] %v1046_v19  ;;  %v1064_v61 = vsel %vm7175_vm4, 0, %v1063_v60  ;;  %1024 = vst [vmem:[#allocation2 + $0x84] sm:$0x1] %v1023_v15  ;;  %v1076_v19 = vsel %vm7175_vm4, 0, %v1075_v17 }
  0xde   : > { %5476 = vmatpush3.bf16.msra.mxu1 %v6445_v31  ;;  %5962 = vmatpush3.bf16.msra.mxu0 %v6452_v40  ;;  %1065 = vst [vmem:[#allocation2 + $0x68] sm:$0x1] %v1064_v61  ;;  %1077 = vst [vmem:[#allocation2 + $0x98] sm:$0x1] %v1076_v19  ;;  %v1034_v31 = vld [vmem:[#allocation2 + $0xb4] sm:$0x1] }
  0xdf   : > { %5477 = vmatprep.subr.bf16.mxu1 %v6447_v36  ;;  %5963 = vmatprep.subr.bf16.mxu0 %v6455_v51  ;;  %1039 = vst [vmem:[#allocation2 + $0xc0] sm:$0x1] %v1038_v30  ;;  %v1035_v32 = vsel %vm7168_vm2, 0, %v1034_v31  ;;  %v1085_v36 = vsel %vm7175_vm4, 0, %v1084_v35  ;;  %v6819_v40 = vmov 0  }
  0xe0   : > { %1036 = vst [vmem:[#allocation2 + $0xb4] sm:$0x1] %v1035_v32  ;;  %1086 = vst [vmem:[#allocation2 + $0xbc] sm:$0x1] %v1085_v36  ;;  %v1510_v22 = vld [vmem:[#allocation2 + $0xc] sm:$0xf] }
  0xe1   : > { %981 = vst [vmem:[#allocation2] sm:$0xf] %v6819_v40  ;;  %982 = vst [vmem:[#allocation2 + $0x4] sm:$0xf] %v6819_v40 }
  0xe2   : > { %5478 = vmatpush3.bf16.msra.mxu1 %v6448_v38  ;;  %5964 = vmatpush3.bf16.msra.mxu0 %v6455_v51  ;;  %983 = vst [vmem:[#allocation2 + $0x8] sm:$0x1] %v6819_v40  ;;  %985 = vst [vmem:[#allocation2 + $0xcc] sm:$0xf] %v6819_v40 }
  0xe3   : > { %5479 = vmatprep.subr.bf16.mxu1 %v6450_v39  ;;  %5605 = vmatprep.subr.bf16.mxu0 %v6462_v10  ;;  %v7249_v39 = vld [vmem:[%s8558_s3] ss:$0 sm:$0xff]  ;;  %986 = vst [vmem:[#allocation2 + $0xd0] sm:$0xf] %v6819_v40  ;;  %987 = vst [vmem:[#allocation2 + $0xd4] sm:$0x1] %v6819_v40 }
  0xe4   : > { %5934 = vmatmul.mubr.bf16.gmra.mrb[16].mxu0 %v536_v62  ;;  %v1060_v62 = vld [vmem:[#allocation2 + $0x5c] sm:$0x1]  ;;  %v1521_v28 = vld [vmem:[#allocation2 + $0x20] sm:$0x1] }
  0xe5   : > { %5937 = vmatprep.mubr.bf16.mxu0 %v538_v63  ;;  %v1061_v63 = vsel %vm7175_vm4, 0, %v1060_v62 }
  0xe6   : > { %5480 = vmatpush3.bf16.msra.mxu1 %v6451_v41  ;;  %1062 = vst [vmem:[#allocation2 + $0x5c] sm:$0x1] %v1061_v63 }
  0xe7   : > { %5481 = vmatprep.subr.bf16.mxu1 %v6453_v50 }
  0xea   : > { %5482 = vmatpush3.bf16.msra.mxu1 %v6454_v52 }
  0xeb   : > { %5483 = vmatprep.subr.bf16.mxu1 %v6456_v57 }
  0xec   : > { %5938 = vmatmul.mubr.bf16.gmra.mrb[20].mxu0 %v540_v0  ;;  %v6459_v0 = vld [vmem:[#allocation8 + $0xf8] sm:$0xff]  }
  0xed   : > { %5941 = vmatprep.mubr.bf16.mxu0 %v542_v1  ;;  %v1019_v1 = vld [vmem:[#allocation2 + $0x78] sm:$0x1] }
  0xee   : > { %5484 = vmatpush3.bf16.msra.mxu1 %v6459_v0 }
  0xef   : > { %6141 = vmatprep.subr.bf16.mxu1 %v6462_v10 }
  0xf4   : > { %5942 = vmatmul.mubr.bf16.gmra.mrb[24].mxu0 %v544_v2  ;;  %v1020_v2 = vsel %vm7168_vm2, 0, %v1019_v1 }
  0xf5   : > { %5945 = vmatprep.mubr.bf16.mxu0 %v546_v3  ;;  %1021 = vst [vmem:[#allocation2 + $0x78] sm:$0x1] %v1020_v2  ;;  %v1016_v3 = vld [vmem:[#allocation2 + $0x6c] sm:$0x1] }
  0xfc   : > { %5946 = vmatmul.mubr.bf16.gmra.mrb[28].mxu0 %v548_v4  ;;  %v1017_v4 = vsel %vm7168_vm2, 0, %v1016_v3 }
  0xfd   : > { %1018 = vst [vmem:[#allocation2 + $0x6c] sm:$0x1] %v1017_v4 }
 0x197   : > { %v5919_v38 = vpop.f32.mrb[0].mxu0 }
 0x198   : > { %v880_v11 = vmul.f32 %v5919_v38, %v7244_v37  ;;  %v744_v41 = vpop.f32.mrb[1].mxu0 }
 0x199   : > { %v878_v42 = vmul.f32 %v7244_v37, %v744_v41  ;;  %v5920_v43 = vpop.f32.mrb[2].mxu0 }
 0x19a   : > { %v919_v44 = vadd.f32 %v7249_v39, %v880_v11  ;;  %v881_v45 = vmul.f32 %v5920_v43, %v7244_v37  ;;  %v747_v46 = vpop.f32.mrb[3].mxu0 }
 0x19b   : > { %v917_v47 = vadd.f32 %v7249_v39, %v878_v42  ;;  %v879_v48 = vmul.f32 %v7244_v37, %v747_v46 }
 0x19c   : > { %v951_v49 = vmax.f32 %v919_v44, 0.0  ;;  %v920_v50 = vadd.f32 %v7249_v39, %v881_v45 }
 0x19d   : > { %v949_v51 = vmax.f32 %v917_v47, 0.0  ;;  %v918_v52 = vadd.f32 %v7249_v39, %v879_v48 }
 0x19e   : > { %v5414_v53 = vpack.c.bf16 %v951_v49, %v951_v49  ;;  %v952_v54 = vmax.f32 %v920_v50, 0.0 }
 0x19f   : > { %v5412_v56 = vpack.c.bf16 %v949_v51, %v949_v51  ;;  %v950_v57 = vmax.f32 %v918_v52, 0.0  ;;  %v5923_v58 = vpop.f32.mrb[4].mxu0 }
 0x1a0   : > { %v1206_v60 = vshrl.u32 %v5414_v53, 16  ;;  %v1209_v61 = vshll.u32 %v5414_v53, 16  ;;  %v5415_v62 = vpack.c.bf16 %v952_v54, %v952_v54  ;;  %v884_v63 = vmul.f32 %v5923_v58, %v7244_v37  ;;  %v760_v0 = vpop.f32.mrb[5].mxu0  ;;  %v1531_v58 = vld [vmem:[#allocation2 + $0x30] sm:$0xf] }
 0x1a1   : > { %v1189_v1 = vshrl.u32 %v5412_v56, 16  ;;  %v1192_v2 = vshll.u32 %v5412_v56, 16  ;;  %v5413_v3 = vpack.c.bf16 %v950_v57, %v950_v57  ;;  %v882_v4 = vmul.f32 %v7244_v37, %v760_v0  ;;  %v5924_v5 = vpop.f32.mrb[6].mxu0 }
 0x1a2   : > { %v1208_v6 = vrot.slane %v1206_v60, 7  ;;  %v1214_v7 = vshrl.u32 %v5415_v62, 16  ;;  %v1217_v9 = vshll.u32 %v5415_v62, 16  ;;  %v923_v10 = vadd.f32 %v7249_v39, %v884_v63  ;;  %v763_v12 = vpop.f32.mrb[7].mxu0 }
 0x1a3   : > { %v1191_v15 = vrot.slane %v1189_v1, 7  ;;  %v1197_v17 = vshrl.u32 %v5413_v3, 16  ;;  %v1200_v18 = vshll.u32 %v5413_v3, 16  ;;  %v921_v19 = vadd.f32 %v7249_v39, %v882_v4 }
 0x1a4   : > { %v1211_v20 = vor.u32 %v1209_v61, %v1208_v6  ;;  %v1212_v21 = vrot.slane %v1208_v6, 4  ;;  %v1216_v23 = vrot.slane %v1214_v7, 7  ;;  %v955_v24 = vmax.f32 %v923_v10, 0.0 }
 0x1a5   : > { %v1194_v25 = vor.u32 %v1192_v2, %v1191_v15  ;;  %v1195_v26 = vrot.slane %v1191_v15, 4  ;;  %v1199_v29 = vrot.slane %v1197_v17, 7  ;;  %v953_v30 = vmax.f32 %v921_v19, 0.0  ;;  %v1524_v2 = vld [vmem:[#allocation2 + $0x24] sm:$0xf] }
 0x1a6   : > { %v1518_v31 = vsel %vm7264_vm7, %v1211_v20, %v1517_v14  ;;  %v1219_v32 = vor.u32 %v1217_v9, %v1216_v23  ;;  %v1221_v33 = vrot.slane %v1216_v23, 4  ;;  %v5418_v35 = vpack.c.bf16 %v955_v24, %v955_v24 }
 0x1a7   : > { %1519 = vst [vmem:[#allocation2 + $0x18] sm:$0xf] %v1518_v31  ;;  %v1511_v36 = vsel %vm7264_vm7, %v1194_v25, %v1510_v22  ;;  %v1202_v38 = vor.u32 %v1200_v18, %v1199_v29  ;;  %v1204_v40 = vrot.slane %v1199_v29, 4  ;;  %v5416_v11 = vpack.c.bf16 %v953_v30, %v953_v30  ;;  %v5927_v41 = vpop.f32.mrb[8].mxu0 }
 0x1a8   : > { %1512 = vst [vmem:[#allocation2 + $0xc] sm:$0xf] %v1511_v36  ;;  %v1220_v42 = vsel %vm7271_vm8, %v1212_v21, %v1219_v32  ;;  %v1522_v43 = vsel %vm7168_vm2, %v1221_v33, %v1521_v28  ;;  %v1240_v44 = vshrl.u32 %v5418_v35, 16  ;;  %v1243_v45 = vshll.u32 %v5418_v35, 16  ;;  %v776_v46 = vpop.f32.mrb[9].mxu0 }
 0x1a9   : > { %1520 = vst [vmem:[#allocation2 + $0x1c] sm:$0xf] %v1220_v42  ;;  %1523 = vst [vmem:[#allocation2 + $0x20] sm:$0x1] %v1522_v43  ;;  %v1203_v47 = vsel %vm7271_vm8, %v1195_v26, %v1202_v38  ;;  %v1515_v48 = vsel %vm7168_vm2, %v1204_v40, %v1514_v34  ;;  %v1223_v49 = vshrl.u32 %v5416_v11, 16  ;;  %v1226_v50 = vshll.u32 %v5416_v11, 16 }
 0x1aa   : > { %v5928_v51 = vpop.f32.mrb[10].mxu0  ;;  %1513 = vst [vmem:[#allocation2 + $0x10] sm:$0xf] %v1203_v47  ;;  %1516 = vst [vmem:[#allocation2 + $0x14] sm:$0x1] %v1515_v48  ;;  %v7287_v52 = vrot.slane %v1240_v44, 7  ;;  %v885_v53 = vmul.f32 %v5924_v5, %v7244_v37  ;;  %v883_v54 = vmul.f32 %v7244_v37, %v763_v12  ;;  %v888_v56 = vmul.f32 %v5927_v41, %v7244_v37 }
 0x1ab   : > { %v779_v57 = vpop.f32.mrb[11].mxu0  ;;  %v7292_v60 = vrot.slane %v1223_v49, 7  ;;  %v886_v61 = vmul.f32 %v7244_v37, %v776_v46  ;;  %v889_v62 = vmul.f32 %v5928_v51, %v7244_v37  ;;  %v1535_v44 = vld [vmem:[#allocation2 + $0x38] sm:$0x1]  ;;  %v1528_v48 = vld [vmem:[#allocation2 + $0x2c] sm:$0x1] }
 0x1ac   : > { %v887_v63 = vmul.f32 %v7244_v37, %v779_v57  ;;  %v1245_v0 = vor.u32 %v1243_v45, %v7287_v52  ;;  %v1246_v1 = vrot.slane %v7287_v52, 4  ;;  %v924_v3 = vadd.f32 %v7249_v39, %v885_v53 }
 0x1ad   : > { %v922_v4 = vadd.f32 %v7249_v39, %v883_v54  ;;  %v1228_v5 = vor.u32 %v1226_v50, %v7292_v60  ;;  %v1229_v6 = vrot.slane %v7292_v60, 4  ;;  %v927_v7 = vadd.f32 %v7249_v39, %v888_v56  ;;  %v1545_v50 = vld [vmem:[#allocation2 + $0x48] sm:$0xf]  ;;  %v1538_v60 = vld [vmem:[#allocation2 + $0x3c] sm:$0xf] }
 0x1ae   : > { %v925_v9 = vadd.f32 %v7249_v39, %v886_v61  ;;  %v1532_v10 = vsel %vm7264_vm7, %v1245_v0, %v1531_v58  ;;  %v956_v12 = vmax.f32 %v924_v3, 0.0  ;;  %v928_v15 = vadd.f32 %v7249_v39, %v889_v62 }
 0x1af   : > { %v954_v14 = vmax.f32 %v922_v4, 0.0  ;;  %1533 = vst [vmem:[#allocation2 + $0x30] sm:$0xf] %v1532_v10  ;;  %v1525_v17 = vsel %vm7264_vm7, %v1228_v5, %v1524_v2  ;;  %v959_v18 = vmax.f32 %v927_v7, 0.0  ;;  %v926_v20 = vadd.f32 %v7249_v39, %v887_v63  ;;  %v5931_v21 = vpop.f32.mrb[12].mxu0 }
 0x1b0   : > { %v957_v19 = vmax.f32 %v925_v9, 0.0  ;;  %1526 = vst [vmem:[#allocation2 + $0x24] sm:$0xf] %v1525_v17  ;;  %v5419_v22 = vpack.c.bf16 %v956_v12, %v956_v12  ;;  %v960_v24 = vmax.f32 %v928_v15, 0.0  ;;  %v892_v25 = vmul.f32 %v5931_v21, %v7244_v37  ;;  %v792_v26 = vpop.f32.mrb[13].mxu0 }
 0x1b1   : > { %v5417_v23 = vpack.c.bf16 %v954_v14, %v954_v14  ;;  %v5422_v28 = vpack.c.bf16 %v959_v18, %v959_v18  ;;  %v958_v30 = vmax.f32 %v926_v20, 0.0  ;;  %v890_v31 = vmul.f32 %v7244_v37, %v792_v26  ;;  %v5932_v32 = vpop.f32.mrb[14].mxu0  ;;  %v7327_v9 = vld [vmem:[#allocation2 + $0xc] sm:$0xff]  }
 0x1b2   : > { %v5420_v29 = vpack.c.bf16 %v957_v19, %v957_v19  ;;  %v1248_v33 = vshrl.u32 %v5419_v22, 16  ;;  %v1251_v34 = vshll.u32 %v5419_v22, 16  ;;  %v795_v38 = vpop.f32.mrb[15].mxu0  ;;  %v5423_v46 = vpack.c.bf16 %v960_v24, %v960_v24  ;;  %v1549_v26 = vld [vmem:[#allocation2 + $0x50] sm:$0x1] }
 0x1b3   : > { %v1231_v35 = vshrl.u32 %v5417_v23, 16  ;;  %v1234_v36 = vshll.u32 %v5417_v23, 16  ;;  %v1274_v40 = vshrl.u32 %v5422_v28, 16  ;;  %v1277_v11 = vshll.u32 %v5422_v28, 16 }
 0x1b4   : > { %v1257_v41 = vshrl.u32 %v5420_v29, 16  ;;  %v1260_v42 = vshll.u32 %v5420_v29, 16  ;;  %v1250_v43 = vrot.slane %v1248_v33, 7  ;;  %v5421_v47 = vpack.c.bf16 %v958_v30, %v958_v30 }
 0x1b5   : > { %v1233_v45 = vrot.slane %v1231_v35, 7  ;;  %v1276_v49 = vrot.slane %v1274_v40, 7  ;;  %v931_v52 = vadd.f32 %v7249_v39, %v892_v25  ;;  %v929_v53 = vadd.f32 %v7249_v39, %v890_v31  ;;  %v1542_v35 = vld [vmem:[#allocation2 + $0x44] sm:$0x1] }
 0x1b6   : > { %v7313_v51 = vrot.slane %v1257_v41, 7  ;;  %v1253_v54 = vor.u32 %v1251_v34, %v1250_v43  ;;  %v1255_v56 = vrot.slane %v1250_v43, 4  ;;  %v1282_v14 = vshrl.u32 %v5423_v46, 16 }
 0x1b7   : > { %v1236_v57 = vor.u32 %v1234_v36, %v1233_v45  ;;  %v1238_v58 = vrot.slane %v1233_v45, 4  ;;  %v1279_v61 = vor.u32 %v1277_v11, %v1276_v49  ;;  %v1280_v62 = vrot.slane %v1276_v49, 4  ;;  %v5935_v2 = vpop.f32.mrb[16].mxu0  ;;  %v7343_v11 = vld [vmem:[#allocation2 + $0x14] ss:$0 sps:$4 sm:$0x11]  }
 0x1b8   : > { %v1262_v63 = vor.u32 %v1260_v42, %v7313_v51  ;;  %v1263_v0 = vrot.slane %v7313_v51, 4  ;;  %v1254_v3 = vsel %vm7271_vm8, %v1246_v1, %v1253_v54  ;;  %v1536_v4 = vsel %vm7168_vm2, %v1255_v56, %v1535_v44  ;;  %v808_v10 = vpop.f32.mrb[17].mxu0  ;;  %v1559_v45 = vld [vmem:[#allocation2 + $0x60] sm:$0xf] }
 0x1b9   : > { %v1237_v5 = vsel %vm7271_vm8, %v1229_v6, %v1236_v57  ;;  %v1529_v7 = vsel %vm7168_vm2, %v1238_v58, %v1528_v48  ;;  %1534 = vst [vmem:[#allocation2 + $0x34] sm:$0xf] %v1254_v3  ;;  %1537 = vst [vmem:[#allocation2 + $0x38] sm:$0x1] %v1536_v4  ;;  %v1546_v12 = vsel %vm7264_vm7, %v1279_v61, %v1545_v50  ;;  %v1285_v15 = vshll.u32 %v5423_v46, 16  ;;  %v7333_v6 = vpop.f32.mrb[18].mxu0 }
 0x1ba   : > { %1527 = vst [vmem:[#allocation2 + $0x28] sm:$0xf] %v1237_v5  ;;  %1530 = vst [vmem:[#allocation2 + $0x2c] sm:$0x1] %v1529_v7  ;;  %v1539_v1 = vsel %vm7264_vm7, %v1262_v63, %v1538_v60  ;;  %v1265_v17 = vshrl.u32 %v5421_v47, 16  ;;  %v1268_v18 = vshll.u32 %v5421_v47, 16  ;;  %v893_v23 = vmul.f32 %v5932_v32, %v7244_v37 }
 0x1bb   : > { %1547 = vst [vmem:[#allocation2 + $0x48] sm:$0xf] %v1546_v12  ;;  %1540 = vst [vmem:[#allocation2 + $0x3c] sm:$0xf] %v1539_v1  ;;  %v963_v19 = vmax.f32 %v931_v52, 0.0  ;;  %v961_v20 = vmax.f32 %v929_v53, 0.0  ;;  %v891_v24 = vmul.f32 %v7244_v37, %v795_v38  ;;  %v896_v25 = vmul.f32 %v5935_v2, %v7244_v37 }
 0x1bc   : > { %v7335_v21 = vpop.f32.mrb[19].mxu0  ;;  %v1284_v22 = vrot.slane %v1282_v14, 7  ;;  %v1267_v28 = vrot.slane %v1265_v17, 7  ;;  %v2077_v31 = vrot.slane %v7327_v9, 1  ;;  %v932_v36 = vadd.f32 %v7249_v39, %v893_v23  ;;  %v1552_v52 = vld [vmem:[#allocation2 + $0x54] sm:$0xf] }
 0x1bd   : > { %v5426_v29 = vpack.c.bf16 %v963_v19, %v963_v19  ;;  %v5424_v30 = vpack.c.bf16 %v961_v20, %v961_v20  ;;  %v930_v40 = vadd.f32 %v7249_v39, %v891_v24  ;;  %v935_v57 = vadd.f32 %v7249_v39, %v896_v25  ;;  %v7359_v60 = vld [vmem:[#allocation2 + $0x18] sm:$0xff]   ;;  %v7364_v3 = vld [vmem:[#allocation2 + $0x20] ss:$0 sps:$4 sm:$0x11]   ;;  %v1563_v20 = vld [vmem:[#allocation2 + $0x68] sm:$0x1] }
 0x1be   : > { %v1287_v33 = vor.u32 %v1285_v15, %v1284_v22  ;;  %v1289_v34 = vrot.slane %v1284_v22, 4  ;;  %v1270_v32 = vor.u32 %v1268_v18, %v1267_v28  ;;  %v1272_v41 = vrot.slane %v1267_v28, 4 }
 0x1bf   : > { %v1308_v38 = vshrl.u32 %v5426_v29, 16  ;;  %v1311_v42 = vshll.u32 %v5426_v29, 16  ;;  %v1291_v46 = vshrl.u32 %v5424_v30, 16  ;;  %v1294_v47 = vshll.u32 %v5424_v30, 16  ;;  %v7349_v48 = vpop.f32.mrb[20].mxu0 }
 0x1c0   : > { %v1288_v43 = vsel %vm7271_vm8, %v1280_v62, %v1287_v33  ;;  %v1550_v44 = vsel %vm7168_vm2, %v1289_v34, %v1549_v26  ;;  %v1271_v49 = vsel %vm7271_vm8, %v1263_v0, %v1270_v32  ;;  %v1543_v50 = vsel %vm7168_vm2, %v1272_v41, %v1542_v35  ;;  %v7361_v61 = vpop.f32.mrb[21].mxu0  ;;  %v1556_v26 = vld [vmem:[#allocation2 + $0x5c] sm:$0x1]  ;;  %v7385_v33 = vld [vmem:[#allocation8 + $0x48] sm:$0xff]  }
 0x1c1   : > { %1548 = vst [vmem:[#allocation2 + $0x4c] sm:$0xf] %v1288_v43  ;;  %1551 = vst [vmem:[#allocation2 + $0x50] sm:$0x1] %v1550_v44  ;;  %v1310_v51 = vrot.slane %v1308_v38, 7  ;;  %v964_v53 = vmax.f32 %v932_v36, 0.0  ;;  %v894_v2 = vmul.f32 %v7244_v37, %v808_v10 }
 0x1c2   : > { %1541 = vst [vmem:[#allocation2 + $0x40] sm:$0xf] %v1271_v49  ;;  %1544 = vst [vmem:[#allocation2 + $0x44] sm:$0x1] %v1543_v50  ;;  %v7355_v54 = vrot.slane %v1291_v46, 7  ;;  %v962_v56 = vmax.f32 %v930_v40, 0.0  ;;  %v897_v40 = vmul.f32 %v7333_v6, %v7244_v37 }
 0x1c3   : > { %v2078_v58 = vrot.slane %v7343_v11, 1  ;;  %v1313_v62 = vor.u32 %v1311_v42, %v1310_v51  ;;  %v1314_v63 = vrot.slane %v1310_v51, 4  ;;  %v5427_v0 = vpack.c.bf16 %v964_v53, %v964_v53  ;;  %v7368_v1 = vpop.f32.mrb[22].mxu0  ;;  %v1573_v50 = vld [vmem:[#allocation2 + $0x78] sm:$0xf] }
 0x1c4   : > { %v1296_v4 = vor.u32 %v1294_v47, %v7355_v54  ;;  %v1297_v5 = vrot.slane %v7355_v54, 4  ;;  %v5425_v7 = vpack.c.bf16 %v962_v56, %v962_v56  ;;  %v967_v12 = vmax.f32 %v935_v57, 0.0  ;;  %v7375_v19 = vpop.f32.mrb[23].mxu0  ;;  %v7406_v54 = vld [vmem:[#allocation8 + $0x8] sm:$0xff]  }
 0x1c5   : > { %v1560_v14 = vsel %vm7264_vm7, %v1313_v62, %v1559_v45  ;;  %v1316_v15 = vshrl.u32 %v5427_v0, 16  ;;  %v1319_v17 = vshll.u32 %v5427_v0, 16  ;;  %v7373_v18 = vsel %vm2073_vm9, %v2077_v31, %v2078_v58  ;;  %v7383_v31 = vld [vmem:[#allocation8] sm:$0xff]  }
 0x1c6   : > { %1561 = vst [vmem:[#allocation2 + $0x60] sm:$0xf] %v1560_v14  ;;  %v1553_v10 = vsel %vm7264_vm7, %v1296_v4, %v1552_v52  ;;  %v1299_v22 = vshrl.u32 %v5425_v7, 16  ;;  %v1302_v23 = vshll.u32 %v5425_v7, 16  ;;  %v5430_v24 = vpack.c.bf16 %v967_v12, %v967_v12  ;;  %5965 = vmatprep.mubr.bf16.mxu0 %v7373_v18  ;;  %v7423_v12 = vld [vmem:[#allocation8 + $0x10] sm:$0xff]  }
 0x1c7   : > { %1554 = vst [vmem:[#allocation2 + $0x54] sm:$0xf] %v1553_v10  ;;  %v1318_v25 = vrot.slane %v1316_v15, 7  ;;  %v933_v28 = vadd.f32 %v7249_v39, %v894_v2  ;;  %v2080_v29 = vrot.slane %v7359_v60, 1  ;;  %v2081_v30 = vrot.slane %v7364_v3, 1  ;;  %v7389_v32 = vpop.f32.mrb[24].mxu0 }
 0x1c8   : > { %v1301_v34 = vrot.slane %v1299_v22, 7  ;;  %v1342_v35 = vshrl.u32 %v5430_v24, 16  ;;  %v1345_v36 = vshll.u32 %v5430_v24, 16  ;;  %v936_v47 = vadd.f32 %v7249_v39, %v897_v40  ;;  %v7404_v53 = vpop.f32.mrb[25].mxu0  ;;  %v1566_v15 = vld [vmem:[#allocation2 + $0x6c] sm:$0xf] }
 0x1c9   : > { %v1321_v41 = vor.u32 %v1319_v17, %v1318_v25  ;;  %v1323_v38 = vrot.slane %v1318_v25, 4  ;;  %v965_v42 = vmax.f32 %v933_v28, 0.0  ;;  %v7392_v43 = vsel %vm2073_vm9, %v2080_v29, %v2081_v30  ;;  %v7430_v22 = vld [vmem:[#allocation2 + $0x24] sm:$0xff]   ;;  %v7435_v28 = vld [vmem:[#allocation2 + $0x2c] ss:$0 sps:$4 sm:$0x11]  }
 0x1ca   : > { %v1304_v44 = vor.u32 %v1302_v23, %v1301_v34  ;;  %v1306_v45 = vrot.slane %v1301_v34, 4  ;;  %v7394_v46 = vrot.slane %v1342_v35, 7  ;;  %5966 = vmatmul.mubr.bf16.vlgmr.msra.gmra.mrb[32].mxu0 %v7392_v43  ;;  %v895_v52 = vmul.f32 %v7244_v37, %v7335_v21  ;;  %v7418_v21 = vld [vmem:[#allocation8 + $0x50] sm:$0xff]  }
 0x1cb   : > { %v1322_v6 = vsel %vm7271_vm8, %v1314_v63, %v1321_v41  ;;  %v1564_v49 = vsel %vm7168_vm2, %v1323_v38, %v1563_v20  ;;  %v5428_v51 = vpack.c.bf16 %v965_v42, %v965_v42  ;;  %5606 = vmatpush3.bf16.msra.mxu0 %v7383_v31  ;;  %v7415_v63 = vpop.f32.mrb[26].mxu0  ;;  %v968_v4 = vmax.f32 %v936_v47, 0.0  ;;  %v1577_v47 = vld [vmem:[#allocation2 + $0x80] sm:$0x1] }
 0x1cc   : > { %1562 = vst [vmem:[#allocation2 + $0x64] sm:$0xf] %v1322_v6  ;;  %1565 = vst [vmem:[#allocation2 + $0x68] sm:$0x1] %v1564_v49  ;;  %v1305_v56 = vsel %vm7271_vm8, %v1297_v5, %v1304_v44  ;;  %v1557_v57 = vsel %vm7168_vm2, %v1306_v45, %v1556_v26  ;;  %v1347_v58 = vor.u32 %v1345_v36, %v7394_v46  ;;  %v1348_v62 = vrot.slane %v7394_v46, 4  ;;  %v7421_v7 = vpop.f32.mrb[27].mxu0 }
 0x1cd   : > { %5607 = vmatprep.subr.bf16.mxu0 %v7385_v33  ;;  %1555 = vst [vmem:[#allocation2 + $0x58] sm:$0xf] %v1305_v56  ;;  %1558 = vst [vmem:[#allocation2 + $0x5c] sm:$0x1] %v1557_v57  ;;  %v1325_v0 = vshrl.u32 %v5428_v51, 16  ;;  %v1328_v2 = vshll.u32 %v5428_v51, 16  ;;  %v934_v5 = vadd.f32 %v7249_v39, %v895_v52  ;;  %v5431_v24 = vpack.c.bf16 %v968_v4, %v968_v4 }
 0x1ce   : > { %v1574_v14 = vsel %vm7264_vm7, %v1347_v58, %v1573_v50  ;;  %v1852_v17 = vshrl.u32 %v7327_v9, 16  ;;  %v1854_v10 = vshll.u32 %v7327_v9, 16  ;;  %v1859_v20 = vshll.u32 %v7343_v11, 16  ;;  %v7443_v36 = vld [vmem:[#allocation8 + $0x58] sm:$0xff]  }
 0x1cf   : > { %1575 = vst [vmem:[#allocation2 + $0x78] sm:$0xf] %v1574_v14  ;;  %v7432_v23 = vrot.slane %v1325_v0, 7  ;;  %v966_v25 = vmax.f32 %v934_v5, 0.0  ;;  %v1864_v26 = vshrl.u32 %v7359_v60, 16  ;;  %5608 = vmatpush3.bf16.msra.mxu0 %v7406_v54  ;;  %v1866_v34 = vshll.u32 %v7359_v60, 16 }
 0x1d0   : > { %v1856_v29 = vrot.slane %v1854_v10, 1  ;;  %v1861_v30 = vrot.slane %v1859_v20, 1  ;;  %v1871_v35 = vshll.u32 %v7364_v3, 16  ;;  %v7440_v11 = vpop.f32.mrb[28].mxu0  ;;  %5609 = vmatprep.subr.bf16.mxu0 %v7418_v21  ;;  %v1350_v38 = vshrl.u32 %v5431_v24, 16  ;;  %v7447_v44 = vld [vmem:[#allocation2 + $0x30] sm:$0xff]  }
 0x1d1   : > { %v1330_v40 = vor.u32 %v1328_v2, %v7432_v23  ;;  %v1331_v41 = vrot.slane %v7432_v23, 4  ;;  %v1353_v42 = vshll.u32 %v5431_v24, 16  ;;  %v7449_v45 = vpop.f32.mrb[29].mxu0  ;;  %v5429_v6 = vpack.c.bf16 %v966_v25, %v966_v25  ;;  %v7451_v51 = vld [vmem:[#allocation2 + $0x38] ss:$0 sps:$4 sm:$0x11]  }
 0x1d2   : > { %v1857_v49 = vor.u32 %v1856_v29, %v1852_v17  ;;  %v1868_v3 = vrot.slane %v1866_v34, 1  ;;  %v1873_v50 = vrot.slane %v1871_v35, 1  ;;  %v7453_v52 = vpop.f32.mrb[30].mxu0  ;;  %v1352_v57 = vrot.slane %v1350_v38, 7  ;;  %v7468_v20 = vld [vmem:[#allocation8 + $0x18] sm:$0xff]   ;;  %v7477_v29 = vld [vmem:[#allocation8 + $0x60] sm:$0xff]  }
 0x1d3   : > { %v1567_v56 = vsel %vm7264_vm7, %v1330_v40, %v1566_v15  ;;  %v900_v58 = vmul.f32 %v7349_v48, %v7244_v37  ;;  %v2083_v0 = vrot.slane %v7430_v22, 1  ;;  %5610 = vmatpush3.bf16.msra.mxu0 %v7423_v12  ;;  %v1333_v2 = vshrl.u32 %v5429_v6, 16  ;;  %v1570_v35 = vld [vmem:[#allocation2 + $0x74] sm:$0x1]  ;;  %v7490_v40 = vpop.f32.mrb[31].mxu0 }
 0x1d4   : > { %1568 = vst [vmem:[#allocation2 + $0x6c] sm:$0xf] %v1567_v56  ;;  %v1336_v4 = vshll.u32 %v5429_v6, 16  ;;  %v7462_v5 = vsel %vm1838_vm10, %v1857_v49, %v1861_v30  ;;  %v1869_v14 = vor.u32 %v1868_v3, %v1864_v26  ;;  %5611 = vmatprep.subr.bf16.mxu0 %v7443_v36  ;;  %v1355_v17 = vor.u32 %v1353_v42, %v1352_v57  ;;  %v7501_v3 = vld [vmem:[#allocation2 + $0x3c] sm:$0xff]  }
 0x1d5   : > { %v1357_v10 = vrot.slane %v1352_v57, 4  ;;  %2418 = vmatprep.mubr.bf16.mxu1 %v7462_v5  ;;  %v939_v15 = vadd.f32 %v7249_v39, %v900_v58  ;;  %v2084_v48 = vrot.slane %v7435_v28, 1  ;;  %v1335_v23 = vrot.slane %v1333_v2, 7 }
 0x1d6   : > { %2419 = vmatmul.mubr.bf16.vlgmr.msra.gmra.mrb[0].mxu1 %v7327_v9  ;;  %v7472_v24 = vsel %vm1838_vm10, %v1869_v14, %v1873_v50  ;;  %v898_v25 = vmul.f32 %v7244_v37, %v7361_v61  ;;  %v2086_v26 = vrot.slane %v7447_v44, 1  ;;  %v1356_v30 = vsel %vm7271_vm8, %v1348_v62, %v1355_v17  ;;  %v7504_v50 = vld [vmem:[#allocation8 + $0x20] sm:$0xff]  }
 0x1d7   : > { %v1578_v34 = vsel %vm7168_vm2, %v1357_v10, %v1577_v47  ;;  %6149 = vmatpush3.bf16.msra.mxu1 %v7383_v31  ;;  %2426 = vmatprep.mubr.bf16.mxu1 %v7472_v24  ;;  %v971_v9 = vmax.f32 %v939_v15, 0.0  ;;  %v7488_v61 = vsel %vm2073_vm9, %v2083_v0, %v2084_v48  ;;  %1576 = vst [vmem:[#allocation2 + $0x7c] sm:$0xf] %v1356_v30  ;;  %v1340_v38 = vrot.slane %v1335_v23, 4 }
 0x1d8   : > { %1579 = vst [vmem:[#allocation2 + $0x80] sm:$0x1] %v1578_v34  ;;  %v1338_v46 = vor.u32 %v1336_v4, %v1335_v23  ;;  %5969 = vmatprep.mubr.bf16.mxu0 %v7488_v61  ;;  %v937_v62 = vadd.f32 %v7249_v39, %v898_v25  ;;  %v2087_v42 = vrot.slane %v7451_v51, 1  ;;  %6142 = vmatprep.subr.bf16.mxu1 %v7385_v33  ;;  %v1876_v49 = vshrl.u32 %v7430_v22, 16  ;;  %v1587_v4 = vld [vmem:[#allocation2 + $0x90] sm:$0xf] }
 0x1d9   : > { %v5434_v31 = vpack.c.bf16 %v971_v9, %v971_v9  ;;  %v901_v47 = vmul.f32 %v7368_v1, %v7244_v37  ;;  %v899_v6 = vmul.f32 %v7244_v37, %v7375_v19  ;;  %5612 = vmatpush3.bf16.msra.mxu0 %v7468_v20  ;;  %v1571_v33 = vsel %vm7168_vm2, %v1340_v38, %v1570_v35  ;;  %v7514_v19 = vld [vmem:[#allocation8 + $0x68] sm:$0xff]   ;;  %v7535_v9 = vld [vmem:[#allocation8 + $0x70] sm:$0xff]  }
 0x1da   : > { %v1339_v56 = vsel %vm7271_vm8, %v1331_v41, %v1338_v46  ;;  %v969_v57 = vmax.f32 %v937_v62, 0.0  ;;  %v7511_v1 = vsel %vm2073_vm9, %v2086_v26, %v2087_v42  ;;  %5613 = vmatprep.subr.bf16.mxu0 %v7477_v29  ;;  %1572 = vst [vmem:[#allocation2 + $0x74] sm:$0x1] %v1571_v33  ;;  %v1878_v17 = vshll.u32 %v7430_v22, 16 }
 0x1db   : > { %1569 = vst [vmem:[#allocation2 + $0x70] sm:$0xf] %v1339_v56  ;;  %v1376_v58 = vshrl.u32 %v5434_v31, 16  ;;  %v1379_v0 = vshll.u32 %v5434_v31, 16  ;;  %5970 = vmatmul.mubr.bf16.gmra.mrb[36].mxu0 %v7511_v1  ;;  %v940_v2 = vadd.f32 %v7249_v39, %v901_v47  ;;  %v938_v41 = vadd.f32 %v7249_v39, %v899_v6  ;;  %6150 = vmatpush3.bf16.msra.mxu1 %v7406_v54  ;;  %v7531_v54 = vld [vmem:[#allocation8 + $0x28] sm:$0xff]   ;;  %v7542_v6 = vld [vmem:[#allocation2 + $0x48] sm:$0xff]  }
 0x1dc   : > { %v5432_v14 = vpack.c.bf16 %v969_v57, %v969_v57  ;;  %v1883_v10 = vshll.u32 %v7435_v28, 16  ;;  %v904_v15 = vmul.f32 %v7389_v32, %v7244_v37  ;;  %v7524_v48 = vld [vmem:[#allocation2 + $0x44] ss:$0 sps:$4 sm:$0x11]   ;;  %6143 = vmatprep.subr.bf16.mxu1 %v7418_v21  ;;  %v2089_v30 = vrot.slane %v7501_v3, 1 }
 0x1dd   : > { %v7527_v23 = vrot.slane %v1376_v58, 7  ;;  %v972_v25 = vmax.f32 %v940_v2, 0.0  ;;  %v970_v26 = vmax.f32 %v938_v41, 0.0  ;;  %5614 = vmatpush3.bf16.msra.mxu0 %v7504_v50  ;;  %v1880_v28 = vrot.slane %v1878_v17, 1  ;;  %v1580_v57 = vld [vmem:[#allocation2 + $0x84] sm:$0xf] }
 0x1de   : > { %v1359_v34 = vshrl.u32 %v5432_v14, 16  ;;  %v1362_v35 = vshll.u32 %v5432_v14, 16  ;;  %2427 = vmatmul.mubr.bf16.gmra.mrb[4].mxu1 %v7359_v60  ;;  %v1885_v32 = vrot.slane %v1883_v10, 1  ;;  %5615 = vmatprep.subr.bf16.mxu0 %v7514_v19  ;;  %v943_v47 = vadd.f32 %v7249_v39, %v904_v15  ;;  %v7544_v56 = vld [vmem:[#allocation2 + $0x50] ss:$0 sps:$4 sm:$0x11]  }
 0x1df   : > { %v1381_v21 = vor.u32 %v1379_v0, %v7527_v23  ;;  %v1382_v46 = vrot.slane %v7527_v23, 4  ;;  %v5435_v38 = vpack.c.bf16 %v972_v25, %v972_v25  ;;  %v5433_v62 = vpack.c.bf16 %v970_v26, %v970_v26  ;;  %6151 = vmatpush3.bf16.msra.mxu1 %v7423_v12  ;;  %v7550_v12 = vld [vmem:[#allocation8 + $0x30] sm:$0xff]   ;;  %v1591_v10 = vld [vmem:[#allocation2 + $0x98] sm:$0x1] }
 0x1e0   : > { %v1361_v42 = vrot.slane %v1359_v34, 7  ;;  %v1881_v31 = vor.u32 %v1880_v28, %v1876_v49  ;;  %v2090_v60 = vrot.slane %v7524_v48, 1  ;;  %6144 = vmatprep.subr.bf16.mxu1 %v7443_v36  ;;  %v975_v15 = vmax.f32 %v943_v47, 0.0  ;;  %v1584_v26 = vld [vmem:[#allocation2 + $0x8c] sm:$0x1] }
 0x1e1   : > { %v1588_v33 = vsel %vm7264_vm7, %v1381_v21, %v1587_v4  ;;  %v1384_v58 = vshrl.u32 %v5435_v38, 16  ;;  %v1387_v0 = vshll.u32 %v5435_v38, 16  ;;  %v1367_v2 = vshrl.u32 %v5433_v62, 16  ;;  %5616 = vmatpush3.bf16.msra.mxu0 %v7531_v54 }
 0x1e2   : > { %1589 = vst [vmem:[#allocation2 + $0x90] sm:$0xf] %v1588_v33  ;;  %v1364_v49 = vor.u32 %v1362_v35, %v1361_v42  ;;  %v1365_v41 = vrot.slane %v1361_v42, 4  ;;  %v1370_v14 = vshll.u32 %v5433_v62, 16  ;;  %v7553_v17 = vsel %vm1838_vm10, %v1881_v31, %v1885_v32  ;;  %5617 = vmatprep.subr.bf16.mxu0 %v7535_v9  ;;  %v7568_v32 = vld [vmem:[#allocation8 + $0x78] sm:$0xff]  }
 0x1e3   : > { %v1386_v36 = vrot.slane %v1384_v58, 7  ;;  %v1369_v4 = vrot.slane %v1367_v2, 7  ;;  %2434 = vmatprep.mubr.bf16.mxu1 %v7553_v17  ;;  %v7558_v23 = vsel %vm2073_vm9, %v2089_v30, %v2090_v60  ;;  %6152 = vmatpush3.bf16.msra.mxu1 %v7468_v20  ;;  %v902_v34 = vmul.f32 %v7244_v37, %v7404_v53  ;;  %v7572_v62 = vld [vmem:[#allocation8 + $0x38] sm:$0xff]  }
 0x1e4   : > { %v1581_v25 = vsel %vm7264_vm7, %v1364_v49, %v1580_v57  ;;  %5973 = vmatprep.mubr.bf16.mxu0 %v7558_v23  ;;  %v2092_v35 = vrot.slane %v7542_v6, 1  ;;  %v2093_v28 = vrot.slane %v7544_v56, 1  ;;  %6145 = vmatprep.subr.bf16.mxu1 %v7477_v29  ;;  %v5438_v42 = vpack.c.bf16 %v975_v15, %v975_v15  ;;  %v7581_v29 = vld [vmem:[#allocation8 + $0x80] sm:$0xff]  }
 0x1e5   : > { %1582 = vst [vmem:[#allocation2 + $0x84] sm:$0xf] %v1581_v25  ;;  %v1389_v30 = vor.u32 %v1387_v0, %v1386_v36  ;;  %v1391_v20 = vrot.slane %v1386_v36, 4  ;;  %v1372_v21 = vor.u32 %v1370_v14, %v1369_v4  ;;  %v1374_v38 = vrot.slane %v1369_v4, 4  ;;  %5618 = vmatpush3.bf16.msra.mxu0 %v7550_v12  ;;  %v7592_v0 = vld [vmem:[#allocation2 + $0x54] sm:$0xff]  }
 0x1e6   : > { %v941_v53 = vadd.f32 %v7249_v39, %v902_v34  ;;  %v7576_v31 = vsel %vm2073_vm9, %v2092_v35, %v2093_v28  ;;  %v905_v47 = vmul.f32 %v7415_v63, %v7244_v37  ;;  %2435 = vmatmul.mubr.bf16.gmra.mrb[8].mxu1 %v7430_v22  ;;  %v1410_v63 = vshrl.u32 %v5438_v42, 16  ;;  %5619 = vmatprep.subr.bf16.mxu0 %v7568_v32 }
 0x1e7   : > { %v1390_v60 = vsel %vm7271_vm8, %v1382_v46, %v1389_v30  ;;  %v1592_v33 = vsel %vm7168_vm2, %v1391_v20, %v1591_v10  ;;  %v1373_v57 = vsel %vm7271_vm8, %v1365_v41, %v1372_v21  ;;  %v1585_v58 = vsel %vm7168_vm2, %v1374_v38, %v1584_v26  ;;  %5974 = vmatmul.mubr.bf16.gmra.mrb[40].mxu0 %v7576_v31  ;;  %v1594_v21 = vld [vmem:[#allocation2 + $0x9c] sm:$0xf] }
 0x1e8   : > { %1590 = vst [vmem:[#allocation2 + $0x94] sm:$0xf] %v1390_v60  ;;  %1593 = vst [vmem:[#allocation2 + $0x98] sm:$0x1] %v1592_v33  ;;  %v1413_v2 = vshll.u32 %v5438_v42, 16  ;;  %v973_v46 = vmax.f32 %v941_v53, 0.0  ;;  %v944_v49 = vadd.f32 %v7249_v39, %v905_v47  ;;  %6153 = vmatpush3.bf16.msra.mxu1 %v7504_v50  ;;  %v903_v41 = vmul.f32 %v7244_v37, %v7421_v7 }
 0x1e9   : > { %1583 = vst [vmem:[#allocation2 + $0x88] sm:$0xf] %v1373_v57  ;;  %1586 = vst [vmem:[#allocation2 + $0x8c] sm:$0x1] %v1585_v58  ;;  %v1888_v14 = vshrl.u32 %v7447_v44, 16  ;;  %v1890_v36 = vshll.u32 %v7447_v44, 16  ;;  %5620 = vmatpush3.bf16.msra.mxu0 %v7572_v62  ;;  %6146 = vmatprep.subr.bf16.mxu1 %v7514_v19 }
 0x1ea   : > { %v1895_v10 = vshll.u32 %v7451_v51, 16  ;;  %v7604_v4 = vrot.slane %v1410_v63, 7  ;;  %v5436_v39 = vpack.c.bf16 %v973_v46, %v973_v46  ;;  %v976_v15 = vmax.f32 %v944_v49, 0.0  ;;  %v7609_v50 = vld [vmem:[%s8557_s2] ss:$0 sm:$0xff]  ;;  %5997 = vmatprep.subr.bf16.mxu0 %v7581_v29 }
 0x1eb   : > { %v908_v37 = vmul.f32 %v7609_v50, %v7440_v11  ;;  %v7613_v7 = vld [vmem:[#allocation2 + $0x5c] ss:$0 sps:$4 sm:$0x11]   ;;  %v1601_v51 = vld [vmem:[#allocation2 + $0xa8] sm:$0xf]  ;;  %v1892_v26 = vrot.slane %v1890_v36, 1  ;;  %v906_v58 = vmul.f32 %v7609_v50, %v7449_v45 }
 0x1ec   : > { %v7619_v19 = vld [vmem:[%s8558_s3] ss:$0 sm:$0xff]  ;;  %v1897_v34 = vrot.slane %v1895_v10, 1  ;;  %v2095_v35 = vrot.slane %v7592_v0, 1  ;;  %v1415_v28 = vor.u32 %v1413_v2, %v7604_v4  ;;  %v1416_v11 = vrot.slane %v7604_v4, 4  ;;  %6154 = vmatpush3.bf16.msra.mxu1 %v7531_v54 }
 0x1ed   : > { %v942_v25 = vadd.f32 %v7619_v19, %v903_v41  ;;  %v1393_v30 = vshrl.u32 %v5436_v39, 16  ;;  %v1396_v20 = vshll.u32 %v5436_v39, 16  ;;  %v5439_v38 = vpack.c.bf16 %v976_v15, %v976_v15  ;;  %6147 = vmatprep.subr.bf16.mxu1 %v7535_v9  ;;  %v7633_v63 = vld [vmem:[#allocation2 + $0x60] sm:$0xff]   ;;  %v7635_v54 = vld [vmem:[#allocation2 + $0x68] ss:$0 sps:$4 sm:$0x11]  }
 0x1ee   : > { %v1893_v53 = vor.u32 %v1892_v26, %v1888_v14  ;;  %v947_v47 = vadd.f32 %v7619_v19, %v908_v37  ;;  %v1602_v60 = vsel %vm7264_vm7, %v1415_v28, %v1601_v51  ;;  %v2096_v57 = vrot.slane %v7613_v7, 1  ;;  %v6513_v37 = vld [vmem:[#allocation8 + $0x1c0] sm:$0xff]  }
 0x1ef   : > { %v974_v42 = vmax.f32 %v942_v25, 0.0  ;;  %v1395_v33 = vrot.slane %v1393_v30, 7  ;;  %1603 = vst [vmem:[#allocation2 + $0xa8] sm:$0xf] %v1602_v60  ;;  %v1418_v2 = vshrl.u32 %v5439_v38, 16  ;;  %v1421_v46 = vshll.u32 %v5439_v38, 16 }
 0x1f0   : > { %v7638_v41 = vsel %vm1838_vm10, %v1893_v53, %v1897_v34  ;;  %v979_v36 = vmax.f32 %v947_v47, 0.0  ;;  %v7642_v10 = vsel %vm2073_vm9, %v2095_v35, %v2096_v57  ;;  %6155 = vmatpush3.bf16.msra.mxu1 %v7550_v12  ;;  %v945_v15 = vadd.f32 %v7619_v19, %v906_v58  ;;  %v1605_v25 = vld [vmem:[#allocation2 + $0xb0] sm:$0x1]  ;;  %v1598_v38 = vld [vmem:[#allocation2 + $0xa4] sm:$0x1] }
 0x1f1   : > { %v5437_v49 = vpack.c.bf16 %v974_v42, %v974_v42  ;;  %v1398_v9 = vor.u32 %v1396_v20, %v1395_v33  ;;  %v1399_v14 = vrot.slane %v1395_v33, 4  ;;  %2442 = vmatprep.mubr.bf16.mxu1 %v7638_v41  ;;  %v1420_v45 = vrot.slane %v1418_v2, 7  ;;  %5977 = vmatprep.mubr.bf16.mxu0 %v7642_v10  ;;  %v7664_v58 = vld [vmem:[#allocation2 + $0x6c] sm:$0xff]  }
 0x1f2   : > { %2443 = vmatmul.mubr.bf16.gmra.mrb[12].mxu1 %v7447_v44  ;;  %v5442_v26 = vpack.c.bf16 %v979_v36, %v979_v36  ;;  %v2098_v34 = vrot.slane %v7633_v63, 1  ;;  %v2099_v35 = vrot.slane %v7635_v54, 1  ;;  %6148 = vmatprep.subr.bf16.mxu1 %v7568_v32  ;;  %v977_v20 = vmax.f32 %v945_v15, 0.0  ;;  %v1615_v36 = vld [vmem:[#allocation2 + $0xc0] sm:$0xf] }
 0x1f3   : > { %v1401_v4 = vshrl.u32 %v5437_v49, 16  ;;  %v1404_v39 = vshll.u32 %v5437_v49, 16  ;;  %v1595_v51 = vsel %vm7264_vm7, %v1398_v9, %v1594_v21  ;;  %v1423_v12 = vor.u32 %v1421_v46, %v1420_v45  ;;  %v7671_v46 = vld [vmem:[#allocation2 + $0x74] ss:$0 sps:$4 sm:$0x11]  }
 0x1f4   : > { %1596 = vst [vmem:[#allocation2 + $0x9c] sm:$0xf] %v1595_v51  ;;  %v1425_v28 = vrot.slane %v1420_v45, 4  ;;  %v1444_v42 = vshrl.u32 %v5442_v26, 16  ;;  %v1447_v53 = vshll.u32 %v5442_v26, 16  ;;  %v7654_v47 = vsel %vm2073_vm9, %v2098_v34, %v2099_v35  ;;  %6156 = vmatpush3.bf16.msra.mxu1 %v7572_v62 }
 0x1f5   : > { %v1403_v30 = vrot.slane %v1401_v4, 7  ;;  %v909_v21 = vmul.f32 %v7609_v50, %v7453_v52  ;;  %v1424_v60 = vsel %vm7271_vm8, %v1416_v11, %v1423_v12  ;;  %5978 = vmatmul.mubr.bf16.gmra.mrb[44].mxu0 %v7654_v47  ;;  %5741 = vmatprep.subr.bf16.mxu1 %v6513_v37  ;;  %v5440_v52 = vpack.c.bf16 %v977_v20, %v977_v20  ;;  %v7681_v37 = vld [vmem:[#allocation2 + $0x78] sm:$0xff]   ;;  %v7685_v34 = vld [vmem:[#allocation2 + $0x80] ss:$0 sps:$4 sm:$0x11]  }
 0x1f6   : > { %v1606_v32 = vsel %vm7168_vm2, %v1425_v28, %v1605_v25  ;;  %1604 = vst [vmem:[#allocation2 + $0xac] sm:$0xf] %v1424_v60  ;;  %v7666_v2 = vrot.slane %v1444_v42, 7  ;;  %v907_v11 = vmul.f32 %v7609_v50, %v7490_v40  ;;  %v1900_v45 = vshrl.u32 %v7501_v3, 16  ;;  %v1608_v20 = vld [vmem:[#allocation2 + $0xb4] sm:$0xf] }
 0x1f7   : > { %v1406_v33 = vor.u32 %v1404_v39, %v1403_v30  ;;  %v1408_v57 = vrot.slane %v1403_v30, 4  ;;  %1607 = vst [vmem:[#allocation2 + $0xb0] sm:$0x1] %v1606_v32  ;;  %v948_v62 = vadd.f32 %v7619_v19, %v909_v21  ;;  %v1902_v4 = vshll.u32 %v7501_v3, 16 }
 0x1f8   : > { %v1449_v39 = vor.u32 %v1447_v53, %v7666_v2  ;;  %v1450_v15 = vrot.slane %v7666_v2, 4  ;;  %v1427_v40 = vshrl.u32 %v5440_v52, 16  ;;  %v1430_v50 = vshll.u32 %v5440_v52, 16  ;;  %v7699_v2 = vld [vmem:[#allocation2 + $0x90] sm:$0xff]  }
 0x1f9   : > { %v1407_v49 = vsel %vm7271_vm8, %v1399_v14, %v1406_v33  ;;  %v1599_v9 = vsel %vm7168_vm2, %v1408_v57, %v1598_v38  ;;  %v980_v51 = vmax.f32 %v948_v62, 0.0  ;;  %v946_v14 = vadd.f32 %v7619_v19, %v907_v11  ;;  %v7691_v19 = vld [vmem:[#allocation2 + $0x84] sm:$0xff]   ;;  %v7697_v57 = vld [vmem:[#allocation2 + $0x8c] ss:$0 sps:$4 sm:$0x11]  }
 0x1fa   : > { %1597 = vst [vmem:[#allocation2 + $0xa0] sm:$0xf] %v1407_v49  ;;  %1600 = vst [vmem:[#allocation2 + $0xa4] sm:$0x1] %v1599_v9  ;;  %v1904_v25 = vrot.slane %v1902_v4, 1  ;;  %v1907_v26 = vshll.u32 %v7524_v48, 16  ;;  %v1616_v35 = vsel %vm7264_vm7, %v1449_v39, %v1615_v36 }
 0x1fb   : > { %v1429_v12 = vrot.slane %v1427_v40, 7  ;;  %v2101_v28 = vrot.slane %v7664_v58, 1  ;;  %v2102_v30 = vrot.slane %v7671_v46, 1  ;;  %1617 = vst [vmem:[#allocation2 + $0xc0] sm:$0xf] %v1616_v35  ;;  %v5443_v38 = vpack.c.bf16 %v980_v51, %v980_v51 }
 0x1fc   : > { %v978_v42 = vmax.f32 %v946_v14, 0.0  ;;  %v1905_v53 = vor.u32 %v1904_v25, %v1900_v45  ;;  %v1909_v21 = vrot.slane %v1907_v26, 1  ;;  %v2104_v33 = vrot.slane %v7681_v37, 1  ;;  %v1619_v36 = vld [vmem:[#allocation2 + $0xc8] sm:$0x1] }
 0x1fd   : > { %v1432_v60 = vor.u32 %v1430_v50, %v1429_v12  ;;  %v1433_v48 = vrot.slane %v1429_v12, 4  ;;  %v7694_v32 = vsel %vm2073_vm9, %v2101_v28, %v2102_v30  ;;  %v1452_v52 = vshrl.u32 %v5443_v38, 16  ;;  %v7711_v40 = vld [vmem:[#allocation2 + $0x98] ss:$0 sps:$4 sm:$0x11]  }
 0x1fe   : > { %v1455_v62 = vshll.u32 %v5443_v38, 16  ;;  %v5441_v11 = vpack.c.bf16 %v978_v42, %v978_v42  ;;  %v7702_v49 = vsel %vm1838_vm10, %v1905_v53, %v1909_v21  ;;  %5981 = vmatprep.mubr.bf16.mxu0 %v7694_v32  ;;  %v2105_v45 = vrot.slane %v7685_v34, 1  ;;  %v1612_v38 = vld [vmem:[#allocation2 + $0xbc] sm:$0x1] }
 0x1ff   : > { %v1609_v9 = vsel %vm7264_vm7, %v1432_v60, %v1608_v20  ;;  %2450 = vmatprep.mubr.bf16.mxu1 %v7702_v49  ;;  %v1912_v4 = vshrl.u32 %v7542_v6, 16  ;;  %v1914_v39 = vshll.u32 %v7542_v6, 16  ;;  %v1454_v50 = vrot.slane %v1452_v52, 7 }
 0x200   : > { %1610 = vst [vmem:[#allocation2 + $0xb4] sm:$0xf] %v1609_v9  ;;  %v1435_v51 = vshrl.u32 %v5441_v11, 16  ;;  %v1438_v14 = vshll.u32 %v5441_v11, 16  ;;  %2451 = vmatmul.mubr.bf16.gmra.mrb[16].mxu1 %v7501_v3  ;;  %v1919_v13 = vshll.u32 %v7544_v56, 16  ;;  %v7716_v25 = vsel %vm2073_vm9, %v2104_v33, %v2105_v45 }
 0x201   : > { %v1916_v26 = vrot.slane %v1914_v39, 1  ;;  %v2107_v35 = vrot.slane %v7691_v19, 1  ;;  %v2108_v12 = vrot.slane %v7697_v57, 1  ;;  %v1457_v28 = vor.u32 %v1455_v62, %v1454_v50  ;;  %5982 = vmatmul.mubr.bf16.gmra.mrb[48].mxu0 %v7716_v25  ;;  %v7721_v53 = vld [vmem:[#allocation2 + $0x9c] sm:$0xff]  }
 0x202   : > { %v1459_v30 = vrot.slane %v1454_v50, 4  ;;  %v1437_v20 = vrot.slane %v1435_v51, 7  ;;  %v1921_v42 = vrot.slane %v1919_v13, 1  ;;  %v2110_v60 = vrot.slane %v7699_v2, 1 }
 0x203   : > { %v1917_v21 = vor.u32 %v1916_v26, %v1912_v4  ;;  %v7724_v56 = vsel %vm2073_vm9, %v2107_v35, %v2108_v12  ;;  %v2111_v33 = vrot.slane %v7711_v40, 1  ;;  %v7728_v52 = vld [vmem:[#allocation2 + $0xa4] ss:$0 sps:$4 sm:$0x11]   ;;  %v1458_v62 = vsel %vm7271_vm8, %v1450_v15, %v1457_v28 }
 0x204   : > { %v1620_v11 = vsel %vm7168_vm2, %v1459_v30, %v1619_v36  ;;  %v1440_v9 = vor.u32 %v1438_v14, %v1437_v20  ;;  %v1442_v45 = vrot.slane %v1437_v20, 4  ;;  %5985 = vmatprep.mubr.bf16.mxu0 %v7724_v56  ;;  %1618 = vst [vmem:[#allocation2 + $0xc4] sm:$0xf] %v1458_v62  ;;  %v1924_v39 = vshrl.u32 %v7592_v0, 16  ;;  %v7759_v30 = vld [vmem:[#allocation2] sm:$0xff]  }
 0x205   : > { %1621 = vst [vmem:[#allocation2 + $0xc8] sm:$0x1] %v1620_v11  ;;  %v7736_v4 = vsel %vm1838_vm10, %v1917_v21, %v1921_v42  ;;  %v1926_v50 = vshll.u32 %v7592_v0, 16  ;;  %v1931_v36 = vshll.u32 %v7613_v7, 16  ;;  %v2113_v14 = vrot.slane %v7721_v53, 1 }
 0x206   : > { %v1441_v51 = vsel %vm7271_vm8, %v1433_v48, %v1440_v9  ;;  %v1613_v15 = vsel %vm7168_vm2, %v1442_v45, %v1612_v38  ;;  %2458 = vmatprep.mubr.bf16.mxu1 %v7736_v4  ;;  %v7747_v13 = vld [vmem:[#allocation2 + $0xb0] ss:$0 sps:$4 sm:$0x11]   ;;  %v7750_v26 = vsel %vm2073_vm9, %v2110_v60, %v2111_v33  ;;  %v2114_v27 = vrot.slane %v7728_v52, 1  ;;  %v7753_v48 = vld [vmem:[#allocation2 + $0xa8] sm:$0xff]  }
 0x207   : > { %1611 = vst [vmem:[#allocation2 + $0xb8] sm:$0xf] %v1441_v51  ;;  %1614 = vst [vmem:[#allocation2 + $0xbc] sm:$0x1] %v1613_v15  ;;  %v1928_v35 = vrot.slane %v1926_v50, 1  ;;  %v1933_v8 = vrot.slane %v1931_v36, 1 }
 0x208   : > { %2459 = vmatmul.mubr.bf16.gmra.mrb[20].mxu1 %v7542_v6  ;;  %v1936_v12 = vshrl.u32 %v7633_v63, 16  ;;  %v1938_v7 = vshll.u32 %v7633_v63, 16  ;;  %v1943_v28 = vshll.u32 %v7635_v54, 16  ;;  %v7762_v38 = vsel %vm2073_vm9, %v2113_v14, %v2114_v27  ;;  %v6507_v21 = vld [vmem:[#allocation2 + $0x8] ss:$0 sps:$4 sm:$0x11]  }
 0x209   : > { %v1929_v20 = vor.u32 %v1928_v35, %v1924_v39  ;;  %5986 = vmatmul.mubr.bf16.gmra.mrb[52].mxu0 %v7750_v26  ;;  %v2116_v33 = vrot.slane %v7753_v48, 1  ;;  %v2117_v62 = vrot.slane %v7747_v13, 1  ;;  %v1950_v9 = vshll.u32 %v7664_v58, 16 }
 0x20a   : > { %v1940_v42 = vrot.slane %v1938_v7, 1  ;;  %5989 = vmatprep.mubr.bf16.mxu0 %v7762_v38  ;;  %v1945_v54 = vrot.slane %v1943_v28, 1  ;;  %v1842_v45 = vshll.u32 %v7759_v30, 16  ;;  %v1948_v50 = vshrl.u32 %v7664_v58, 16 }
 0x20b   : > { %v7766_v60 = vsel %vm1838_vm10, %v1929_v20, %v1933_v8  ;;  %v7774_v39 = vld [vmem:[#allocation2 + $0xc0] sm:$0xff]   ;;  %v1955_v51 = vshll.u32 %v7671_v46, 16  ;;  %v1840_v15 = vshrl.u32 %v7759_v30, 16  ;;  %v1847_v14 = vshll.u32 %v6507_v21, 16 }
 0x20c   : > { %2466 = vmatprep.mubr.bf16.mxu1 %v7766_v60  ;;  %v1941_v11 = vor.u32 %v1940_v42, %v1936_v12  ;;  %v7782_v35 = vsel %vm2073_vm9, %v2116_v33, %v2117_v62  ;;  %v7786_v8 = vld [vmem:[#allocation2 + $0xc8] ss:$0 sps:$4 sm:$0x11]   ;;  %v1952_v46 = vrot.slane %v1950_v9, 1  ;;  %v1844_v28 = vrot.slane %v1842_v45, 1 }
 0x20d   : > { %v2122_v33 = vrot.slane %v7774_v39, 1  ;;  %v2123_v62 = vrot.slane %v7786_v8, 1  ;;  %v1957_v59 = vrot.slane %v1955_v51, 1  ;;  %v1849_v9 = vrot.slane %v1847_v14, 1 }
 0x20e   : > { %v7779_v36 = vld [vmem:[#allocation2 + $0xb4] sm:$0xff]   ;;  %v7784_v27 = vld [vmem:[#allocation2 + $0xbc] ss:$0 sps:$4 sm:$0x11]   ;;  %v7790_v12 = vsel %vm1838_vm10, %v1941_v11, %v1945_v54  ;;  %v1953_v54 = vor.u32 %v1952_v46, %v1948_v50  ;;  %v1845_v11 = vor.u32 %v1844_v28, %v1840_v15  ;;  %v1962_v45 = vshll.u32 %v7681_v37, 16 }
 0x20f   : > { %v2119_v7 = vrot.slane %v7779_v36, 1  ;;  %v2120_v20 = vrot.slane %v7784_v27, 1  ;;  %v7804_v55 = vsel %vm2073_vm9, %v2122_v33, %v2123_v62  ;;  %v1960_v16 = vshrl.u32 %v7681_v37, 16 }
 0x210   : > { %2467 = vmatmul.mubr.bf16.gmra.mrb[24].mxu1 %v7592_v0  ;;  %v1964_v51 = vrot.slane %v1962_v45, 1  ;;  %v2074_v50 = vrot.slane %v7759_v30, 1  ;;  %v2075_v15 = vrot.slane %v6507_v21, 1  ;;  %v1974_v28 = vshll.u32 %v7691_v19, 16 }
 0x211   : > { %2474 = vmatprep.mubr.bf16.mxu1 %v7790_v12  ;;  %5990 = vmatmul.mubr.bf16.gmra.mrb[56].mxu0 %v7782_v35  ;;  %v7797_v42 = vsel %vm2073_vm9, %v2119_v7, %v2120_v20  ;;  %v7809_v7 = vsel %vm1838_vm10, %v1953_v54, %v1957_v59  ;;  %v1850_v20 = vsel %vm1838_vm10, %v1845_v11, %v1849_v9  ;;  %v1979_v54 = vshll.u32 %v7697_v57, 16  ;;  %v6509_v11 = vld [vmem:[#allocation8 + $0x88] sm:$0xff]   ;;  %v6510_v9 = vld [vmem:[#allocation8 + $0x90] sm:$0xff]  }
 0x212   : > { %8612 = vst [vmem:[#allocation22_spill] sm:$0xff] %v7797_v42  ;;  %5993 = vmatprep.mubr.bf16.mxu0 %v7797_v42  ;;  %v1967_v42 = vshll.u32 %v7685_v34, 16  ;;  %v1965_v14 = vor.u32 %v1964_v51, %v1960_v16  ;;  %v7818_v59 = vsel %vm2073_vm9, %v2074_v50, %v2075_v15  ;;  %v1972_v34 = vshrl.u32 %v7691_v19, 16 }
 0x213   : > { %v1976_v62 = vrot.slane %v1974_v28, 1  ;;  %v1981_v21 = vrot.slane %v1979_v54, 1  ;;  %v1984_v45 = vshrl.u32 %v7699_v2, 16  ;;  %v1998_v15 = vshll.u32 %v7721_v53, 16  ;;  %v7847_v54 = vld [vmem:[#allocation2 + $0x18] sm:$0xff]  }
 0x214   : > { %v1969_v46 = vrot.slane %v1967_v42, 1  ;;  %v1986_v42 = vshll.u32 %v7699_v2, 16 }
 0x215   : > { %v1977_v16 = vor.u32 %v1976_v62, %v1972_v34  ;;  %v2000_v28 = vrot.slane %v1998_v15, 1  ;;  %v2003_v34 = vshll.u32 %v7728_v52, 16  ;;  %v6517_v62 = vld [vmem:[#allocation8 + $0xa8] sm:$0xff]   ;;  %v2020_v15 = vshrl.u32 %v7779_v36, 16 }
 0x216   : > { %v7822_v33 = vsel %vm1838_vm10, %v1965_v14, %v1969_v46  ;;  %v6512_v14 = vld [vmem:[#allocation8 + $0xa0] sm:$0xff]   ;;  %v1996_v46 = vshrl.u32 %v7721_v53, 16 }
 0x217   : > { %v7833_v57 = vsel %vm1838_vm10, %v1977_v16, %v1981_v21  ;;  %v2005_v16 = vrot.slane %v2003_v34, 1  ;;  %v2010_v21 = vshll.u32 %v7753_v48, 16  ;;  %v2034_v34 = vshll.u32 %v7774_v39, 16 }
 0x218   : > { %2475 = vmatmul.mubr.bf16.gmra.mrb[28].mxu1 %v7633_v63 }
 0x219   : > { %2482 = vmatprep.mubr.bf16.mxu1 %v7809_v7  ;;  %5994 = vmatmul.mubr.bf16.gmra.mrb[60].mxu0 %v7804_v55 }
 0x21a   : > { %2884 = vmatprep.mubr.bf16.mxu0 %v1850_v20  ;;  %v1988_v20 = vrot.slane %v1986_v42, 1  ;;  %v6520_v42 = vld [vmem:[#allocation8 + $0xb0] sm:$0xff]  }
 0x21c   : > { %v1989_v51 = vor.u32 %v1988_v20, %v1984_v45  ;;  %v2012_v45 = vrot.slane %v2010_v21, 1  ;;  %v2015_v20 = vshll.u32 %v7747_v13, 16 }
 0x220   : > { %2483 = vmatmul.mubr.bf16.gmra.mrb[32].mxu1 %v7664_v58 }
 0x221   : > { %2490 = vmatprep.mubr.bf16.mxu1 %v7822_v33  ;;  %2885 = vmatmul.mubr.bf16.vlgmr.msra.gmra.mrb[64].mxu0 %v7759_v30  ;;  %v1991_v30 = vshll.u32 %v7711_v40, 16 }
 0x222   : > { %2892 = vmatprep.mubr.bf16.mxu0 %v7462_v5  ;;  %5998 = vmatpush3.bf16.msra.mxu0 %v7581_v29  ;;  %v6511_v5 = vld [vmem:[#allocation8 + $0x98] sm:$0xff]  }
 0x223   : > { %5999 = vmatprep.subr.bf16.mxu0 %v6509_v11  ;;  %v6576_v29 = vld [vmem:[#allocation2 + $0xc] sm:$0xff]   ;;  %v1993_v50 = vrot.slane %v1991_v30, 1 }
 0x224   : > { %v6523_v30 = vld [vmem:[#allocation8 + $0xb8] sm:$0xff]  }
 0x225   : > { %v7842_v40 = vsel %vm1838_vm10, %v1989_v51, %v1993_v50  ;;  %v2022_v51 = vshll.u32 %v7779_v36, 16  ;;  %v7862_v50 = vld [vmem:[#allocation8 + $0x200] sm:$0xff]  }
 0x226   : > { %6000 = vmatpush3.bf16.msra.mxu0 %v6509_v11  ;;  %v2001_v11 = vor.u32 %v2000_v28, %v1996_v46 }
 0x227   : > { %6001 = vmatprep.subr.bf16.mxu0 %v6510_v9 }
 0x228   : > { %2491 = vmatmul.mubr.bf16.gmra.mrb[36].mxu1 %v7681_v37  ;;  %v7854_v52 = vsel %vm1838_vm10, %v2001_v11, %v2005_v16  ;;  %v2032_v11 = vshrl.u32 %v7774_v39, 16  ;;  %v2039_v16 = vshll.u32 %v7786_v8, 16  ;;  %v6515_v8 = vld [vmem:[#allocation8 + $0x1c8] sm:$0xff]  }
 0x229   : > { %2498 = vmatprep.mubr.bf16.mxu1 %v7833_v57  ;;  %2893 = vmatmul.mubr.bf16.gmra.mrb[68].mxu0 %v6576_v29  ;;  %v2017_v29 = vrot.slane %v2015_v20, 1  ;;  %v6519_v20 = vld [vmem:[#allocation8 + $0x190] sm:$0xff]  }
 0x22a   : > { %2900 = vmatprep.mubr.bf16.mxu0 %v7472_v24  ;;  %6002 = vmatpush3.bf16.msra.mxu0 %v6510_v9  ;;  %v2008_v9 = vshrl.u32 %v7753_v48, 16  ;;  %v2041_v21 = vrot.slane %v2039_v16, 1  ;;  %v6578_v16 = vld [vmem:[#allocation2 + $0x24] sm:$0xff]  }
 0x22b   : > { %6003 = vmatprep.subr.bf16.mxu0 %v6511_v5 }
 0x22e   : > { %6004 = vmatpush3.bf16.msra.mxu0 %v6511_v5  ;;  %v2013_v5 = vor.u32 %v2012_v45, %v2008_v9  ;;  %v6516_v9 = vld [vmem:[#allocation8 + $0x188] sm:$0xff]   ;;  %v6518_v45 = vld [vmem:[#allocation8 + $0x1d0] sm:$0xff]  }
 0x22f   : > { %6005 = vmatprep.subr.bf16.mxu0 %v6512_v14 }
 0x230   : > { %2499 = vmatmul.mubr.bf16.gmra.mrb[40].mxu1 %v7691_v19  ;;  %v7866_v13 = vsel %vm1838_vm10, %v2013_v5, %v2017_v29  ;;  %v6522_v5 = vld [vmem:[#allocation8 + $0x198] sm:$0xff]   ;;  %v6524_v29 = vld [vmem:[#allocation8 + $0x1e0] sm:$0xff]  }
 0x231   : > { %2506 = vmatprep.mubr.bf16.mxu1 %v7842_v40  ;;  %2901 = vmatmul.mubr.bf16.gmra.mrb[72].mxu0 %v7847_v54 }
 0x232   : > { %2908 = vmatprep.mubr.bf16.mxu0 %v7553_v17  ;;  %6006 = vmatpush3.bf16.msra.mxu0 %v6512_v14  ;;  %v2024_v14 = vrot.slane %v2022_v51, 1  ;;  %v6525_v51 = vld [vmem:[#allocation8 + $0x1a0] sm:$0xff]  }
 0x233   : > { %6007 = vmatprep.subr.bf16.mxu0 %v6517_v62 }
 0x234   : > { %v2025_v46 = vor.u32 %v2024_v14, %v2020_v15  ;;  %v6526_v15 = vld [vmem:[#allocation8 + $0x1e8] sm:$0xff]  }
 0x235   : > { %v6527_v14 = vld [vmem:[#allocation8 + $0x1a8] sm:$0xff]  }
 0x236   : > { %6008 = vmatpush3.bf16.msra.mxu0 %v6517_v62 }
 0x237   : > { %6009 = vmatprep.subr.bf16.mxu0 %v6520_v42 }
 0x238   : > { %2507 = vmatmul.mubr.bf16.gmra.mrb[44].mxu1 %v7699_v2 }
 0x239   : > { %2514 = vmatprep.mubr.bf16.mxu1 %v7854_v52  ;;  %2909 = vmatmul.mubr.bf16.gmra.mrb[76].mxu0 %v7430_v22  ;;  %v2027_v22 = vshll.u32 %v7784_v27, 16  ;;  %v2036_v27 = vrot.slane %v2034_v34, 1  ;;  %v6533_v34 = vld [vmem:[#allocation8 + $0x208] sm:$0xff]  }
 0x23a   : > { %2916 = vmatprep.mubr.bf16.mxu0 %v7638_v41  ;;  %6010 = vmatpush3.bf16.msra.mxu0 %v6520_v42 }
 0x23b   : > { %6011 = vmatprep.subr.bf16.mxu0 %v6523_v30  ;;  %v2029_v28 = vrot.slane %v2027_v22, 1  ;;  %v6528_v22 = vld [vmem:[#allocation8 + $0x1f0] sm:$0xff]  }
 0x23d   : > { %v7877_v62 = vsel %vm1838_vm10, %v2025_v46, %v2029_v28  ;;  %v6529_v46 = vld [vmem:[#allocation8 + $0x1b0] sm:$0xff]   ;;  %v6530_v28 = vld [vmem:[#allocation8 + $0x1f8] sm:$0xff]  }
 0x23e   : > { %6012 = vmatpush3.bf16.msra.mxu0 %v6523_v30  ;;  %v6521_v30 = vld [vmem:[#allocation8 + $0x1d8] sm:$0xff]  }
 0x23f   : > { %6045 = vmatprep.subr.bf16.mxu0 %v7862_v50 }
 0x240   : > { %2515 = vmatmul.mubr.bf16.gmra.mrb[48].mxu1 %v7721_v53 }
 0x241   : > { %2522 = vmatprep.mubr.bf16.mxu1 %v7866_v13  ;;  %2917 = vmatmul.mubr.bf16.gmra.mrb[80].mxu0 %v7447_v44  ;;  %v2037_v44 = vor.u32 %v2036_v27, %v2032_v11  ;;  %v6531_v11 = vld [vmem:[#allocation8 + $0x1b8] sm:$0xff]  }
 0x242   : > { %2924 = vmatprep.mubr.bf16.mxu0 %v7702_v49  ;;  %v6535_v27 = vld [vmem:[#allocation8 + $0x218] sm:$0xff]  }
 0x243   : > { %v7886_v42 = vsel %vm1838_vm10, %v2037_v44, %v2041_v21  ;;  %v6539_v44 = vld [vmem:[#allocation8 + $0x238] sm:$0xff]  }
 0x248   : > { %2523 = vmatmul.mubr.bf16.gmra.mrb[52].mxu1 %v7753_v48 }
 0x249   : > { %2530 = vmatprep.mubr.bf16.mxu1 %v7877_v62  ;;  %2925 = vmatmul.mubr.bf16.gmra.mrb[84].mxu0 %v7501_v3  ;;  %v6514_v3 = vld [vmem:[#allocation8 + $0x180] sm:$0xff]  }
 0x24a   : > { %2932 = vmatprep.mubr.bf16.mxu0 %v7736_v4 }
 0x250   : > { %2531 = vmatmul.mubr.bf16.gmra.mrb[56].mxu1 %v7779_v36 }
 0x251   : > { %2538 = vmatprep.mubr.bf16.mxu1 %v7886_v42  ;;  %2933 = vmatmul.mubr.bf16.gmra.mrb[88].mxu0 %v7542_v6 }
 0x252   : > { %2940 = vmatprep.mubr.bf16.mxu0 %v7766_v60 }
 0x258   : > { %2539 = vmatmul.mubr.bf16.gmra.mrb[60].mxu1 %v7774_v39 }
 0x259   : > { %2972 = vmatprep.mubr.bf16.mxu1 %v7833_v57  ;;  %2941 = vmatmul.mubr.bf16.gmra.mrb[92].mxu0 %v7592_v0 }
 0x25a   : > { %2948 = vmatprep.mubr.bf16.mxu0 %v7790_v12 }
 0x260   : > { %2973 = vmatmul.mubr.bf16.vlgmr.msra.gmra.mrb[64].mxu1 %v7691_v19 }
 0x261   : > { %5742 = vmatpush3.bf16.msra.mxu1 %v6514_v3  ;;  %2980 = vmatprep.mubr.bf16.mxu1 %v7842_v40 }
 0x262   : > { %2949 = vmatmul.mubr.bf16.gmra.mrb[96].mxu0 %v7633_v63  ;;  %5743 = vmatprep.subr.bf16.mxu1 %v6515_v8 }
 0x263   : > { %2956 = vmatprep.mubr.bf16.mxu0 %v7809_v7 }
 0x265   : > { %5744 = vmatpush3.bf16.msra.mxu1 %v6516_v9 }
 0x266   : > { %5745 = vmatprep.subr.bf16.mxu1 %v6518_v45 }
 0x268   : > { %2981 = vmatmul.mubr.bf16.gmra.mrb[68].mxu1 %v7699_v2 }
 0x269   : > { %2988 = vmatprep.mubr.bf16.mxu1 %v7854_v52  ;;  %5746 = vmatpush3.bf16.msra.mxu1 %v6519_v20 }
 0x26a   : > { %2957 = vmatmul.mubr.bf16.gmra.mrb[100].mxu0 %v7664_v58  ;;  %5747 = vmatprep.subr.bf16.mxu1 %v6521_v30 }
 0x26b   : > { %2964 = vmatprep.mubr.bf16.mxu0 %v7822_v33 }
 0x26d   : > { %5748 = vmatpush3.bf16.msra.mxu1 %v6522_v5 }
 0x26e   : > { %5749 = vmatprep.subr.bf16.mxu1 %v6524_v29 }
 0x270   : > { %2989 = vmatmul.mubr.bf16.gmra.mrb[72].mxu1 %v7721_v53 }
 0x271   : > { %2996 = vmatprep.mubr.bf16.mxu1 %v7866_v13  ;;  %5750 = vmatpush3.bf16.msra.mxu1 %v6525_v51 }
 0x272   : > { %2965 = vmatmul.mubr.bf16.gmra.mrb[104].mxu0 %v7681_v37  ;;  %5751 = vmatprep.subr.bf16.mxu1 %v6526_v15 }
 0x273   : > { %6013 = vmatprep.mubr.bf16.mxu0 %v7818_v59  ;;  %v6534_v59 = vld [vmem:[#allocation8 + $0x210] sm:$0xff]  }
 0x275   : > { %5752 = vmatpush3.bf16.msra.mxu1 %v6527_v14 }
 0x276   : > { %5753 = vmatprep.subr.bf16.mxu1 %v6528_v22 }
 0x278   : > { %2997 = vmatmul.mubr.bf16.gmra.mrb[76].mxu1 %v7753_v48 }
 0x279   : > { %3004 = vmatprep.mubr.bf16.mxu1 %v7877_v62  ;;  %5754 = vmatpush3.bf16.msra.mxu1 %v6529_v46 }
 0x27a   : > { %6014 = vmatmul.mubr.bf16.vlgmr.msra.gmra.mrb[32].mxu0 %v7373_v18  ;;  %5755 = vmatprep.subr.bf16.mxu1 %v6530_v28  ;;  %v6536_v18 = vld [vmem:[#allocation8 + $0x220] sm:$0xff]  }
 0x27b   : > { %6017 = vmatprep.mubr.bf16.mxu0 %v7392_v43  ;;  %6046 = vmatpush3.bf16.msra.mxu0 %v7862_v50  ;;  %v6537_v50 = vld [vmem:[#allocation8 + $0x228] sm:$0xff]  }
 0x27c   : > { %6047 = vmatprep.subr.bf16.mxu0 %v6533_v34 }
 0x27d   : > { %5756 = vmatpush3.bf16.msra.mxu1 %v6531_v11  ;;  %v6540_v11 = vld [vmem:[#allocation2 + $0xcc] sm:$0xff]  }
 0x27f   : > { %6048 = vmatpush3.bf16.msra.mxu0 %v6533_v34 }
 0x280   : > { %3005 = vmatmul.mubr.bf16.gmra.mrb[80].mxu1 %v7779_v36  ;;  %6049 = vmatprep.subr.bf16.mxu0 %v6534_v59 }
 0x281   : > { %3398 = vmatprep.mubr.bf16.mxu1 %v7472_v24  ;;  %v6538_v24 = vld [vmem:[#allocation8 + $0x230] sm:$0xff]  }
 0x282   : > { %6018 = vmatmul.mubr.bf16.gmra.mrb[36].mxu0 %v7488_v61 }
 0x283   : > { %6021 = vmatprep.mubr.bf16.mxu0 %v7511_v1  ;;  %6050 = vmatpush3.bf16.msra.mxu0 %v6534_v59  ;;  %v6541_v59 = vld [vmem:[#allocation2 + $0xd4] ss:$0 sps:$4 sm:$0x11]  }
 0x284   : > { %6051 = vmatprep.subr.bf16.mxu0 %v6535_v27 }
 0x287   : > { %6052 = vmatpush3.bf16.msra.mxu0 %v6535_v27  ;;  %v6543_v27 = vld [vmem:[#allocation9 + $0x8] sm:$0xff]  }
 0x288   : > { %3399 = vmatmul.mubr.bf16.vlgmr.msra.gmra.mrb[84].mxu1 %v7847_v54  ;;  %6053 = vmatprep.subr.bf16.mxu0 %v6536_v18  ;;  %v6580_v54 = vld [vmem:[#allocation2 + $0x3c] sm:$0xff]  }
 0x289   : > { %3406 = vmatprep.mubr.bf16.mxu1 %v7553_v17  ;;  %v6579_v17 = vld [vmem:[#allocation2 + $0x30] sm:$0xff]  }
 0x28a   : > { %6022 = vmatmul.mubr.bf16.gmra.mrb[40].mxu0 %v7558_v23 }
 0x28b   : > { %6025 = vmatprep.mubr.bf16.mxu0 %v7576_v31  ;;  %6054 = vmatpush3.bf16.msra.mxu0 %v6536_v18 }
 0x28c   : > { %6055 = vmatprep.subr.bf16.mxu0 %v6537_v50 }
 0x28f   : > { %6056 = vmatpush3.bf16.msra.mxu0 %v6537_v50 }
 0x290   : > { %3407 = vmatmul.mubr.bf16.gmra.mrb[88].mxu1 %v6578_v16  ;;  %6057 = vmatprep.subr.bf16.mxu0 %v6538_v24 }
 0x291   : > { %3414 = vmatprep.mubr.bf16.mxu1 %v7638_v41 }
 0x292   : > { %6026 = vmatmul.mubr.bf16.gmra.mrb[44].mxu0 %v7642_v10 }
 0x293   : > { %6029 = vmatprep.mubr.bf16.mxu0 %v7654_v47  ;;  %6058 = vmatpush3.bf16.msra.mxu0 %v6538_v24 }
 0x294   : > { %6059 = vmatprep.subr.bf16.mxu0 %v6539_v44 }
 0x297   : > { %6060 = vmatpush3.bf16.msra.mxu0 %v6539_v44  ;;  %v2044_v44 = vshrl.u32 %v6540_v11, 16 }
 0x298   : > { %3415 = vmatmul.mubr.bf16.gmra.mrb[92].mxu1 %v6579_v17 }
 0x299   : > { %3422 = vmatprep.mubr.bf16.mxu1 %v7702_v49 }
 0x29a   : > { %6030 = vmatmul.mubr.bf16.gmra.mrb[48].mxu0 %v7694_v32 }
 0x29b   : > { %6033 = vmatprep.mubr.bf16.mxu0 %v7716_v25 }
 0x2a0   : > { %3423 = vmatmul.mubr.bf16.gmra.mrb[96].mxu1 %v6580_v54 }
 0x2a1   : > { %3430 = vmatprep.mubr.bf16.mxu1 %v7736_v4  ;;  %v8613_v4 = vld [vmem:[#allocation22_spill] sm:$0xff] }
 0x2a2   : > { %6034 = vmatmul.mubr.bf16.gmra.mrb[52].mxu0 %v7724_v56 }
 0x2a3   : > { %6037 = vmatprep.mubr.bf16.mxu0 %v7750_v26 }
 0x2a8   : > { %3431 = vmatmul.mubr.bf16.gmra.mrb[100].mxu1 %v7542_v6 }
 0x2a9   : > { %3438 = vmatprep.mubr.bf16.mxu1 %v7766_v60  ;;  %v5485_v41 = vpop.f32.mrb[0].mxu1 }
 0x2aa   : > { %6038 = vmatmul.mubr.bf16.gmra.mrb[56].mxu0 %v7762_v38  ;;  %v5486_v49 = vpop.f32.mrb[1].mxu1 }
 0x2ab   : > { %6041 = vmatprep.mubr.bf16.mxu0 %v7782_v35  ;;  %v7933_v21 = vadd.f32 %v5486_v49, %v5485_v41  ;;  %v5488_v3 = vpop.f32.mrb[2].mxu1 }
 0x2ac   : > { %v5489_v8 = vpop.f32.mrb[3].mxu1 }
 0x2ad   : > { %v7935_v9 = vadd.f32 %v5489_v8, %v5488_v3 }
 0x2b0   : > { %3439 = vmatmul.mubr.bf16.gmra.mrb[104].mxu1 %v7592_v0 }
 0x2b1   : > { %3446 = vmatprep.mubr.bf16.mxu1 %v7790_v12  ;;  %v5491_v6 = vpop.f32.mrb[4].mxu1 }
 0x2b2   : > { %6042 = vmatmul.mubr.bf16.gmra.mrb[60].mxu0 %v8613_v4  ;;  %v5492_v60 = vpop.f32.mrb[5].mxu1 }
 0x2b3   : > { %6061 = vmatprep.mubr.bf16.mxu0 %v7392_v43  ;;  %v7941_v45 = vadd.f32 %v5492_v60, %v5491_v6  ;;  %v5494_v20 = vpop.f32.mrb[6].mxu1 }
 0x2b4   : > { %v5495_v30 = vpop.f32.mrb[7].mxu1 }
 0x2b5   : > { %v7943_v5 = vadd.f32 %v5495_v30, %v5494_v20 }
 0x2b8   : > { %3447 = vmatmul.mubr.bf16.gmra.mrb[108].mxu1 %v7633_v63 }
 0x2b9   : > { %3454 = vmatprep.mubr.bf16.mxu1 %v7809_v7  ;;  %v5497_v0 = vpop.f32.mrb[8].mxu1 }
 0x2ba   : > { %6062 = vmatmul.mubr.bf16.vlgmr.msra.gmra.mrb[32].mxu0 %v7488_v61  ;;  %v5498_v12 = vpop.f32.mrb[9].mxu1 }
 0x2bb   : > { %6065 = vmatprep.mubr.bf16.mxu0 %v7511_v1  ;;  %v7949_v29 = vadd.f32 %v5498_v12, %v5497_v0  ;;  %v5500_v43 = vpop.f32.mrb[10].mxu1 }
 0x2bc   : > { %v5501_v51 = vpop.f32.mrb[11].mxu1 }
 0x2bd   : > { %v7951_v15 = vadd.f32 %v5501_v51, %v5500_v43 }
 0x2c0   : > { %3455 = vmatmul.mubr.bf16.gmra.mrb[112].mxu1 %v7664_v58 }
 0x2c1   : > { %3462 = vmatprep.mubr.bf16.mxu1 %v7822_v33 }
 0x2c2   : > { %6066 = vmatmul.mubr.bf16.gmra.mrb[36].mxu0 %v7558_v23 }
 0x2c3   : > { %6069 = vmatprep.mubr.bf16.mxu0 %v7576_v31 }
 0x2c5   : > { %v5503_v63 = vpop.f32.mrb[12].mxu1 }
 0x2c6   : > { %v5504_v61 = vpop.f32.mrb[13].mxu1 }
 0x2c7   : > { %v7957_v7 = vadd.f32 %v5504_v61, %v5503_v63  ;;  %v5506_v1 = vpop.f32.mrb[14].mxu1 }
 0x2c8   : > { %3463 = vmatmul.mubr.bf16.gmra.mrb[116].mxu1 %v7681_v37  ;;  %v5507_v14 = vpop.f32.mrb[15].mxu1 }
 0x2c9   : > { %3470 = vmatprep.mubr.bf16.mxu1 %v7833_v57  ;;  %v7961_v22 = vadd.f32 %v5507_v14, %v5506_v1 }
 0x2ca   : > { %6070 = vmatmul.mubr.bf16.gmra.mrb[40].mxu0 %v7642_v10  ;;  %v6542_v10 = vld [vmem:[#allocation9] sm:$0xff]  }
 0x2cb   : > { %6073 = vmatprep.mubr.bf16.mxu0 %v7654_v47  ;;  %6093 = vmatprep.subr.bf16.mxu1 %v6542_v10 }
 0x2cc   : > { %6094 = vmatpush3.bf16.msra.mxu1 %v6542_v10 }
 0x2cd   : > { %6095 = vmatprep.subr.bf16.mxu1 %v6543_v27 }
 0x2d0   : > { %3471 = vmatmul.mubr.bf16.gmra.mrb[120].mxu1 %v7691_v19 }
 0x2d1   : > { %3478 = vmatprep.mubr.bf16.mxu1 %v7842_v40  ;;  %6096 = vmatpush3.bf16.msra.mxu1 %v6543_v27 }
 0x2d2   : > { %6074 = vmatmul.mubr.bf16.gmra.mrb[44].mxu0 %v7694_v32 }
 0x2d3   : > { %6077 = vmatprep.mubr.bf16.mxu0 %v7716_v25  ;;  %v5509_v23 = vpop.f32.mrb[16].mxu1 }
 0x2d4   : > { %v5510_v31 = vpop.f32.mrb[17].mxu1 }
 0x2d5   : > { %v7969_v58 = vadd.f32 %v5510_v31, %v5509_v23  ;;  %v5512_v37 = vpop.f32.mrb[18].mxu1 }
 0x2d6   : > { %v5513_v33 = vpop.f32.mrb[19].mxu1 }
 0x2d7   : > { %v7971_v57 = vadd.f32 %v5513_v33, %v5512_v37 }
 0x2d8   : > { %3479 = vmatmul.mubr.bf16.gmra.mrb[124].mxu1 %v7699_v2 }
 0x2d9   : > { %3486 = vmatprep.mubr.bf16.mxu1 %v7854_v52 }
 0x2da   : > { %6078 = vmatmul.mubr.bf16.gmra.mrb[48].mxu0 %v7724_v56 }
 0x2db   : > { %6081 = vmatprep.mubr.bf16.mxu0 %v7750_v26  ;;  %v5515_v47 = vpop.f32.mrb[20].mxu1 }
 0x2dc   : > { %v5516_v19 = vpop.f32.mrb[21].mxu1 }
 0x2dd   : > { %v7977_v32 = vadd.f32 %v5516_v19, %v5515_v47  ;;  %v5518_v25 = vpop.f32.mrb[22].mxu1 }
 0x2de   : > { %v5519_v40 = vpop.f32.mrb[23].mxu1 }
 0x2df   : > { %v7979_v46 = vadd.f32 %v5519_v40, %v5518_v25 }
 0x2e0   : > { %3487 = vmatmul.mubr.bf16.gmra.mrb[128].mxu1 %v7721_v53  ;;  %v2046_v53 = vshll.u32 %v6540_v11, 16 }
 0x2e1   : > { %3494 = vmatprep.mubr.bf16.mxu1 %v7866_v13  ;;  %v2126_v13 = vrot.slane %v6541_v59, 1 }
 0x2e2   : > { %6082 = vmatmul.mubr.bf16.gmra.mrb[52].mxu0 %v7762_v38  ;;  %v2048_v17 = vrot.slane %v2046_v53, 1 }
 0x2e3   : > { %6085 = vmatprep.mubr.bf16.mxu0 %v7782_v35  ;;  %v5521_v2 = vpop.f32.mrb[24].mxu1  ;;  %v2125_v35 = vrot.slane %v6540_v11, 1 }
 0x2e4   : > { %v5522_v56 = vpop.f32.mrb[25].mxu1 }
 0x2e5   : > { %v7985_v26 = vadd.f32 %v5522_v56, %v5521_v2  ;;  %v5524_v52 = vpop.f32.mrb[26].mxu1 }
 0x2e6   : > { %v5525_v28 = vpop.f32.mrb[27].mxu1 }
 0x2e7   : > { %v7987_v34 = vadd.f32 %v5525_v28, %v5524_v52 }
 0x2e8   : > { %3495 = vmatmul.mubr.bf16.gmra.mrb[132].mxu1 %v7753_v48  ;;  %v2051_v48 = vshll.u32 %v6541_v59, 16 }
 0x2e9   : > { %3502 = vmatprep.mubr.bf16.mxu1 %v7877_v62  ;;  %v2127_v62 = vsel %vm2073_vm9, %v2125_v35, %v2126_v13 }
 0x2ea   : > { %6086 = vmatmul.mubr.bf16.gmra.mrb[56].mxu0 %v8613_v4  ;;  %v2053_v41 = vrot.slane %v2051_v48, 1 }
 0x2eb   : > { %6089 = vmatprep.mubr.bf16.mxu0 %v7804_v55  ;;  %v5527_v38 = vpop.f32.mrb[28].mxu1  ;;  %v2049_v55 = vor.u32 %v2048_v17, %v2044_v44 }
 0x2ec   : > { %v5528_v18 = vpop.f32.mrb[29].mxu1 }
 0x2ed   : > { %v7993_v50 = vadd.f32 %v5528_v18, %v5527_v38  ;;  %v5530_v24 = vpop.f32.mrb[30].mxu1  ;;  %v2054_v30 = vsel %vm1838_vm10, %v2049_v55, %v2053_v41 }
 0x2ee   : > { %v5531_v16 = vpop.f32.mrb[31].mxu1 }
 0x2ef   : > { %v7996_v54 = vadd.f32 %v5531_v16, %v5530_v24 }
 0x2f0   : > { %3503 = vmatmul.mubr.bf16.gmra.mrb[136].mxu1 %v7779_v36  ;;  %v6544_v36 = vld [vmem:[#allocation9 + $0x10] sm:$0xff]  }
 0x2f1   : > { %3510 = vmatprep.mubr.bf16.mxu1 %v7886_v42  ;;  %6097 = vmatprep.subr.bf16.mxu1 %v6544_v36 }
 0x2f2   : > { %6090 = vmatmul.mubr.bf16.gmra.mrb[60].mxu0 %v2127_v62  ;;  %6098 = vmatpush3.bf16.msra.mxu1 %v6544_v36 }
 0x2f3   : > { %v5533_v49 = vpop.f32.mrb[32].mxu1 }
 0x2f4   : > { %v5534_v3 = vpop.f32.mrb[33].mxu1  ;;  %v5621_v8 = vpop.f32.mrb[64].mxu0 }
 0x2f5   : > { %v8000_v4 = vadd.f32 %v5534_v3, %v5533_v49  ;;  %v5536_v6 = vpop.f32.mrb[34].mxu1  ;;  %v5622_v60 = vpop.f32.mrb[65].mxu0 }
 0x2f6   : > { %v5537_v20 = vpop.f32.mrb[35].mxu1  ;;  %v5623_v0 = vadd.f32 %v5622_v60, %v5621_v8  ;;  %v5624_v12 = vpop.f32.mrb[66].mxu0 }
 0x2f7   : > { %v8003_v43 = vadd.f32 %v5537_v20, %v5536_v6  ;;  %v5625_v51 = vpop.f32.mrb[67].mxu0 }
 0x2f8   : > { %3511 = vmatmul.mubr.bf16.gmra.mrb[140].mxu1 %v7774_v39  ;;  %v8007_v42 = vadd.f32 %v5623_v0, %v7933_v21  ;;  %v5626_v63 = vadd.f32 %v5625_v51, %v5624_v12 }
 0x2f9   : > { %3518 = vmatprep.mubr.bf16.mxu1 %v2054_v30 }
 0x2fa   : > { %v8010_v61 = vadd.f32 %v5626_v63, %v7935_v9 }
 0x2fb   : > { %v5539_v1 = vpop.f32.mrb[36].mxu1 }
 0x2fc   : > { %v5540_v14 = vpop.f32.mrb[37].mxu1  ;;  %v5627_v23 = vpop.f32.mrb[68].mxu0 }
 0x2fd   : > { %v8012_v31 = vadd.f32 %v5540_v14, %v5539_v1  ;;  %v5542_v37 = vpop.f32.mrb[38].mxu1  ;;  %v5628_v33 = vpop.f32.mrb[69].mxu0 }
 0x2fe   : > { %v5543_v10 = vpop.f32.mrb[39].mxu1  ;;  %v5629_v47 = vadd.f32 %v5628_v33, %v5627_v23  ;;  %v5630_v39 = vpop.f32.mrb[70].mxu0 }
 0x2ff   : > { %v8014_v19 = vadd.f32 %v5543_v10, %v5542_v37  ;;  %v5631_v21 = vpop.f32.mrb[71].mxu0 }
 0x300   : > { %3519 = vmatmul.mubr.bf16.gmra.mrb[144].mxu1 %v6540_v11  ;;  %v8017_v25 = vadd.f32 %v5629_v47, %v7941_v45  ;;  %v5632_v40 = vadd.f32 %v5631_v21, %v5630_v39  ;;  %v6545_v47 = vld [vmem:[#allocation9 + $0x18] sm:$0xff]  }
 0x301   : > { %6099 = vmatprep.subr.bf16.mxu1 %v6545_v47 }
 0x302   : > { %v8020_v9 = vadd.f32 %v5632_v40, %v7943_v5  ;;  %6100 = vmatpush3.bf16.msra.mxu1 %v6545_v47 }
 0x303   : > { %v5545_v2 = vpop.f32.mrb[40].mxu1 }
 0x304   : > { %v5546_v56 = vpop.f32.mrb[41].mxu1  ;;  %v5633_v52 = vpop.f32.mrb[72].mxu0 }
 0x305   : > { %v8022_v28 = vadd.f32 %v5546_v56, %v5545_v2  ;;  %v5548_v59 = vpop.f32.mrb[42].mxu1  ;;  %v5634_v27 = vpop.f32.mrb[73].mxu0 }
 0x306   : > { %v5549_v53 = vpop.f32.mrb[43].mxu1  ;;  %v5635_v38 = vadd.f32 %v5634_v27, %v5633_v52  ;;  %v5636_v35 = vpop.f32.mrb[74].mxu0 }
 0x307   : > { %v8024_v13 = vadd.f32 %v5549_v53, %v5548_v59  ;;  %v5637_v11 = vpop.f32.mrb[75].mxu0 }
 0x308   : > { %v8027_v45 = vadd.f32 %v5635_v38, %v7949_v29  ;;  %v5638_v18 = vadd.f32 %v5637_v11, %v5636_v35 }
 0x30a   : > { %v8030_v5 = vadd.f32 %v5638_v18, %v7951_v15 }
 0x30b   : > { %v5551_v24 = vpop.f32.mrb[44].mxu1 }
 0x30c   : > { %v5552_v16 = vpop.f32.mrb[45].mxu1  ;;  %v5639_v44 = vpop.f32.mrb[76].mxu0 }
 0x30d   : > { %v8032_v17 = vadd.f32 %v5552_v16, %v5551_v24  ;;  %v5554_v48 = vpop.f32.mrb[46].mxu1  ;;  %v5640_v62 = vpop.f32.mrb[77].mxu0 }
 0x30e   : > { %v5555_v55 = vpop.f32.mrb[47].mxu1  ;;  %v5641_v41 = vadd.f32 %v5640_v62, %v5639_v44  ;;  %v5642_v49 = vpop.f32.mrb[78].mxu0 }
 0x30f   : > { %v8034_v3 = vadd.f32 %v5555_v55, %v5554_v48  ;;  %v5643_v8 = vpop.f32.mrb[79].mxu0 }
 0x310   : > { %v8037_v29 = vadd.f32 %v5641_v41, %v7957_v7  ;;  %v5644_v6 = vadd.f32 %v5643_v8, %v5642_v49 }
 0x312   : > { %v8040_v15 = vadd.f32 %v5644_v6, %v7961_v22 }
 0x313   : > { %v5557_v60 = vpop.f32.mrb[48].mxu1 }
 0x314   : > { %v5558_v20 = vpop.f32.mrb[49].mxu1  ;;  %v5645_v30 = vpop.f32.mrb[80].mxu0 }
 0x315   : > { %v8042_v0 = vadd.f32 %v5558_v20, %v5557_v60  ;;  %v5560_v12 = vpop.f32.mrb[50].mxu1  ;;  %v5646_v36 = vpop.f32.mrb[81].mxu0 }
 0x316   : > { %v5561_v51 = vpop.f32.mrb[51].mxu1  ;;  %v5647_v63 = vadd.f32 %v5646_v36, %v5645_v30  ;;  %v5648_v1 = vpop.f32.mrb[82].mxu0 }
 0x317   : > { %v8044_v14 = vadd.f32 %v5561_v51, %v5560_v12  ;;  %v5649_v23 = vpop.f32.mrb[83].mxu0 }
 0x318   : > { %v8047_v7 = vadd.f32 %v5647_v63, %v7969_v58  ;;  %v5650_v37 = vadd.f32 %v5649_v23, %v5648_v1  ;;  %v6546_v63 = vld [vmem:[#allocation9 + $0x20] sm:$0xff]  }
 0x319   : > { %6101 = vmatprep.subr.bf16.mxu1 %v6546_v63 }
 0x31a   : > { %v8050_v22 = vadd.f32 %v5650_v37, %v7971_v57  ;;  %6102 = vmatpush3.bf16.msra.mxu1 %v6546_v63 }
 0x31b   : > { %v5563_v33 = vpop.f32.mrb[52].mxu1 }
 0x31c   : > { %v5564_v10 = vpop.f32.mrb[53].mxu1  ;;  %v5651_v39 = vpop.f32.mrb[84].mxu0 }
 0x31d   : > { %v8052_v21 = vadd.f32 %v5564_v10, %v5563_v33  ;;  %v5566_v40 = vpop.f32.mrb[54].mxu1  ;;  %v5652_v2 = vpop.f32.mrb[85].mxu0 }
 0x31e   : > { %v5567_v56 = vpop.f32.mrb[55].mxu1  ;;  %v5653_v52 = vadd.f32 %v5652_v2, %v5651_v39  ;;  %v5654_v59 = vpop.f32.mrb[86].mxu0 }
 0x31f   : > { %v8054_v27 = vadd.f32 %v5567_v56, %v5566_v40  ;;  %v5655_v58 = vpop.f32.mrb[87].mxu0 }
 0x320   : > { %v8057_v53 = vadd.f32 %v5653_v52, %v7977_v32  ;;  %v5656_v57 = vadd.f32 %v5655_v58, %v5654_v59 }
 0x322   : > { %v8060_v38 = vadd.f32 %v5656_v57, %v7979_v46 }
 0x323   : > { %v5569_v35 = vpop.f32.mrb[56].mxu1 }
 0x324   : > { %v5570_v11 = vpop.f32.mrb[57].mxu1  ;;  %v5657_v18 = vpop.f32.mrb[88].mxu0 }
 0x325   : > { %v8062_v24 = vadd.f32 %v5570_v11, %v5569_v35  ;;  %v5572_v16 = vpop.f32.mrb[58].mxu1  ;;  %v5658_v44 = vpop.f32.mrb[89].mxu0 }
 0x326   : > { %v5573_v48 = vpop.f32.mrb[59].mxu1  ;;  %v5659_v62 = vadd.f32 %v5658_v44, %v5657_v18  ;;  %v5660_v55 = vpop.f32.mrb[90].mxu0  ;;  %v6547_v44 = vld [vmem:[#allocation9 + $0x28] sm:$0xff]  }
 0x327   : > { %v8064_v41 = vadd.f32 %v5573_v48, %v5572_v16  ;;  %v5661_v49 = vpop.f32.mrb[91].mxu0  ;;  %6103 = vmatprep.subr.bf16.mxu1 %v6547_v44 }
 0x328   : > { %v8067_v32 = vadd.f32 %v5659_v62, %v7985_v26  ;;  %v5662_v8 = vadd.f32 %v5661_v49, %v5660_v55  ;;  %6104 = vmatpush3.bf16.msra.mxu1 %v6547_v44 }
 0x32a   : > { %v8070_v46 = vadd.f32 %v5662_v8, %v7987_v34 }
 0x32b   : > { %v5575_v6 = vpop.f32.mrb[60].mxu1 }
 0x32c   : > { %v5576_v60 = vpop.f32.mrb[61].mxu1  ;;  %v5663_v20 = vpop.f32.mrb[92].mxu0 }
 0x32d   : > { %v8072_v30 = vadd.f32 %v5576_v60, %v5575_v6  ;;  %v5578_v12 = vpop.f32.mrb[62].mxu1  ;;  %v5664_v36 = vpop.f32.mrb[93].mxu0 }
 0x32e   : > { %v5579_v51 = vpop.f32.mrb[63].mxu1  ;;  %v5665_v1 = vadd.f32 %v5664_v36, %v5663_v20  ;;  %v5666_v23 = vpop.f32.mrb[94].mxu0 }
 0x32f   : > { %v8074_v37 = vadd.f32 %v5579_v51, %v5578_v12  ;;  %v5667_v33 = vpop.f32.mrb[95].mxu0 }
 0x330   : > { %v8077_v26 = vadd.f32 %v5665_v1, %v7993_v50  ;;  %v5668_v34 = vadd.f32 %v5667_v33, %v5666_v23 }
 0x332   : > { %8614 = vst [vmem:[#allocation22_spill] sm:$0xff] %v8077_v26  ;;  %v8080_v10 = vadd.f32 %v5668_v34, %v7996_v54 }
 0x333   : > { %v5687_v47 = vpop.f32.mrb[64].mxu1 }
 0x334   : > { %8615 = vst [vmem:[#allocation23_spill] sm:$0xff] %v8080_v10  ;;  %v5688_v39 = vpop.f32.mrb[65].mxu1 }
 0x335   : > { %v5669_v40 = vpop.f32.mrb[96].mxu0  ;;  %v5689_v2 = vadd.f32 %v5688_v39, %v5687_v47  ;;  %v5690_v56 = vpop.f32.mrb[66].mxu1 }
 0x336   : > { %v5670_v52 = vpop.f32.mrb[97].mxu0  ;;  %v5691_v59 = vpop.f32.mrb[67].mxu1 }
 0x337   : > { %v5671_v58 = vadd.f32 %v5670_v52, %v5669_v40  ;;  %v5672_v57 = vpop.f32.mrb[98].mxu0  ;;  %v8083_v35 = vadd.f32 %v5689_v2, %v8032_v17  ;;  %v5692_v11 = vadd.f32 %v5691_v59, %v5690_v56 }
 0x338   : > { %v5673_v50 = vpop.f32.mrb[99].mxu0 }
 0x339   : > { %8616 = vst [vmem:[#allocation24_spill] sm:$0xff] %v8083_v35  ;;  %v8086_v18 = vadd.f32 %v5671_v58, %v8000_v4  ;;  %v5674_v16 = vadd.f32 %v5673_v50, %v5672_v57  ;;  %v8089_v54 = vadd.f32 %v5692_v11, %v8034_v3  ;;  %v6548_v58 = vld [vmem:[#allocation9 + $0x30] sm:$0xff]   ;;  %v6549_v11 = vld [vmem:[#allocation9 + $0x38] sm:$0xff]  }
 0x33a   : > { %6105 = vmatprep.subr.bf16.mxu1 %v6548_v58 }
 0x33b   : > { %8617 = vst [vmem:[#allocation25_spill] sm:$0xff] %v8086_v18  ;;  %8618 = vst [vmem:[#allocation26_spill] sm:$0xff] %v8089_v54  ;;  %v8092_v48 = vadd.f32 %v5674_v16, %v8003_v43  ;;  %v5693_v62 = vpop.f32.mrb[68].mxu1  ;;  %6106 = vmatpush3.bf16.msra.mxu1 %v6548_v58 }
 0x33c   : > { %v5694_v55 = vpop.f32.mrb[69].mxu1  ;;  %6107 = vmatprep.subr.bf16.mxu1 %v6549_v11 }
 0x33d   : > { %8619 = vst [vmem:[#allocation27_spill] sm:$0xff] %v8092_v48  ;;  %v5675_v49 = vpop.f32.mrb[100].mxu0  ;;  %v5695_v17 = vadd.f32 %v5694_v55, %v5693_v62  ;;  %v5696_v8 = vpop.f32.mrb[70].mxu1 }
 0x33e   : > { %v5676_v6 = vpop.f32.mrb[101].mxu0  ;;  %v5697_v60 = vpop.f32.mrb[71].mxu1 }
 0x33f   : > { %v5677_v20 = vadd.f32 %v5676_v6, %v5675_v49  ;;  %v5678_v4 = vpop.f32.mrb[102].mxu0  ;;  %v8095_v12 = vadd.f32 %v5695_v17, %v8042_v0  ;;  %v5698_v3 = vadd.f32 %v5697_v60, %v5696_v8  ;;  %6108 = vmatpush3.bf16.msra.mxu1 %v6549_v11  ;;  %v6581_v17 = vld [vmem:[%s7123_s17] sm:$0xff]  }
 0x340   : > { %v5679_v36 = vpop.f32.mrb[103].mxu0  ;;  %v4426_v6 = vunpack.c.h.bf16 %v6581_v17 }
 0x341   : > { %8620 = vst [vmem:[#allocation28_spill] sm:$0xff] %v8095_v12  ;;  %v8098_v51 = vadd.f32 %v5677_v20, %v8012_v31  ;;  %v5680_v43 = vadd.f32 %v5679_v36, %v5678_v4  ;;  %v8101_v63 = vadd.f32 %v5698_v3, %v8044_v14  ;;  %v6582_v20 = vld [vmem:[%s7123_s17 + $0x8] sm:$0xff]  }
 0x342   : > { %v4427_v4 = vunpack.c.l.bf16 %v6582_v20 }
 0x343   : > { %8621 = vst [vmem:[#allocation29_spill] sm:$0xff] %v8098_v51  ;;  %8622 = vst [vmem:[#allocation30_spill] sm:$0xff] %v8101_v63  ;;  %v8104_v1 = vadd.f32 %v5680_v43, %v8014_v19  ;;  %v5699_v23 = vpop.f32.mrb[72].mxu1  ;;  %v4428_v43 = vunpack.c.h.bf16 %v6582_v20 }
 0x344   : > { %v5700_v33 = vpop.f32.mrb[73].mxu1 }
 0x345   : > { %8623 = vst [vmem:[#allocation31_spill] sm:$0xff] %v8104_v1  ;;  %v5681_v34 = vpop.f32.mrb[104].mxu0  ;;  %v5701_v47 = vadd.f32 %v5700_v33, %v5699_v23  ;;  %v5702_v39 = vpop.f32.mrb[74].mxu1  ;;  %v6583_v23 = vld [vmem:[%s7123_s17 + $0x10] sm:$0xff]  }
 0x346   : > { %v5682_v40 = vpop.f32.mrb[105].mxu0  ;;  %v5703_v0 = vpop.f32.mrb[75].mxu1 }
 0x347   : > { %v5683_v2 = vadd.f32 %v5682_v40, %v5681_v34  ;;  %v5684_v56 = vpop.f32.mrb[106].mxu0  ;;  %v8107_v52 = vadd.f32 %v5701_v47, %v8052_v21  ;;  %v5704_v31 = vadd.f32 %v5703_v0, %v5702_v39  ;;  %v8630_v34 = vld [vmem:[#allocation19_spill] sm:$0xff]  ;;  %v4430_v0 = vunpack.c.h.bf16 %v6583_v23 }
 0x348   : > { %v5685_v59 = vpop.f32.mrb[107].mxu0  ;;  %v4470_v40 = vrot.slane %v4426_v6, %v8630_v34 }
 0x349   : > { %8624 = vst [vmem:[#allocation32_spill] sm:$0xff] %v8107_v52  ;;  %v8110_v14 = vadd.f32 %v5683_v2, %v8022_v28  ;;  %v5686_v19 = vadd.f32 %v5685_v59, %v5684_v56  ;;  %v8113_v57 = vadd.f32 %v5704_v31, %v8054_v27  ;;  %v6584_v2 = vld [vmem:[%s7123_s17 + $0x18] sm:$0xff]   ;;  %v4477_v59 = vrot.slane %v4427_v4, %v8630_v34 }
 0x34a   : > { %v4431_v56 = vunpack.c.l.bf16 %v6584_v2  ;;  %v4432_v31 = vunpack.c.h.bf16 %v6584_v2 }
 0x34b   : > { %8625 = vst [vmem:[#allocation33_spill] sm:$0xff] %v8110_v14  ;;  %8626 = vst [vmem:[#allocation34_spill] sm:$0xff] %v8113_v57  ;;  %v8116_v50 = vadd.f32 %v5686_v19, %v8024_v13  ;;  %v5705_v16 = vpop.f32.mrb[76].mxu1  ;;  %v4425_v13 = vunpack.c.l.bf16 %v6581_v17  ;;  %v4484_v19 = vrot.slane %v4428_v43, %v8630_v34 }
 0x34c   : > { %v5706_v21 = vpop.f32.mrb[77].mxu1  ;;  %v4512_v17 = vrot.slane %v4432_v31, %v8630_v34 }
 0x34d   : > { %8627 = vst [vmem:[#allocation35_spill] sm:$0xff] %v8116_v50  ;;  %v5707_v44 = vadd.f32 %v5706_v21, %v5705_v16  ;;  %v5708_v62 = vpop.f32.mrb[78].mxu1  ;;  %v4463_v47 = vrot.slane %v4425_v13, %v8630_v34 }
 0x34e   : > { %v5709_v28 = vpop.f32.mrb[79].mxu1  ;;  %v4720_v31 = vrot.slane %v4512_v17, 4 }
 0x34f   : > { %v8119_v55 = vadd.f32 %v5707_v44, %v8062_v24  ;;  %v5710_v49 = vadd.f32 %v5709_v28, %v5708_v62  ;;  %v4429_v24 = vunpack.c.l.bf16 %v6583_v23  ;;  %v4713_v16 = vrot.slane %v4463_v47, 4 }
 0x350   : > { %v4714_v62 = vrot.slane %v4470_v40, 4  ;;  %v4498_v28 = vrot.slane %v4430_v0, %v8630_v34 }
 0x351   : > { %8628 = vst [vmem:[#allocation36_spill] sm:$0xff] %v8119_v55  ;;  %v8122_v27 = vadd.f32 %v5710_v49, %v8064_v41  ;;  %v4491_v11 = vrot.slane %v4429_v24, %v8630_v34  ;;  %v4505_v49 = vrot.slane %v4431_v56, %v8630_v34  ;;  %v8144_v23 = vadd.f32 %v4713_v16, %v4463_v47 }
 0x352   : > { %v8150_v0 = vadd.f32 %v4714_v62, %v4470_v40  ;;  %v4718_v2 = vrot.slane %v4498_v28, 4 }
 0x353   : > { %8629 = vst [vmem:[#allocation37_spill] sm:$0xff] %v8122_v27  ;;  %v5711_v8 = vpop.f32.mrb[80].mxu1  ;;  %v4717_v20 = vrot.slane %v4491_v11, 4  ;;  %v4719_v56 = vrot.slane %v4505_v49, 4  ;;  %v6591_v27 = vld [vmem:[%s7123_s17 + $0x70] sm:$0xff]  }
 0x354   : > { %v5712_v60 = vpop.f32.mrb[81].mxu1  ;;  %v4453_v55 = vunpack.c.l.bf16 %v6591_v27 }
 0x355   : > { %v5713_v3 = vadd.f32 %v5712_v60, %v5711_v8  ;;  %v5714_v36 = vpop.f32.mrb[82].mxu1  ;;  %v4715_v8 = vrot.slane %v4477_v59, 4  ;;  %v4716_v60 = vrot.slane %v4484_v19, 4  ;;  %v8162_v40 = vadd.f32 %v4717_v20, %v4491_v11 }
 0x356   : > { %v5715_v33 = vpop.f32.mrb[83].mxu1 }
 0x357   : > { %v8129_v41 = vadd.f32 %v5713_v3, %v8072_v30  ;;  %v5716_v39 = vadd.f32 %v5715_v33, %v5714_v36  ;;  %v6585_v30 = vld [vmem:[%s7123_s17 + $0x40] sm:$0xff]   ;;  %v6586_v3 = vld [vmem:[%s7123_s17 + $0x48] sm:$0xff]  }
 0x358   : > { %v4441_v21 = vunpack.c.l.bf16 %v6585_v30  ;;  %v4442_v4 = vunpack.c.h.bf16 %v6585_v30  ;;  %v4443_v36 = vunpack.c.l.bf16 %v6586_v3 }
 0x359   : > { %8631 = vst [vmem:[#allocation19_spill] sm:$0xff] %v8129_v41  ;;  %v8135_v58 = vadd.f32 %v5716_v39, %v8074_v37 }
 0x35a   : > { %v4575_v24 = vrot.slane %v4441_v21, %v8630_v34  ;;  %v4582_v47 = vrot.slane %v4442_v4, %v8630_v34  ;;  %v4589_v16 = vrot.slane %v4443_v36, %v8630_v34  ;;  %v8158_v21 = vadd.f32 %v4715_v8, %v4477_v59 }
 0x35b   : > { %8632 = vst [vmem:[#allocation38_spill] sm:$0xff] %v8135_v58  ;;  %v5757_v44 = vpop.f32.mrb[84].mxu1  ;;  %v8172_v4 = vadd.f32 %v4720_v31, %v4512_v17  ;;  %v6589_v31 = vld [vmem:[%s7123_s17 + $0x60] sm:$0xff]  }
 0x35c   : > { %v5758_v13 = vpop.f32.mrb[85].mxu1  ;;  %v4729_v62 = vrot.slane %v4575_v24, 4  ;;  %v4731_v36 = vrot.slane %v4589_v16, 4 }
 0x35d   : > { %v5759_v37 = vadd.f32 %v5758_v13, %v5757_v44  ;;  %v5760_v6 = vpop.f32.mrb[86].mxu1  ;;  %v4444_v44 = vunpack.c.h.bf16 %v6586_v3  ;;  %v6587_v13 = vld [vmem:[%s7123_s17 + $0x50] sm:$0xff]  }
 0x35e   : > { %v5761_v43 = vpop.f32.mrb[87].mxu1  ;;  %v4445_v58 = vunpack.c.l.bf16 %v6587_v13  ;;  %v4446_v30 = vunpack.c.h.bf16 %v6587_v13 }
 0x35f   : > { %v5762_v33 = vadd.f32 %v5761_v43, %v5760_v6  ;;  %v8148_v39 = vadd.f32 %v8007_v42, %v5759_v37  ;;  %v8160_v42 = vadd.f32 %v4716_v60, %v4484_v19  ;;  %v8164_v6 = vld [vmem:[#allocation11] sm:$0xff]   ;;  %v8170_v43 = vadd.f32 %v4719_v56, %v4505_v49  ;;  %v6588_v49 = vld [vmem:[%s7123_s17 + $0x58] sm:$0xff]  }
 0x360   : > { %8633 = vst [vmem:[#allocation39_spill] sm:$0xff] %v8164_v6  ;;  %v4596_v19 = vrot.slane %v4444_v44, %v8630_v34  ;;  %v4603_v11 = vrot.slane %v4445_v58, %v8630_v34  ;;  %v4610_v8 = vrot.slane %v4446_v30, %v8630_v34  ;;  %6117 = vmatprep.subr.bf16.mxu1 %v8164_v6  ;;  %v4449_v44 = vunpack.c.l.bf16 %v6589_v31 }
 0x361   : > { %v8154_v41 = vadd.f32 %v8010_v61, %v5762_v33  ;;  %v8168_v61 = vadd.f32 %v4718_v2, %v4498_v28  ;;  %v4730_v28 = vrot.slane %v4582_v47, 4  ;;  %v4447_v33 = vunpack.c.l.bf16 %v6588_v49 }
 0x362   : > { %v4448_v2 = vunpack.c.h.bf16 %v6588_v49  ;;  %v8179_v56 = vadd.f32 %v4729_v62, %v4575_v24  ;;  %v4450_v30 = vunpack.c.h.bf16 %v6589_v31  ;;  %v4732_v57 = vrot.slane %v4596_v19, 4 }
 0x363   : > { %v5763_v37 = vpop.f32.mrb[88].mxu1  ;;  %v4733_v52 = vrot.slane %v4603_v11, 4  ;;  %v4734_v63 = vrot.slane %v4610_v8, 4  ;;  %v4617_v24 = vrot.slane %v4447_v33, %v8630_v34  ;;  %v8195_v31 = vadd.f32 %v4731_v36, %v4589_v16 }
 0x364   : > { %v5764_v59 = vpop.f32.mrb[89].mxu1  ;;  %v4624_v62 = vrot.slane %v4448_v2, %v8630_v34  ;;  %v4638_v54 = vrot.slane %v4450_v30, %v8630_v34  ;;  %v4659_v33 = vrot.slane %v4453_v55, %v8630_v34 }
 0x365   : > { %v5765_v60 = vadd.f32 %v5764_v59, %v5763_v37  ;;  %v5766_v20 = vpop.f32.mrb[90].mxu1  ;;  %v6590_v37 = vld [vmem:[%s7123_s17 + $0x68] sm:$0xff]   ;;  %v4797_v35 = vadd.f32 %v4733_v52, %v4603_v11  ;;  %v4798_v50 = vadd.f32 %v4734_v63, %v4610_v8  ;;  %v4735_v16 = vrot.slane %v4617_v24, 4 }
 0x366   : > { %v5767_v17 = vpop.f32.mrb[91].mxu1  ;;  %v4451_v59 = vunpack.c.l.bf16 %v6590_v37  ;;  %v4452_v3 = vunpack.c.h.bf16 %v6590_v37  ;;  %v4631_v37 = vrot.slane %v4449_v44, %v8630_v34  ;;  %v4736_v36 = vrot.slane %v4624_v62, 4 }
 0x367   : > { %v5768_v58 = vadd.f32 %v5767_v17, %v5766_v20  ;;  %v8183_v13 = vadd.f32 %v8017_v25, %v5765_v60  ;;  %v4454_v20 = vunpack.c.h.bf16 %v6591_v27  ;;  %v6592_v17 = vld [vmem:[%s7123_s17 + $0x78] sm:$0xff]   ;;  %v8193_v60 = vadd.f32 %v4730_v28, %v4582_v47  ;;  %s5090_s17 = sshll.u32 %s8494_s22, 4  ;;  %s8508_s17 = int_to_ptr.vmem [resolvable:$true] %s5090_s17 }
 0x368   : > { %v4455_v25 = vunpack.c.l.bf16 %v6592_v17  ;;  %v4456_v6 = vunpack.c.h.bf16 %v6592_v17  ;;  %v4796_v27 = vadd.f32 %v4732_v57, %v4596_v19  ;;  %v4737_v30 = vrot.slane %v4631_v37, 4  ;;  %s6735_s18 = scalar_lea.vmem %s8508_s17, 1024 }
 0x369   : > { %v8188_v49 = vadd.f32 %v8020_v9, %v5768_v58  ;;  %v4645_v9 = vrot.slane %v4451_v59, %v8630_v34  ;;  %v4652_v58 = vrot.slane %v4452_v3, %v8630_v34  ;;  %v4666_v44 = vrot.slane %v4454_v20, %v8630_v34  ;;  %p6736_p3 = scmp.ne.s32.totalorder %s8508_s17, %s6735_s18 }
 0x36a   : > { %v4673_v17 = vrot.slane %v4455_v25, %v8630_v34  ;;  %v4680_v59 = vrot.slane %v4456_v6, %v8630_v34  ;;  %v4738_v55 = vrot.slane %v4638_v54, 4  ;;  %v4741_v63 = vrot.slane %v4659_v33, 4  ;;  %v8635_v25 = vld [vmem:[#allocation21_spill] sm:$0xff] }
 0x36b   : > { %v5769_v12 = vpop.f32.mrb[92].mxu1  ;;  %v4739_v57 = vrot.slane %v4645_v9, 4  ;;  %v4740_v52 = vrot.slane %v4652_v58, 4  ;;  %v4842_v19 = vcombine.low %v8158_v21, %v8160_v42  ;;  %v4843_v11 = vcombine.low %v8162_v40, %v8168_v61  ;;  %p6737_p5 = pnand %p6736_p3, %p7064_p10 }
 0x36c   : > { %v5770_v2 = vpop.f32.mrb[93].mxu1  ;;  %v4844_v6 = vcombine.low %v8170_v43, %v8172_v4  ;;  %v4743_v8 = vrot.slane %v4673_v17, 4  ;;  %v8636_v21 = vcombine.low %v8144_v23, %v8150_v0  ;;  %v4800_v40 = vadd.f32 %v4736_v36, %v4624_v62 }
 0x36d   : > { %v5771_v47 = vadd.f32 %v5770_v2, %v5769_v12  ;;  %v5772_v28 = vpop.f32.mrb[94].mxu1  ;;  %v8221_v2 = vmul.f32 0.25, %v8635_v25  ;;  %v4801_v61 = vadd.f32 %v4737_v30, %v4631_v37  ;;  %v4802_v1 = vadd.f32 %v4738_v55, %v4638_v54  ;;  %p6738_p7 = pneg %p6737_p5 }
 0x36e   : > { %v5773_v14 = vpop.f32.mrb[95].mxu1  ;;  %v4873_v42 = vadd.f32 %v4842_v19, %v8636_v21  ;;  %v4805_v10 = vadd.f32 %v4741_v63, %v4659_v33  ;;  %v4807_v23 = vadd.f32 %v4743_v8, %v4673_v17  ;;  %v4849_v36 = vcombine.low %v8179_v56, %v8193_v60 }
 0x36f   : > { %v5774_v48 = vadd.f32 %v5773_v14, %v5772_v28  ;;  %v8206_v3 = vadd.f32 %v8027_v45, %v5771_v47  ;;  %v4742_v14 = vrot.slane %v4666_v44, 4  ;;  %v8634_v45 = vld [vmem:[#allocation20_spill] sm:$0xff]  ;;  %v4799_v47 = vadd.f32 %v4735_v16, %v4617_v24 }
 0x370   : > { %v8218_v20 = vmul.f32 0.25, %v8634_v45  ;;  %v4874_v28 = vadd.f32 %v4844_v6, %v4843_v11  ;;  %v4803_v45 = vadd.f32 %v4739_v57, %v4645_v9  ;;  %v8228_v25 = vmul.f32 0.25, %v4873_v42 }
 0x371   : > { %v8209_v12 = vadd.f32 %v8030_v5, %v5774_v48  ;;  %v4744_v5 = vrot.slane %v4680_v59, 4  ;;  %v4804_v16 = vadd.f32 %v4740_v52, %v4652_v58  ;;  %v4806_v26 = vadd.f32 %v4742_v14, %v4666_v44 }
 0x372   : > { %v4890_v4 = vpack.c.bf16 %v8221_v2, %v8218_v20  ;;  %v8230_v24 = vmul.f32 0.25, %v4874_v28  ;;  %v4850_v58 = vcombine.low %v8195_v31, %v4796_v27  ;;  %v4851_v33 = vcombine.low %v4797_v35, %v4798_v50  ;;  %v5394_v20 = vld [vmem:[%s8656_s14] ss:$0 sm:$0xff] }
 0x373   : > { %v5775_v48 = vpop.f32.mrb[96].mxu1  ;;  %v4808_v19 = vadd.f32 %v4744_v5, %v4680_v59  ;;  %v4852_v44 = vcombine.low %v4799_v47, %v4800_v40  ;;  %v4853_v17 = vcombine.low %v4801_v61, %v4802_v1  ;;  %v4854_v30 = vcombine.low %v4803_v45, %v4804_v16  ;;  %v5404_v2 = vld [vmem:[%s8657_s24] ss:$0 sm:$0xff]  ;;  %s8506_s24 = scalar_lea.hbm %s8660_s15, %s5444_s23 }
 0x374   : > { %v5776_v43 = vpop.f32.mrb[97].mxu1  ;;  %v4889_v37 = vpack.c.bf16 %v8230_v24, %v8228_v25  ;;  %v4855_v59 = vcombine.low %v4805_v10, %v4806_v26  ;;  %v4877_v55 = vadd.f32 %v4850_v58, %v4849_v36 }
 0x375   : > { %v5777_v51 = vadd.f32 %v5776_v43, %v5775_v48  ;;  %v5778_v18 = vpop.f32.mrb[98].mxu1  ;;  %v4878_v57 = vadd.f32 %v4852_v44, %v4851_v33  ;;  %v4879_v52 = vadd.f32 %v4854_v30, %v4853_v17 }
 0x376   : > { %v5779_v0 = vpop.f32.mrb[99].mxu1 }
 0x377   : > { %v5780_v62 = vadd.f32 %v5779_v0, %v5778_v18  ;;  %v8233_v54 = vadd.f32 %v8037_v29, %v5777_v51  ;;  %v4856_v29 = vcombine.low %v4807_v23, %v4808_v19  ;;  %v8245_v56 = vmul.f32 0.25, %v4878_v57 }
 0x378   : > { %v8247_v60 = vmul.f32 0.25, %v4879_v52 }
 0x379   : > { %v8238_v9 = vadd.f32 %v8040_v15, %v5780_v62  ;;  %v8243_v15 = vmul.f32 0.25, %v4877_v55  ;;  %v4880_v6 = vadd.f32 %v4856_v29, %v4855_v59 }
 0x37b   : > { %v5781_v18 = vpop.f32.mrb[100].mxu1  ;;  %v8252_v26 = vmul.f32 0.25, %v4880_v6  ;;  %v4891_v10 = vpack.c.bf16 %v8245_v56, %v8243_v15 }
 0x37c   : > { %v5782_v51 = vpop.f32.mrb[101].mxu1 }
 0x37d   : > { %v5783_v63 = vadd.f32 %v5782_v51, %v5781_v18  ;;  %v5784_v11 = vpop.f32.mrb[102].mxu1  ;;  %v4892_v31 = vpack.c.bf16 %v8252_v26, %v8247_v60  ;;  %v5405_v60 = vld [vmem:[%s8659_s11] ss:$0 sm:$0xff] }
 0x37e   : > { %v5785_v14 = vpop.f32.mrb[103].mxu1 }
 0x37f   : > { %v5786_v35 = vadd.f32 %v5785_v14, %v5784_v11  ;;  %v8250_v1 = vadd.f32 %v8047_v7, %v5783_v63 }
 0x381   : > { %v8257_v50 = vadd.f32 %v8050_v22, %v5786_v35  ;;  %v8270_v22 = vld [vmem:[%s8560_s5] ss:$0 sm:$0xff] }
 0x383   : > { %v5787_v27 = vpop.f32.mrb[104].mxu1 }
 0x384   : > { %v5788_v8 = vpop.f32.mrb[105].mxu1 }
 0x385   : > { %v5789_v47 = vadd.f32 %v5788_v8, %v5787_v27  ;;  %v5790_v5 = vpop.f32.mrb[106].mxu1 }
 0x386   : > { %v5791_v48 = vpop.f32.mrb[107].mxu1 }
 0x387   : > { %v5792_v21 = vadd.f32 %v5791_v48, %v5790_v5  ;;  %v8262_v7 = vadd.f32 %v8057_v53, %v5789_v47  ;;  %v8276_v53 = vld [vmem:[%s8561_s6] ss:$0 sm:$0xff] }
 0x389   : > { %v8265_v42 = vadd.f32 %v8060_v38, %v5792_v21 }
 0x38b   : > { %v5793_v28 = vpop.f32.mrb[108].mxu1 }
 0x38c   : > { %v5794_v40 = vpop.f32.mrb[109].mxu1 }
 0x38d   : > { %v6063_v61 = vpop.f32.mrb[32].mxu0  ;;  %v5795_v43 = vadd.f32 %v5794_v40, %v5793_v28  ;;  %v5796_v45 = vpop.f32.mrb[110].mxu1 }
 0x38e   : > { %v6159_v16 = vadd.f32 %v8183_v13, %v6063_v61  ;;  %v3561_v23 = vpop.f32.mrb[33].mxu0  ;;  %v5797_v0 = vpop.f32.mrb[111].mxu1 }
 0x38f   : > { %v6162_v38 = vadd.f32 %v8148_v39, %v3561_v23  ;;  %v6064_v19 = vpop.f32.mrb[34].mxu0  ;;  %v5798_v62 = vadd.f32 %v5797_v0, %v5796_v45  ;;  %v8280_v36 = vadd.f32 %v8067_v32, %v5795_v43 }
 0x390   : > { %v3729_v58 = vmul.f32 %v6159_v16, %v8270_v22  ;;  %v6165_v33 = vadd.f32 %v8188_v49, %v6064_v19  ;;  %v3564_v44 = vpop.f32.mrb[35].mxu0 }
 0x391   : > { %v3727_v13 = vmul.f32 %v6162_v38, %v8270_v22  ;;  %v6168_v17 = vadd.f32 %v8154_v41, %v3564_v44  ;;  %v8287_v30 = vadd.f32 %v8070_v46, %v5798_v62 }
 0x392   : > { %v3768_v59 = vadd.f32 %v8276_v53, %v3729_v58  ;;  %v3730_v39 = vmul.f32 %v6165_v33, %v8270_v22 }
 0x393   : > { %v3766_v18 = vadd.f32 %v8276_v53, %v3727_v13  ;;  %v3728_v32 = vmul.f32 %v6168_v17, %v8270_v22  ;;  %v5799_v55 = vpop.f32.mrb[112].mxu1 }
 0x394   : > { %v3800_v29 = vmax.f32 %v3768_v59, 0.0  ;;  %v3769_v49 = vadd.f32 %v8276_v53, %v3730_v39  ;;  %v5800_v51 = vpop.f32.mrb[113].mxu1 }
 0x395   : > { %v3798_v57 = vmax.f32 %v3766_v18, 0.0  ;;  %v3767_v52 = vadd.f32 %v8276_v53, %v3728_v32  ;;  %v6067_v41 = vpop.f32.mrb[36].mxu0  ;;  %v5801_v63 = vadd.f32 %v5800_v51, %v5799_v55  ;;  %v5802_v46 = vpop.f32.mrb[114].mxu1 }
 0x396   : > { %v3850_v11 = vrot.slane %v3800_v29, %v8630_v34  ;;  %v3801_v6 = vmax.f32 %v3769_v49, 0.0  ;;  %v6171_v14 = vadd.f32 %v8233_v54, %v6067_v41  ;;  %v3577_v35 = vpop.f32.mrb[37].mxu0  ;;  %v5803_v27 = vpop.f32.mrb[115].mxu1 }
 0x397   : > { %v3836_v8 = vrot.slane %v3798_v57, %v8630_v34  ;;  %v3799_v47 = vmax.f32 %v3767_v52, 0.0  ;;  %v6174_v5 = vadd.f32 %v8206_v3, %v3577_v35  ;;  %v6068_v48 = vpop.f32.mrb[38].mxu0  ;;  %v5804_v21 = vadd.f32 %v5803_v27, %v5802_v46 }
 0x398   : > { %v4088_v28 = vrot.slane %v3850_v11, 4  ;;  %v3857_v40 = vrot.slane %v3801_v6, %v8630_v34  ;;  %v3733_v61 = vmul.f32 %v6171_v14, %v8270_v22  ;;  %v6177_v43 = vadd.f32 %v8238_v9, %v6068_v48  ;;  %v3580_v45 = vpop.f32.mrb[39].mxu0  ;;  %v8638_v14 = vld [vmem:[#allocation23_spill] sm:$0xff] }
 0x399   : > { %v4086_v16 = vrot.slane %v3836_v8, 4  ;;  %v3843_v54 = vrot.slane %v3799_v47, %v8630_v34  ;;  %v3731_v23 = vmul.f32 %v6174_v5, %v8270_v22  ;;  %v6180_v0 = vadd.f32 %v8209_v12, %v3580_v45  ;;  %v8637_v12 = vld [vmem:[#allocation22_spill] sm:$0xff] }
 0x39a   : > { %v4089_v38 = vrot.slane %v3857_v40, 4  ;;  %v3772_v3 = vadd.f32 %v8276_v53, %v3733_v61  ;;  %v3734_v19 = vmul.f32 %v6177_v43, %v8270_v22  ;;  %v8307_v62 = vadd.f32 %v4088_v28, %v3850_v11 }
 0x39b   : > { %v8309_v58 = vadd.f32 %v4086_v16, %v3836_v8  ;;  %v3770_v33 = vadd.f32 %v8276_v53, %v3731_v23  ;;  %v3732_v9 = vmul.f32 %v6180_v0, %v8270_v22  ;;  %v5805_v44 = vpop.f32.mrb[116].mxu1  ;;  %v4087_v13 = vrot.slane %v3843_v54, 4 }
 0x39c   : > { %v3804_v17 = vmax.f32 %v3772_v3, 0.0  ;;  %v3773_v59 = vadd.f32 %v8276_v53, %v3734_v19  ;;  %v5806_v39 = vpop.f32.mrb[117].mxu1  ;;  %v6194_v18 = vadd.f32 %v8637_v12, %v5801_v63  ;;  %v8315_v32 = vadd.f32 %v4089_v38, %v3857_v40 }
 0x39d   : > { %v3802_v55 = vmax.f32 %v3770_v33, 0.0  ;;  %v3771_v29 = vadd.f32 %v8276_v53, %v3732_v9  ;;  %v6071_v49 = vpop.f32.mrb[40].mxu0  ;;  %v5807_v51 = vadd.f32 %v5806_v39, %v5805_v44  ;;  %v5808_v57 = vpop.f32.mrb[118].mxu1  ;;  %v6200_v35 = vadd.f32 %v8638_v14, %v5804_v21 }
 0x39e   : > { %v3878_v52 = vrot.slane %v3804_v17, %v8630_v34  ;;  %v3805_v41 = vmax.f32 %v3773_v59, 0.0  ;;  %v6183_v46 = vadd.f32 %v8262_v7, %v6071_v49  ;;  %v3593_v11 = vpop.f32.mrb[41].mxu0  ;;  %v5809_v6 = vpop.f32.mrb[119].mxu1  ;;  %v8330_v43 = vadd.f32 %v4087_v13, %v3843_v54  ;;  %v8639_v17 = vld [vmem:[#allocation25_spill] sm:$0xff] }
 0x39f   : > { %v8322_v27 = vrot.slane %v3802_v55, %v8630_v34  ;;  %v3803_v63 = vmax.f32 %v3771_v29, 0.0  ;;  %v6186_v8 = vadd.f32 %v8250_v1, %v3593_v11  ;;  %v6072_v47 = vpop.f32.mrb[42].mxu0  ;;  %v8325_v5 = vadd.f32 %v5809_v6, %v5808_v57 }
 0x3a0   : > { %v4092_v48 = vrot.slane %v3878_v52, 4  ;;  %v3885_v28 = vrot.slane %v3805_v41, %v8630_v34  ;;  %v3737_v40 = vmul.f32 %v6183_v46, %v8270_v22  ;;  %v6189_v7 = vadd.f32 %v8265_v42, %v6072_v47  ;;  %v3596_v61 = vpop.f32.mrb[43].mxu0 }
 0x3a1   : > { %v3871_v21 = vrot.slane %v3803_v63, %v8630_v34  ;;  %v3735_v45 = vmul.f32 %v6186_v8, %v8270_v22  ;;  %v6192_v16 = vadd.f32 %v8257_v50, %v3596_v61  ;;  %v4090_v1 = vrot.slane %v8322_v27, 4 }
 0x3a2   : > { %v4093_v23 = vrot.slane %v3885_v28, 4  ;;  %v3776_v0 = vadd.f32 %v8276_v53, %v3737_v40  ;;  %v3738_v38 = vmul.f32 %v6189_v7, %v8270_v22  ;;  %v8338_v3 = vadd.f32 %v4092_v48, %v3878_v52 }
 0x3a3   : > { %v4091_v19 = vrot.slane %v3871_v21, 4  ;;  %v3774_v42 = vadd.f32 %v8276_v53, %v3735_v45  ;;  %v3736_v54 = vmul.f32 %v6192_v16, %v8270_v22  ;;  %v5811_v33 = vpop.f32.mrb[120].mxu1  ;;  %v6209_v59 = vadd.f32 %v8639_v17, %v5807_v51 }
 0x3a4   : > { %v8342_v9 = vadd.f32 %v4093_v23, %v3885_v28  ;;  %v3808_v44 = vmax.f32 %v3776_v0, 0.0  ;;  %v3777_v50 = vadd.f32 %v8276_v53, %v3738_v38  ;;  %v5812_v13 = vpop.f32.mrb[121].mxu1  ;;  %v4214_v14 = vcombine.low %v8309_v58, %v8330_v43 }
 0x3a5   : > { %v8346_v39 = vadd.f32 %v4091_v19, %v3871_v21  ;;  %v3806_v12 = vmax.f32 %v3774_v42, 0.0  ;;  %v3775_v55 = vadd.f32 %v8276_v53, %v3736_v54  ;;  %v6075_v29 = vpop.f32.mrb[44].mxu0  ;;  %v5813_v49 = vadd.f32 %v5812_v13, %v5811_v33  ;;  %v5814_v57 = vpop.f32.mrb[122].mxu1 }
 0x3a6   : > { %v3906_v52 = vrot.slane %v3808_v44, %v8630_v34  ;;  %v3809_v41 = vmax.f32 %v3777_v50, 0.0  ;;  %v6195_v46 = vadd.f32 %v6194_v18, %v6075_v29  ;;  %v3609_v11 = vpop.f32.mrb[45].mxu0  ;;  %v5815_v6 = vpop.f32.mrb[123].mxu1 }
 0x3a7   : > { %v3892_v63 = vrot.slane %v3806_v12, %v8630_v34  ;;  %v3807_v51 = vmax.f32 %v3775_v55, 0.0  ;;  %v6198_v8 = vadd.f32 %v8280_v36, %v3609_v11  ;;  %v6076_v47 = vpop.f32.mrb[46].mxu0  ;;  %v5816_v48 = vadd.f32 %v5815_v6, %v5814_v57  ;;  %v8640_v12 = vld [vmem:[#allocation29_spill] sm:$0xff] }
 0x3a8   : > { %v4096_v28 = vrot.slane %v3906_v52, 4  ;;  %v3913_v40 = vrot.slane %v3809_v41, %v8630_v34  ;;  %v3741_v7 = vmul.f32 %v6195_v46, %v8270_v22  ;;  %v6201_v61 = vadd.f32 %v6200_v35, %v6076_v47  ;;  %v3612_v21 = vpop.f32.mrb[47].mxu0  ;;  %v8641_v46 = vld [vmem:[#allocation31_spill] sm:$0xff] }
 0x3a9   : > { %v4094_v18 = vrot.slane %v3892_v63, 4  ;;  %v3899_v45 = vrot.slane %v3807_v51, %v8630_v34  ;;  %v3739_v16 = vmul.f32 %v6198_v8, %v8270_v22  ;;  %v6204_v23 = vadd.f32 %v8287_v30, %v3612_v21 }
 0x3aa   : > { %v4160_v0 = vadd.f32 %v4096_v28, %v3906_v52  ;;  %v4097_v38 = vrot.slane %v3913_v40, 4  ;;  %v3780_v36 = vadd.f32 %v8276_v53, %v3741_v7  ;;  %v3742_v19 = vmul.f32 %v6201_v61, %v8270_v22 }
 0x3ab   : > { %v4158_v42 = vadd.f32 %v4094_v18, %v3892_v63  ;;  %v4095_v54 = vrot.slane %v3899_v45, 4  ;;  %v3778_v33 = vadd.f32 %v8276_v53, %v3739_v16  ;;  %v3740_v35 = vmul.f32 %v6204_v23, %v8270_v22  ;;  %v8363_v44 = vpop.f32.mrb[124].mxu1 }
 0x3ac   : > { %v4161_v50 = vadd.f32 %v4097_v38, %v3913_v40  ;;  %v3812_v13 = vmax.f32 %v3780_v36, 0.0  ;;  %v3781_v17 = vadd.f32 %v8276_v53, %v3742_v19  ;;  %v6206_v30 = vadd.f32 %v8640_v12, %v5813_v49  ;;  %v5818_v55 = vpop.f32.mrb[125].mxu1 }
 0x3ad   : > { %v4159_v29 = vadd.f32 %v4095_v54, %v3899_v45  ;;  %v3810_v57 = vmax.f32 %v3778_v33, 0.0  ;;  %v3779_v52 = vadd.f32 %v8276_v53, %v3740_v35  ;;  %v6079_v41 = vpop.f32.mrb[48].mxu0  ;;  %v6212_v11 = vadd.f32 %v8641_v46, %v5816_v48  ;;  %v5820_v6 = vpop.f32.mrb[126].mxu1 }
 0x3ae   : > { %v4219_v63 = vcombine.low %v4160_v0, %v4161_v50  ;;  %v3934_v51 = vrot.slane %v3812_v13, %v8630_v34  ;;  %v3813_v8 = vmax.f32 %v3781_v17, 0.0  ;;  %v6207_v47 = vadd.f32 %v6206_v30, %v6079_v41  ;;  %v3625_v28 = vpop.f32.mrb[49].mxu0  ;;  %v5821_v40 = vpop.f32.mrb[127].mxu1 }
 0x3af   : > { %v4218_v7 = vcombine.low %v4158_v42, %v4159_v29  ;;  %v3920_v61 = vrot.slane %v3810_v57, %v8630_v34  ;;  %v3811_v49 = vmax.f32 %v3779_v52, 0.0  ;;  %v6210_v21 = vadd.f32 %v6209_v59, %v3625_v28  ;;  %v6080_v18 = vpop.f32.mrb[50].mxu0 }
 0x3b0   : > { %v4100_v45 = vrot.slane %v3934_v51, 4  ;;  %v3941_v16 = vrot.slane %v3813_v8, %v8630_v34  ;;  %v3745_v23 = vmul.f32 %v6207_v47, %v8270_v22  ;;  %v6213_v48 = vadd.f32 %v6212_v11, %v6080_v18  ;;  %v3628_v38 = vpop.f32.mrb[51].mxu0  ;;  %v8642_v18 = vld [vmem:[#allocation27_spill] sm:$0xff] }
 0x3b1   : > { %v4248_v0 = vadd.f32 %v4219_v63, %v4218_v7  ;;  %v4098_v36 = vrot.slane %v3920_v61, 4  ;;  %v3927_v19 = vrot.slane %v3811_v49, %v8630_v34  ;;  %v3743_v54 = vmul.f32 %v6210_v21, %v8270_v22 }
 0x3b2   : > { %v4154_v42 = vadd.f32 %v4090_v1, %v8322_v27  ;;  %v4101_v33 = vrot.slane %v3941_v16, 4  ;;  %v3784_v59 = vadd.f32 %v8276_v53, %v3745_v23  ;;  %v3746_v35 = vmul.f32 %v6213_v48, %v8270_v22 }
 0x3b3   : > { %v4164_v50 = vadd.f32 %v4100_v45, %v3934_v51  ;;  %v4162_v13 = vadd.f32 %v4098_v36, %v3920_v61  ;;  %v4099_v17 = vrot.slane %v3927_v19, 4  ;;  %v3782_v12 = vadd.f32 %v8276_v53, %v3743_v54  ;;  %v5823_v30 = vpop.f32.mrb[128].mxu1 }
 0x3b4   : > { %v4165_v29 = vadd.f32 %v4101_v33, %v3941_v16  ;;  %v3816_v57 = vmax.f32 %v3784_v59, 0.0  ;;  %v3785_v52 = vadd.f32 %v8276_v53, %v3746_v35  ;;  %v4215_v41 = vcombine.low %v8307_v62, %v8315_v32  ;;  %v5824_v46 = vpop.f32.mrb[129].mxu1  ;;  %v8643_v33 = vld [vmem:[#allocation33_spill] sm:$0xff] }
 0x3b5   : > { %v4163_v27 = vadd.f32 %v4099_v17, %v3927_v19  ;;  %v3814_v1 = vmax.f32 %v3782_v12, 0.0  ;;  %v4216_v11 = vcombine.low %v4154_v42, %v8346_v39  ;;  %v4217_v63 = vcombine.low %v8338_v3, %v8342_v9  ;;  %v6083_v51 = vpop.f32.mrb[52].mxu0  ;;  %v5826_v8 = vpop.f32.mrb[130].mxu1 }
 0x3b6   : > { %v4221_v47 = vcombine.low %v4164_v50, %v4165_v29  ;;  %v3962_v28 = vrot.slane %v3816_v57, %v8630_v34  ;;  %v3817_v7 = vmax.f32 %v3785_v52, 0.0  ;;  %v4246_v61 = vadd.f32 %v4215_v41, %v4214_v14  ;;  %v3641_v49 = vpop.f32.mrb[53].mxu0  ;;  %v5827_v62 = vpop.f32.mrb[131].mxu1 }
 0x3b7   : > { %v4220_v32 = vcombine.low %v4162_v13, %v4163_v27  ;;  %v4247_v21 = vadd.f32 %v4217_v63, %v4216_v11  ;;  %v6215_v39 = vadd.f32 %v8642_v18, %v8325_v5  ;;  %v6084_v45 = vpop.f32.mrb[54].mxu0  ;;  %v4256_v16 = vmul.f32 0.25, %v4248_v0 }
 0x3b8   : > { %v4104_v3 = vrot.slane %v3962_v28, 4  ;;  %v3969_v9 = vrot.slane %v3817_v7, %v8630_v34  ;;  %v5819_v23 = vadd.f32 %v5818_v55, %v8363_v44  ;;  %v3644_v48 = vpop.f32.mrb[55].mxu0  ;;  %v4254_v19 = vmul.f32 0.25, %v4246_v61  ;;  %v8644_v55 = vld [vmem:[#allocation35_spill] sm:$0xff] }
 0x3b9   : > { %v4249_v36 = vadd.f32 %v4221_v47, %v4220_v32  ;;  %v4255_v54 = vmul.f32 0.25, %v4247_v21  ;;  %v6216_v58 = vadd.f32 %v6215_v39, %v3628_v38  ;;  %v3948_v43 = vrot.slane %v3814_v1, %v8630_v34  ;;  %v6551_v1 = vld [vmem:[#allocation11 + $0x8] sm:$0xff]  }
 0x3ba   : > { %v4105_v14 = vrot.slane %v3969_v9, 4  ;;  %v5822_v42 = vadd.f32 %v5821_v40, %v5820_v6  ;;  %v6221_v59 = vadd.f32 %v8643_v33, %v5819_v23  ;;  %v8397_v5 = vadd.f32 %v4104_v3, %v3962_v28  ;;  %v8645_v47 = vld [vmem:[#allocation24_spill] sm:$0xff] }
 0x3bb   : > { %v4257_v35 = vmul.f32 0.25, %v4249_v36  ;;  %v4262_v0 = vpack.c.bf16 %v4255_v54, %v4254_v19  ;;  %v3744_v50 = vmul.f32 %v6216_v58, %v8270_v22  ;;  %v5829_v13 = vpop.f32.mrb[132].mxu1  ;;  %v5825_v29 = vadd.f32 %v5824_v46, %v5823_v30  ;;  %v8649_v58 = vld [vmem:[#allocation30_spill] sm:$0xff] }
 0x3bc   : > { %v8400_v17 = vadd.f32 %v4105_v14, %v3969_v9  ;;  %v6222_v44 = vadd.f32 %v6221_v59, %v3641_v49  ;;  %v6227_v12 = vadd.f32 %v8644_v55, %v5822_v42  ;;  %v5830_v38 = vpop.f32.mrb[133].mxu1  ;;  %v5828_v6 = vadd.f32 %v5827_v62, %v5826_v8  ;;  %v8646_v49 = vld [vmem:[#allocation26_spill] sm:$0xff]  ;;  %v8647_v62 = vld [vmem:[#allocation28_spill] sm:$0xff]  ;;  %v6552_v42 = vld [vmem:[#allocation11 + $0x10] sm:$0xff]  }
 0x3bd   : > { %6109 = vmatprep.mubr.bf16.mxu1 %v4262_v0  ;;  %v3783_v57 = vadd.f32 %v8276_v53, %v3744_v50  ;;  %v8404_v40 = vpop.f32.mrb[56].mxu0  ;;  %v4263_v52 = vpack.c.bf16 %v4257_v35, %v4256_v16  ;;  %v5831_v41 = vadd.f32 %v5830_v38, %v5829_v13  ;;  %v5832_v27 = vpop.f32.mrb[134].mxu1  ;;  %v6218_v28 = vadd.f32 %v8645_v47, %v5825_v29 }
 0x3be   : > { %v3747_v11 = vmul.f32 %v6222_v44, %v8270_v22  ;;  %v6228_v63 = vadd.f32 %v6227_v12, %v3644_v48  ;;  %v3657_v7 = vpop.f32.mrb[57].mxu0  ;;  %v5833_v61 = vpop.f32.mrb[135].mxu1  ;;  %v4223_v30 = vcombine.low %v8397_v5, %v8400_v17  ;;  %v6224_v32 = vadd.f32 %v8646_v49, %v5828_v6  ;;  %v8648_v48 = vld [vmem:[#allocation39_spill] sm:$0xff] }
 0x3bf   : > { %v3815_v46 = vmax.f32 %v3783_v57, 0.0  ;;  %v8411_v8 = vpop.f32.mrb[58].mxu0  ;;  %6110 = vmatmul.mubr.bf16.vlgmr.msra.gmra.mrb[148].mxu1 %v4263_v52  ;;  %v6233_v21 = vadd.f32 %v8647_v62, %v5831_v41  ;;  %v5834_v18 = vadd.f32 %v5833_v61, %v5832_v27  ;;  %v4102_v39 = vrot.slane %v3948_v43, 4 }
 0x3c0   : > { %v3786_v16 = vadd.f32 %v8276_v53, %v3747_v11  ;;  %v3748_v3 = vmul.f32 %v6228_v63, %v8270_v22  ;;  %v6219_v9 = vadd.f32 %v6218_v28, %v6083_v51  ;;  %v3660_v23 = vpop.f32.mrb[59].mxu0  ;;  %6118 = vmatpush3.bf16.msra.mxu1 %v8648_v48  ;;  %v6225_v19 = vadd.f32 %v6224_v32, %v6084_v45  ;;  %v6553_v63 = vld [vmem:[#allocation11 + $0x18] sm:$0xff]  }
 0x3c1   : > { %v3955_v36 = vrot.slane %v3815_v46, %v8630_v34  ;;  %v6234_v54 = vadd.f32 %v6233_v21, %v3657_v7  ;;  %v6239_v14 = vadd.f32 %v8649_v58, %v5834_v18  ;;  %6119 = vmatprep.subr.bf16.mxu1 %v6551_v1  ;;  %v4166_v55 = vadd.f32 %v4102_v39, %v3948_v43 }
 0x3c2   : > { %v3818_v33 = vmax.f32 %v3786_v16, 0.0  ;;  %v3787_v59 = vadd.f32 %v8276_v53, %v3748_v3  ;;  %v3749_v35 = vmul.f32 %v6219_v9, %v8270_v22  ;;  %v3750_v50 = vmul.f32 %v6225_v19, %v8270_v22  ;;  %v8650_v9 = vld [vmem:[#allocation32_spill] sm:$0xff] }
 0x3c3   : > { %v4103_v0 = vrot.slane %v3955_v36, 4  ;;  %v3751_v51 = vmul.f32 %v6234_v54, %v8270_v22  ;;  %v6240_v13 = vadd.f32 %v6239_v14, %v3660_v23  ;;  %v5835_v44 = vpop.f32.mrb[136].mxu1  ;;  %v8651_v54 = vld [vmem:[#allocation34_spill] sm:$0xff]  ;;  %v6554_v14 = vld [vmem:[#allocation11 + $0x20] sm:$0xff]  }
 0x3c4   : > { %v3976_v45 = vrot.slane %v3818_v33, %v8630_v34  ;;  %v3819_v12 = vmax.f32 %v3787_v59, 0.0  ;;  %v3788_v29 = vadd.f32 %v8276_v53, %v3749_v35  ;;  %v5836_v38 = vpop.f32.mrb[137].mxu1  ;;  %6120 = vmatpush3.bf16.msra.mxu1 %v6551_v1  ;;  %v3789_v6 = vadd.f32 %v8276_v53, %v3750_v50 }
 0x3c5   : > { %v4167_v57 = vadd.f32 %v4103_v0, %v3955_v36  ;;  %v3790_v52 = vadd.f32 %v8276_v53, %v3751_v51  ;;  %v3752_v41 = vmul.f32 %v6240_v13, %v8270_v22  ;;  %v8428_v27 = vpop.f32.mrb[60].mxu0  ;;  %v5838_v11 = vpop.f32.mrb[138].mxu1  ;;  %6121 = vmatprep.subr.bf16.mxu1 %v6552_v42  ;;  %v5837_v61 = vadd.f32 %v5836_v38, %v5835_v44 }
 0x3c6   : > { %v4106_v43 = vrot.slane %v3976_v45, 4  ;;  %v3983_v47 = vrot.slane %v3819_v12, %v8630_v34  ;;  %v3820_v28 = vmax.f32 %v3788_v29, 0.0  ;;  %v3673_v7 = vpop.f32.mrb[61].mxu0  ;;  %v5839_v46 = vpop.f32.mrb[139].mxu1  ;;  %v3821_v1 = vmax.f32 %v3789_v6, 0.0 }
 0x3c7   : > { %v3822_v49 = vmax.f32 %v3790_v52, 0.0  ;;  %v3791_v32 = vadd.f32 %v8276_v53, %v3752_v41  ;;  %v8432_v62 = vpop.f32.mrb[62].mxu0  ;;  %v5840_v21 = vadd.f32 %v5839_v46, %v5838_v11  ;;  %v6230_v23 = vadd.f32 %v8650_v9, %v5837_v61 }
 0x3c8   : > { %v4170_v18 = vadd.f32 %v4106_v43, %v3976_v45  ;;  %v4107_v39 = vrot.slane %v3983_v47, 4  ;;  %v3990_v16 = vrot.slane %v3820_v28, %v8630_v34  ;;  %v3676_v3 = vpop.f32.mrb[63].mxu0  ;;  %6122 = vmatpush3.bf16.msra.mxu1 %v6552_v42  ;;  %v3997_v48 = vrot.slane %v3821_v1, %v8630_v34  ;;  %v8652_v28 = vld [vmem:[#allocation36_spill] sm:$0xff] }
 0x3c9   : > { %v4004_v36 = vrot.slane %v3822_v49, %v8630_v34  ;;  %v3823_v19 = vmax.f32 %v3791_v32, 0.0  ;;  %v6236_v58 = vadd.f32 %v8651_v54, %v5840_v21  ;;  %6123 = vmatprep.subr.bf16.mxu1 %v6553_v63  ;;  %v6231_v59 = vadd.f32 %v6230_v23, %v8404_v40  ;;  %v8653_v32 = vld [vmem:[#allocation37_spill] sm:$0xff] }
 0x3ca   : > { %v4171_v33 = vadd.f32 %v4107_v39, %v3983_v47  ;;  %v4108_v35 = vrot.slane %v3990_v16, 4  ;;  %v4222_v0 = vcombine.low %v4166_v55, %v4167_v57  ;;  %v4109_v42 = vrot.slane %v3997_v48, 4  ;;  %v6556_v39 = vld [vmem:[#allocation11 + $0x30] sm:$0xff]  }
 0x3cb   : > { %v4011_v50 = vrot.slane %v3823_v19, %v8630_v34  ;;  %v6237_v51 = vadd.f32 %v6236_v58, %v8411_v8  ;;  %v5841_v13 = vpop.f32.mrb[140].mxu1  ;;  %v4110_v44 = vrot.slane %v4004_v36, 4  ;;  %v3753_v45 = vmul.f32 %v6231_v59, %v8270_v22  ;;  %v6555_v8 = vld [vmem:[#allocation11 + $0x28] sm:$0xff]  }
 0x3cc   : > { %v5842_v12 = vpop.f32.mrb[141].mxu1  ;;  %v4172_v29 = vadd.f32 %v4108_v35, %v3990_v16  ;;  %v4224_v38 = vcombine.low %v4170_v18, %v4171_v33  ;;  %v4250_v6 = vadd.f32 %v4223_v30, %v4222_v0  ;;  %6124 = vmatpush3.bf16.msra.mxu1 %v6553_v63  ;;  %v4173_v52 = vadd.f32 %v4109_v42, %v3997_v48 }
 0x3cd   : > { %v3754_v40 = vmul.f32 %v6237_v51, %v8270_v22  ;;  %v5843_v55 = vadd.f32 %v5842_v12, %v5841_v13  ;;  %v5844_v57 = vpop.f32.mrb[142].mxu1  ;;  %6125 = vmatprep.subr.bf16.mxu1 %v6554_v14  ;;  %v4111_v41 = vrot.slane %v4011_v50, 4  ;;  %v3792_v11 = vadd.f32 %v8276_v53, %v3753_v45  ;;  %v6557_v51 = vld [vmem:[#allocation11 + $0x38] sm:$0xff]  }
 0x3ce   : > { %v5845_v43 = vpop.f32.mrb[143].mxu1  ;;  %v4225_v1 = vcombine.low %v4172_v29, %v4173_v52  ;;  %v4174_v17 = vadd.f32 %v4110_v44, %v4004_v36  ;;  %v4258_v9 = vmul.f32 0.25, %v4250_v6  ;;  %v8655_v52 = vld [vmem:[#allocation38_spill] sm:$0xff] }
 0x3cf   : > { %v3793_v47 = vadd.f32 %v8276_v53, %v3754_v40  ;;  %v6245_v61 = vadd.f32 %v8652_v28, %v5843_v55  ;;  %v5846_v46 = vadd.f32 %v5845_v43, %v5844_v57  ;;  %v3824_v5 = vmax.f32 %v3792_v11, 0.0 }
 0x3d0   : > { %6126 = vmatpush3.bf16.msra.mxu1 %v6554_v14  ;;  %v4175_v30 = vadd.f32 %v4111_v41, %v4011_v50  ;;  %v4251_v18 = vadd.f32 %v4225_v1, %v4224_v38 }
 0x3d1   : > { %v3825_v63 = vmax.f32 %v3793_v47, 0.0  ;;  %v6246_v49 = vadd.f32 %v6245_v61, %v3673_v7  ;;  %v6251_v21 = vadd.f32 %v8653_v32, %v5846_v46  ;;  %6127 = vmatprep.subr.bf16.mxu1 %v6555_v8  ;;  %v4018_v16 = vrot.slane %v3824_v5, %v8630_v34 }
 0x3d2   : > { %v4226_v23 = vcombine.low %v4174_v17, %v4175_v30  ;;  %v4259_v58 = vmul.f32 0.25, %v4251_v18 }
 0x3d3   : > { %v4025_v48 = vrot.slane %v3825_v63, %v8630_v34  ;;  %v3755_v19 = vmul.f32 %v6246_v49, %v8270_v22  ;;  %v6252_v54 = vadd.f32 %v6251_v21, %v3676_v3  ;;  %v5847_v14 = vpop.f32.mrb[144].mxu1  ;;  %v4112_v33 = vrot.slane %v4018_v16, 4  ;;  %v8654_v3 = vld [vmem:[#allocation19_spill] sm:$0xff] }
 0x3d4   : > { %v5848_v36 = vpop.f32.mrb[145].mxu1  ;;  %6128 = vmatpush3.bf16.msra.mxu1 %v6555_v8  ;;  %v4264_v35 = vpack.c.bf16 %v4259_v58, %v4258_v9 }
 0x3d5   : > { %v3794_v7 = vadd.f32 %v8276_v53, %v3755_v19  ;;  %v3756_v59 = vmul.f32 %v6252_v54, %v8270_v22  ;;  %v5849_v0 = vadd.f32 %v5848_v36, %v5847_v14  ;;  %v5850_v50 = vpop.f32.mrb[146].mxu1  ;;  %6129 = vmatprep.subr.bf16.mxu1 %v6556_v39  ;;  %v4113_v42 = vrot.slane %v4025_v48, 4 }
 0x3d6   : > { %v5851_v13 = vpop.f32.mrb[147].mxu1  ;;  %6113 = vmatprep.mubr.bf16.mxu1 %v4264_v35  ;;  %v4176_v38 = vadd.f32 %v4112_v33, %v4018_v16 }
 0x3d7   : > { %v3826_v44 = vmax.f32 %v3794_v7, 0.0  ;;  %v3795_v45 = vadd.f32 %v8276_v53, %v3756_v59  ;;  %v6242_v12 = vadd.f32 %v8654_v3, %v5849_v0  ;;  %v5852_v29 = vadd.f32 %v5851_v13, %v5850_v50 }
 0x3d8   : > { %v4177_v6 = vadd.f32 %v4113_v42, %v4025_v48  ;;  %6130 = vmatpush3.bf16.msra.mxu1 %v6556_v39 }
 0x3d9   : > { %v4032_v40 = vrot.slane %v3826_v44, %v8630_v34  ;;  %v3827_v55 = vmax.f32 %v3795_v45, 0.0  ;;  %v6243_v57 = vadd.f32 %v6242_v12, %v8428_v27  ;;  %v6248_v8 = vadd.f32 %v8655_v52, %v5852_v29  ;;  %6131 = vmatprep.subr.bf16.mxu1 %v6557_v51 }
 0x3da   : > { %v4227_v41 = vcombine.low %v4176_v38, %v4177_v6 }
 0x3db   : > { %v4039_v11 = vrot.slane %v3827_v55, %v8630_v34  ;;  %v3757_v43 = vmul.f32 %v6243_v57, %v8270_v22  ;;  %v6249_v47 = vadd.f32 %v6248_v8, %v8432_v62  ;;  %v4114_v28 = vrot.slane %v4032_v40, 4 }
 0x3dc   : > { %v4252_v61 = vadd.f32 %v4227_v41, %v4226_v23  ;;  %6132 = vmatpush3.bf16.msra.mxu1 %v6557_v51 }
 0x3dd   : > { %v3796_v46 = vadd.f32 %v8276_v53, %v3757_v43  ;;  %v3758_v1 = vmul.f32 %v6249_v47, %v8270_v22  ;;  %v4115_v5 = vrot.slane %v4039_v11, 4  ;;  %v4178_v30 = vadd.f32 %v4114_v28, %v4032_v40 }
 0x3de   : > { %v4260_v19 = vmul.f32 0.25, %v4252_v61 }
 0x3df   : > { %v3828_v17 = vmax.f32 %v3796_v46, 0.0  ;;  %v3797_v27 = vadd.f32 %v8276_v53, %v3758_v1  ;;  %v4179_v63 = vadd.f32 %v4115_v5, %v4039_v11 }
 0x3e1   : > { %v4046_v49 = vrot.slane %v3828_v17, %v8630_v34  ;;  %v3829_v32 = vmax.f32 %v3797_v27, 0.0  ;;  %v4228_v21 = vcombine.low %v4178_v30, %v4179_v63 }
 0x3e3   : > { %v4053_v18 = vrot.slane %v3829_v32, %v8630_v34  ;;  %v4116_v62 = vrot.slane %v4046_v49, 4 }
 0x3e5   : > { %v4117_v39 = vrot.slane %v4053_v18, 4  ;;  %v4180_v16 = vadd.f32 %v4116_v62, %v4046_v49 }
 0x3e7   : > { %v4181_v9 = vadd.f32 %v4117_v39, %v4053_v18 }
 0x3e9   : > { %v4229_v23 = vcombine.low %v4180_v16, %v4181_v9 }
 0x3eb   : > { %v4253_v48 = vadd.f32 %v4229_v23, %v4228_v21 }
 0x3ed   : > { %v4261_v22 = vmul.f32 0.25, %v4253_v48 }
 0x3ef   : > { %v4265_v54 = vpack.c.bf16 %v4261_v22, %v4260_v19 }
 0x3f1   : > { %6114 = vmatmul.mubr.bf16.gmra.mrb[152].mxu1 %v4265_v54 }
 0x3f2   : > { %6133 = vmatprep.mubr.bf16.mxu1 %v4889_v37  ;;  %v5395_v37 = vld [vmem:[%s8658_s8] ss:$0 sm:$0xff]  ;;  %s6739_s8 = sshll.u32 %s6820_s21, 4  ;;  %s6740_s8 = int_to_ptr.vmem [resolvable:$false] %s6739_s8 }
 0x3f3   : > { %s6741_s19 = scalar_lea.vmem %s6740_s8, 2048  ;;  %p6742_p12 = scmp.lt.s32.totalorder %s8508_s17, %s6740_s8 }
 0x3f4   : > { %p6743_p1 = scmp.lt.s32.totalorder %s6741_s19, %s6735_s18 }
 0x3f6   : > { %p6744_p2 = por %p6743_p1, %p6742_p12 }
 0x3f8   : > { %p6745_p13 = pnand %p6744_p2, %p6738_p7 }
 0x3f9   : > { %6134 = vmatmul.mubr.bf16.vlgmr.msra.gmra.mrb[156].mxu1 %v4890_v4 }
 0x3fa   : > { %6137 = vmatprep.mubr.bf16.mxu1 %v4891_v10 }
 0x401   : > { %6138 = vmatmul.mubr.bf16.gmra.mrb[160].mxu1 %v4892_v31 }
 0x492   : > { %v6111_v34 = vpop.f32.mrb[148].mxu1 }
 0x493   : > { %v4364_v53 = vpop.f32.mrb[149].mxu1  ;;  %v4404_v4 = vmul.f32 %v6111_v34, %v5394_v20 }
 0x494   : > { %v6112_v58 = vpop.f32.mrb[150].mxu1  ;;  %v4402_v15 = vmul.f32 %v5394_v20, %v4364_v53 }
 0x495   : > { %v4367_v14 = vpop.f32.mrb[151].mxu1  ;;  %v4405_v26 = vmul.f32 %v6112_v58, %v5394_v20  ;;  %v4419_v0 = vadd.f32 %v5395_v37, %v4404_v4 }
 0x496   : > { %v4403_v7 = vmul.f32 %v5394_v20, %v4367_v14  ;;  %v4417_v42 = vadd.f32 %v5395_v37, %v4402_v15 }
 0x497   : > { %v4420_v3 = vadd.f32 %v5395_v37, %v4405_v26 }
 0x498   : > { %v4418_v38 = vadd.f32 %v5395_v37, %v4403_v7 }
 0x4c4   : > { %v6115_v36 = vpop.f32.mrb[152].mxu1 }
 0x4c5   : > { %v4380_v33 = vpop.f32.mrb[153].mxu1  ;;  %v4408_v55 = vmul.f32 %v6115_v36, %v5394_v20 }
 0x4c6   : > { %v6116_v25 = vpop.f32.mrb[154].mxu1  ;;  %v4406_v8 = vmul.f32 %v5394_v20, %v4380_v33 }
 0x4c7   : > { %v4383_v24 = vpop.f32.mrb[155].mxu1  ;;  %v4409_v47 = vmul.f32 %v6116_v25, %v5394_v20  ;;  %v4423_v30 = vadd.f32 %v5395_v37, %v4408_v55 }
 0x4c8   : > { %v4407_v1 = vmul.f32 %v5394_v20, %v4383_v24  ;;  %v4421_v21 = vadd.f32 %v5395_v37, %v4406_v8 }
 0x4c9   : > { %v4424_v39 = vadd.f32 %v5395_v37, %v4409_v47 }
 0x4ca   : > { %v4422_v23 = vadd.f32 %v5395_v37, %v4407_v1 }
 0x4cc   : > { %v6135_v56 = vpop.f32.mrb[156].mxu1 }
 0x4cd   : > { %v5031_v10 = vmul.f32 %v6135_v56, %v5404_v2  ;;  %v4991_v31 = vpop.f32.mrb[157].mxu1 }
 0x4ce   : > { %v5029_v59 = vmul.f32 %v5404_v2, %v4991_v31  ;;  %v6136_v35 = vpop.f32.mrb[158].mxu1 }
 0x4cf   : > { %v5046_v50 = vadd.f32 %v5405_v60, %v5031_v10  ;;  %v5032_v51 = vmul.f32 %v6136_v35, %v5404_v2  ;;  %v4994_v13 = vpop.f32.mrb[159].mxu1 }
 0x4d0   : > { %v5044_v44 = vadd.f32 %v5405_v60, %v5029_v59  ;;  %v5030_v45 = vmul.f32 %v5404_v2, %v4994_v13 }
 0x4d1   : > { %v5054_v12 = vadd.f32 %v5046_v50, %v4419_v0  ;;  %v5047_v29 = vadd.f32 %v5405_v60, %v5032_v51 }
 0x4d2   : > { %v5052_v6 = vadd.f32 %v5044_v44, %v4417_v42  ;;  %v5045_v40 = vadd.f32 %v5405_v60, %v5030_v45 }
 0x4d3   : > { %v5062_v57 = vmax.f32 %v5054_v12, 0.0  ;;  %v5055_v52 = vadd.f32 %v5047_v29, %v4420_v3 }
 0x4d4   : > { %v5060_v41 = vmax.f32 %v5052_v6, 0.0  ;;  %v5053_v11 = vadd.f32 %v5045_v40, %v4418_v38  ;;  %v6139_v43 = vpop.f32.mrb[160].mxu1 }
 0x4d5   : > { %5070 = vst [vmem:[%s8494_s22 + $0x10] sm:$0xff] %v5062_v57  ;;  %v5063_v28 = vmax.f32 %v5055_v52, 0.0  ;;  %v5035_v61 = vmul.f32 %v6139_v43, %v5404_v2  ;;  %v5007_v46 = vpop.f32.mrb[161].mxu1 }
 0x4d6   : > { %5068 = vst [vmem:[%s8494_s22] sm:$0xff] %v5060_v41  ;;  %v5061_v5 = vmax.f32 %v5053_v11, 0.0  ;;  %v5033_v17 = vmul.f32 %v5404_v2, %v5007_v46  ;;  %v6140_v27 = vpop.f32.mrb[162].mxu1 }
 0x4d7   : > { %5071 = vst [vmem:[%s8494_s22 + $0x18] sm:$0xff] %v5063_v28  ;;  %v5050_v63 = vadd.f32 %v5405_v60, %v5035_v61  ;;  %v5036_v49 = vmul.f32 %v6140_v27, %v5404_v2  ;;  %v5010_v32 = vpop.f32.mrb[163].mxu1 }
 0x4d8   : > { %5069 = vst [vmem:[%s8494_s22 + $0x8] sm:$0xff] %v5061_v5  ;;  %v5048_v18 = vadd.f32 %v5405_v60, %v5033_v17  ;;  %v5034_v62 = vmul.f32 %v5404_v2, %v5010_v32 }
 0x4d9   : > { %v5058_v16 = vadd.f32 %v5050_v63, %v4423_v30  ;;  %v5051_v9 = vadd.f32 %v5405_v60, %v5036_v49 }
 0x4da   : > { %v5056_v48 = vadd.f32 %v5048_v18, %v4421_v21  ;;  %v5049_v19 = vadd.f32 %v5405_v60, %v5034_v62 }
 0x4db   : > { %v5066_v22 = vmax.f32 %v5058_v16, 0.0  ;;  %v5059_v54 = vadd.f32 %v5051_v9, %v4424_v39 }
 0x4dc   : > { %v5064_v34 = vmax.f32 %v5056_v48, 0.0  ;;  %v5057_v53 = vadd.f32 %v5049_v19, %v4422_v23 }
 0x4dd   : > { %5074 = vst [vmem:[%s8494_s22 + $0x30] sm:$0xff] %v5066_v22  ;;  %v5067_v58 = vmax.f32 %v5059_v54, 0.0 }
 0x4de   : > { %5072 = vst [vmem:[%s8494_s22 + $0x20] sm:$0xff] %v5064_v34  ;;  %v5065_v14 = vmax.f32 %v5057_v53, 0.0 }
 0x4df   : > { %5075 = vst [vmem:[%s8494_s22 + $0x38] sm:$0xff] %v5067_v58 }
 0x4e0   : > { %5073 = vst [vmem:[%s8494_s22 + $0x28] sm:$0xff] %v5065_v14 }
 0x4e1   : > { %6748 = shalt.err (!%p6745_p13)
}
 0x4e2   : > { %s6749_s20 = scalar_lea.hbm %s8506_s24, 1024  ;;  %s6753_s22 = scalar_lea.hbm %s8660_s15, 2048 }
 0x4e3   : > { %p6750_p9 = scmp.ne.s32.totalorder %s8506_s24, %s6749_s20  ;;  %p6754_p4 = scmp.lt.u32.totalorder %s8506_s24, %s8660_s15 }
 0x4e4   : > { %p6755_p8 = scmp.lt.u32.totalorder %s6753_s22, %s6749_s20  ;;  %p6757_p3 = scmp.lt.u32.totalorder %s6749_s20, %s8506_s24 }
 0x4e5   : > { %p6751_p0 = pnand %p6750_p9, %p7064_p10 }
 0x4e6   : > { %p6756_p6 = por %p6755_p8, %p6754_p4 }
 0x4e7   : > { %p6752_p11 = pneg %p6751_p0 }
 0x4e8   : > { %p6758_p5 = por %p6757_p3, %p6756_p6 }
 0x4ea   : > { %p6759_p7 = pnand %p6758_p5, %p6752_p11 }
 0x4ec   : > { %6762 = shalt.err (!%p6759_p7)
}
 0x4ed   : > { %s6821_s16 = smov 128   ;;  %s6822_s18 = smov 8  }
 0x4ee   : > { %6335 = dma.vmem_to_hbm [thread:$0]  (%p7064_p10), %s8508_s17, 1024, %s8506_s24, %s5077_s29, %s6821_s16, %s6821_s16, %s6822_s18  }
 0x4ef PF: > { %s8661_s21 = sld [smem:[#allocation17_spill]]  ;;  %s8662_s8 = sld [smem:[#allocation18_spill]] }
 0x4f0   : > { %p8664_p1 = scmp.ge.s32.totalorder %s6809_s28, 2 }
 0x4f5   : > { %s5105_s19 = sand.u32 1, %s8661_s21   ;;  %p8663_p12 = scmp.ne.s32.totalorder %s8662_s8, 0 }
 0x4f6   : > { %s5106_s20 = scalar_lea.sflag [#allocation5], %s5105_s19 }
 0x4f7   : > { %p6355_p2 = pnand %p8664_p1, %p8663_p12 }
 0x4f9   : > { %6792 = dma.done.wait (!%p6355_p2), %s5106_s20, 1024  }
 0x4fa   : > { %6794 = vsyncadd (!%p6355_p2), %s5106_s20, 4294966272  ;;  %p28_p13 = scmp.ge.s32.totalorder %s7054_s13, 4   ;;  %s8665_s25 = smov %s6801_s26 }
 0x4fb   : > { %s8666_s26 = smov %s6805_s27  ;;  %s8667_s27 = smov %s7070_s30 }
 0x4fc   : > { %s8668_s28 = smov %s7054_s13  ;;  %30 = sbr.rel (!%p28_p13) target bundleno = 13 (0xd), region = 135 }
 0x503   :  { %5111 = vsyncpa [#allocation4], 1 }
 0x504   :  { %5113 = vsyncpa [#allocation4 + $0x1], 1 }
 0x505   :  { %5114 = vsyncpa [#allocation7], 1 }
 0x506   :  { %5115 = vsyncpa [#allocation10], 1 }
 0x507   :  { %5116 = vsyncpa [#allocation5], 1 }
 0x508   :  { %5118 = vsyncpa [#allocation5 + $0x1], 1 }

</bundles_post_ra>
